<compile_context>
chip_gen: v6e
topology: v6e:2x2x1
jax: 0.10.0
libtpu: 0.0.40
codegen_flags: <defaults>
</compile_context>

<pallas_src>
import math
import functools

import jax
import jax.numpy as jnp
from jax.experimental import pallas as pl
from jax.experimental.pallas import tpu as pltpu


LANE = 128  # lane-dense padded width for packed vectors / classifier output

CFG = dict(
    vocab=50,
    max_pos=16,
    type_vocab=2,
    hidden=32,
    heads=4,
    intermediate=64,
    layers=2,
    num_classes=5,
)


def _round_up(x, m):
    return ((x + m - 1) // m) * m


# ----------------------------------------------------------------------------
# Fused kernel: one-hot embedding gather -> emb-LN -> L x (QKV -> attention ->
# out-proj -> add&LN -> FFN(GELU) -> add&LN) -> classifier on full slab.
# All activations stay resident in VMEM/vregs; one pallas_call per forward.
# ----------------------------------------------------------------------------

def _fused_news_model_kernel(
    tok_ref,      # (B*S, 3) int32: [word_id, V+pos, V+P+type_id]
    mask_ref,     # (B, S)   int32 attention mask (1 = keep)
    emb_tbl_ref,  # (n_emb_rows, H) stacked word/pos/type embedding table
    w_ref,        # (4L+1, 64, 128) padded weight stack
    vec_ref,      # (n_vec_rows, 128) packed biases / LN gammas / betas
    out_ref,      # (B*S, 128) padded logits slab
    ctx_ref,      # VMEM scratch (B*S, H): per-head attention context
    *, B, S, H, nh, I, L, n_emb_rows):
    dh = H // nh
    scale = 1.0 / math.sqrt(dh)
    BS = B * S

    vecs = vec_ref[...]                                   # (n_vec_rows, 128)

    def vrow(i, w):
        return vecs[i:i + 1, :w]                          # (1, w) broadcast row

    def layer_norm(x, g, b):
        mean = jnp.mean(x, axis=-1, keepdims=True)
        cen = x - mean
        var = jnp.mean(cen * cen, axis=-1, keepdims=True)
        return cen * jax.lax.rsqrt(var + 1e-12) * g + b   # BERT LayerNorm eps

    def softmax_rows(s):
        s = s - jnp.max(s, axis=-1, keepdims=True)
        p = jnp.exp(s)
        return p / jnp.sum(p, axis=-1, keepdims=True)     # exact normalization

    def gelu(h):
        # TODO(synk): HF BERT default activation is exact erf-GELU; tanh approx used here.
        return 0.5 * h * (1.0 + jnp.tanh(0.7978845608028654 * (h + 0.044715 * h * h * h)))

    # --- fused embedding lookup: single one-hot MXU gather of word+pos+type ---
    tok = tok_ref[...]                                                     # (BS, 3)
    col = jax.lax.broadcasted_iota(jnp.int32, (BS, n_emb_rows), 1)
    onehot = ((col == tok[:, 0:1]) | (col == tok[:, 1:2])
              | (col == tok[:, 2:3])).astype(jnp.float32)                  # (BS, n_emb_rows)
    emb = jnp.dot(onehot, emb_tbl_ref[...], preferred_element_type=jnp.float32)  # (BS, H)
    x = layer_norm(emb, vrow(0, H), vrow(1, H))

    # additive attention mask, computed in-kernel: (1 - mask) * -10000
    amask = (1.0 - mask_ref[...].astype(jnp.float32)) * -10000.0           # (B, S)

    for l in range(L):
        wbase, vbase = 4 * l, 2 + 8 * l
        qkv_w = w_ref[wbase + 0][:H, :3 * H]
        o_w = w_ref[wbase + 1][:H, :H]
        i_w = w_ref[wbase + 2][:H, :I]
        f_w = w_ref[wbase + 3][:I, :H]

        # Fused QKV projection: one MXU pass with N = 3H (lane-dense 96-wide).
        qkv = (jnp.dot(x, qkv_w, preferred_element_type=jnp.float32)
               + vrow(vbase + 0, 3 * H))                                   # (BS, 3H)

        # Per-(batch, head) attention on static 2-D slices; results written
        # directly into the VMEM scratch at static offsets (no concatenates).
        for b in range(B):
            r0 = b * S
            for h in range(nh):
                c0 = h * dh
                q_bh = qkv[r0:r0 + S, c0:c0 + dh]                          # (S, dh)
                k_bh = qkv[r0:r0 + S, H + c0:H + c0 + dh]
                v_bh = qkv[r0:r0 + S, 2 * H + c0:2 * H + c0 + dh]
                s = pl.dot(q_bh, k_bh, trans_b=True) * scale               # (S, S)
                s = s + amask[b:b + 1, :]
                p = softmax_rows(s)
                ctx_ref[r0:r0 + S, c0:c0 + dh] = jnp.dot(
                    p, v_bh, preferred_element_type=jnp.float32)

        # Output projection + residual + LayerNorm (dropout = identity at inference).
        attn_out = (jnp.dot(ctx_ref[...], o_w, preferred_element_type=jnp.float32)
                    + vrow(vbase + 1, H))
        x = layer_norm(attn_out + x, vrow(vbase + 2, H), vrow(vbase + 3, H))

        # FFN: intermediate (GELU) -> output -> residual -> LayerNorm.
        inter = gelu(jnp.dot(x, i_w, preferred_element_type=jnp.float32)
                     + vrow(vbase + 4, I))
        ffn_out = (jnp.dot(inter, f_w, preferred_element_type=jnp.float32)
                   + vrow(vbase + 5, H))
        x = layer_norm(ffn_out + x, vrow(vbase + 6, H), vrow(vbase + 7, H))

    # Classifier over the FULL (BS, H) slab -> lane-dense (BS, 128) store.
    # CLS rows (b*S) and the :num_classes slice are taken host-side.
    # nn.Dropout(0.5): identity at inference.
    cls_w = w_ref[4 * L][:H, :]                                            # (H, 128)
    cls_b = vrow(2 + 8 * L, LANE)                                          # (1, 128)
    out_ref[...] = (jnp.dot(x, cls_w, preferred_element_type=jnp.float32) + cls_b)


# ----------------------------------------------------------------------------
# pallas_call wrapper (full-array blocks, trivial grid, 5 inputs total)
# ----------------------------------------------------------------------------

def _vspec(shape):
    zeros = (0,) * len(shape)
    return pl.BlockSpec(tuple(shape), lambda i, _z=zeros: _z)


def fused_news_model(packed, tok, mask, cfg, B, S):
    H, nh, L, I = cfg["hidden"], cfg["heads"], cfg["layers"], cfg["intermediate"]
    n_emb_rows = packed["emb_table"].shape[0]
    kernel = functools.partial(
        _fused_news_model_kernel,
        B=B, S=S, H=H, nh=nh, I=I, L=L, n_emb_rows=n_emb_rows)
    inputs = (tok, mask, packed["emb_table"], packed["weights"], packed["vecs"])
    return pl.pallas_call(
        kernel,
        grid=(1,),
        in_specs=[_vspec(t.shape) for t in inputs],
        out_specs=_vspec((B * S, LANE)),
        out_shape=jax.ShapeDtypeStruct((B * S, LANE), jnp.float32),
        scratch_shapes=[pltpu.VMEM((B * S, H), jnp.float32)],
        compiler_params=pltpu.CompilerParams(dimension_semantics=("arbitrary",)),
    )(*inputs)


# ----------------------------------------------------------------------------
# Model config / parameters (deterministic synthetic init)
# ----------------------------------------------------------------------------

def init_params(key, cfg):
    std = 0.02  # BERT initializer_range
    keys = iter(jax.random.split(key, 256))

    def norm(shape, s=std):
        return (s * jax.random.normal(next(keys), shape)).astype(jnp.float32)

    H, I = cfg["hidden"], cfg["intermediate"]
    params = {
        "word_emb": norm((cfg["vocab"], H)),
        "pos_emb": norm((cfg["max_pos"], H)),
        "type_emb": norm((cfg["type_vocab"], H)),
        "emb_ln_g": jnp.ones((H,), jnp.float32),
        "emb_ln_b": jnp.zeros((H,), jnp.float32),
        "layers": [],
    }
    for _ in range(cfg["layers"]):
        layer = {
            # weights stored (in, out) == PyTorch nn.Linear weight transposed
            "q_w": norm((H, H)), "q_b": jnp.zeros((H,), jnp.float32),
            "k_w": norm((H, H)), "k_b": jnp.zeros((H,), jnp.float32),
            "v_w": norm((H, H)), "v_b": jnp.zeros((H,), jnp.float32),
            "o_w": norm((H, H)), "o_b": jnp.zeros((H,), jnp.float32),
            "ln1_g": jnp.ones((H,), jnp.float32), "ln1_b": jnp.zeros((H,), jnp.float32),
            "i_w": norm((H, I)), "i_b": jnp.zeros((I,), jnp.float32),
            "f_w": norm((I, H)), "f_b": jnp.zeros((H,), jnp.float32),
            "ln2_g": jnp.ones((H,), jnp.float32), "ln2_b": jnp.zeros((H,), jnp.float32),
        }
        params["layers"].append(layer)

    # classifier: nn.Linear(hidden, 5) with xavier_normal_ weight init
    xav_std = math.sqrt(2.0 / (H + cfg["num_classes"]))
    params["cls_w"] = norm((H, cfg["num_classes"]), s=xav_std)
    params["cls_b"] = jnp.zeros((cfg["num_classes"],), jnp.float32)
    return params


def pack_params(params, cfg):
    """Pack everything into three dense tensors (done once, outside jit):
       emb_table  (n_emb_rows, H)    stacked word/pos/type embeddings
       weights    (4L+1, 64, 128)    padded per-layer weight stack + classifier
       vecs       (n_vec_rows, 128)  all biases / LN gammas / betas, lane-padded
    """
    H, I, L = cfg["hidden"], cfg["intermediate"], cfg["layers"]
    V, P, T = cfg["vocab"], cfg["max_pos"], cfg["type_vocab"]
    NC = cfg["num_classes"]
    layers = params["layers"]

    n_emb_rows = _round_up(V + P + T, 8)
    emb_table = jnp.zeros((n_emb_rows, H), jnp.float32)
    emb_table = emb_table.at[:V].set(params["word_emb"])
    emb_table = emb_table.at[V:V + P].set(params["pos_emb"])
    emb_table = emb_table.at[V + P:V + P + T].set(params["type_emb"])

    weights = jnp.zeros((4 * L + 1, 64, LANE), jnp.float32)
    for l, lyr in enumerate(layers):
        qkv_w = jnp.concatenate([lyr["q_w"], lyr["k_w"], lyr["v_w"]], axis=1)  # (H, 3H)
        weights = weights.at[4 * l + 0, :H, :3 * H].set(qkv_w)
        weights = weights.at[4 * l + 1, :H, :H].set(lyr["o_w"])
        weights = weights.at[4 * l + 2, :H, :I].set(lyr["i_w"])
        weights = weights.at[4 * l + 3, :I, :H].set(lyr["f_w"])
    weights = weights.at[4 * L, :H, :NC].set(params["cls_w"])

    n_vec_rows = _round_up(2 + 8 * L + 1, 8)
    vecs = jnp.zeros((n_vec_rows, LANE), jnp.float32)
    vecs = vecs.at[0, :H].set(params["emb_ln_g"])
    vecs = vecs.at[1, :H].set(params["emb_ln_b"])
    for l, lyr in enumerate(layers):
        base = 2 + 8 * l
        qkv_b = jnp.concatenate([lyr["q_b"], lyr["k_b"], lyr["v_b"]])
        vecs = vecs.at[base + 0, :3 * H].set(qkv_b)
        vecs = vecs.at[base + 1, :H].set(lyr["o_b"])
        vecs = vecs.at[base + 2, :H].set(lyr["ln1_g"])
        vecs = vecs.at[base + 3, :H].set(lyr["ln1_b"])
        vecs = vecs.at[base + 4, :I].set(lyr["i_b"])
        vecs = vecs.at[base + 5, :H].set(lyr["f_b"])
        vecs = vecs.at[base + 6, :H].set(lyr["ln2_g"])
        vecs = vecs.at[base + 7, :H].set(lyr["ln2_b"])
    vecs = vecs.at[2 + 8 * L, :NC].set(params["cls_b"])

    return {"emb_table": emb_table, "weights": weights, "vecs": vecs}


# ----------------------------------------------------------------------------
# Forward pass (NewsModel.forward): everything after index packing is in-kernel
# ----------------------------------------------------------------------------

def news_model_forward(packed, input_ids, attention_masks, token_type_ids, cfg=CFG):
    B, S = input_ids.shape
    V, P = cfg["vocab"], cfg["max_pos"]

    # Tiny (B*S, 3) int32 index tensor [word_id, V+pos, V+P+type_id]; the actual
    # embedding gather / mask arithmetic happens inside the fused kernel.
    pos_ids = jnp.tile(jnp.arange(S, dtype=jnp.int32), (B,))
    tok = jnp.stack(
        [input_ids.reshape(-1).astype(jnp.int32),
         V + pos_ids,
         V + P + token_type_ids.reshape(-1).astype(jnp.int32)], axis=1)
    mask = attention_masks.astype(jnp.int32)

    out = fused_news_model(packed, tok, mask, cfg, B, S)      # (B*S, 128)
    # CLS rows are b*S of the batch-major slab; pad columns are exact zeros.
    return out[::S, :cfg["num_classes"]]                       # (B, num_classes)


# ----------------------------------------------------------------------------
# Driver
# ----------------------------------------------------------------------------

if __name__ == "__main__":
    key = jax.random.PRNGKey(0)
    pkey, ikey, tkey = jax.random.split(key, 3)

    params = init_params(pkey, CFG)
    packed = pack_params(params, CFG)

    B, S = 2, 8
    input_ids = jax.random.randint(ikey, (B, S), 0, CFG["vocab"], dtype=jnp.int32)
    # mask out the last two tokens of the second sequence
    attention_masks = jnp.array(
        [[1, 1, 1, 1, 1, 1, 1, 1],
         [1, 1, 1, 1, 1, 1, 0, 0]], dtype=jnp.int32)
    token_type_ids = jax.random.randint(tkey, (B, S), 0, CFG["type_vocab"], dtype=jnp.int32)

    fwd = jax.jit(functools.partial(news_model_forward, cfg=CFG))
    logits = fwd(packed, input_ids, attention_masks, token_type_ids)
    jax.block_until_ready(logits)

    assert logits.shape == (B, CFG["num_classes"])
    assert logits.dtype == jnp.float32
    print("KERNEL_OK")
</pallas_src>

<mosaic_0001>
module attributes {stable_mosaic.version = 11 : i64} {
  func.func @_fused_news_model_kernel(%arg0: i32, %arg1: memref<16x3xi32, #tpu.memory_space<vmem>>, %arg2: memref<2x8xi32, #tpu.memory_space<vmem>>, %arg3: memref<72x32xf32, #tpu.memory_space<vmem>>, %arg4: memref<9x64x128xf32, #tpu.memory_space<vmem>>, %arg5: memref<24x128xf32, #tpu.memory_space<vmem>>, %arg6: memref<16x128xf32, #tpu.memory_space<vmem>>, %arg7: memref<16x32xf32, #tpu.memory_space<vmem>>) attributes {dimension_semantics = [#tpu.dimension_semantics<arbitrary>], iteration_bounds = array<i64: 1>, scalar_prefetch = 0 : i64, scratch_operands = 1 : i64, tpu.core_type = #tpu.core_type<tc>, window_params = [{pipeline_mode = #tpu.pipeline_mode<synchronous>, transform_indices = @transform_0, window_bounds = array<i64: 16, 3>}, {pipeline_mode = #tpu.pipeline_mode<synchronous>, transform_indices = @transform_1, window_bounds = array<i64: 2, 8>}, {pipeline_mode = #tpu.pipeline_mode<synchronous>, transform_indices = @transform_2, window_bounds = array<i64: 72, 32>}, {pipeline_mode = #tpu.pipeline_mode<synchronous>, transform_indices = @transform_3, window_bounds = array<i64: 9, 64, 128>}, {pipeline_mode = #tpu.pipeline_mode<synchronous>, transform_indices = @transform_4, window_bounds = array<i64: 24, 128>}, {pipeline_mode = #tpu.pipeline_mode<synchronous>, transform_indices = @transform_5, window_bounds = array<i64: 16, 128>}]} {
    %c0 = arith.constant 0 : index
    %c0_0 = arith.constant 0 : index
    %0 = vector.load %arg5[%c0, %c0_0] : memref<24x128xf32, #tpu.memory_space<vmem>>, vector<24x128xf32>
    %c0_1 = arith.constant 0 : index
    %c0_2 = arith.constant 0 : index
    %1 = vector.load %arg1[%c0_1, %c0_2] : memref<16x3xi32, #tpu.memory_space<vmem>>, vector<16x3xi32>
    %2 = tpu.iota {dimensions = array<i32: 1>} : vector<16x72xi32>
    %3 = vector.extract_strided_slice %1 {offsets = [0, 0], sizes = [16, 1], strides = [1, 1]} : vector<16x3xi32> to vector<16x1xi32>
    %4 = vector.broadcast %3 : vector<16x1xi32> to vector<16x72xi32>
    %5 = arith.cmpi eq, %2, %4 : vector<16x72xi32>
    %6 = vector.extract_strided_slice %1 {offsets = [0, 1], sizes = [16, 1], strides = [1, 1]} : vector<16x3xi32> to vector<16x1xi32>
    %7 = vector.broadcast %6 : vector<16x1xi32> to vector<16x72xi32>
    %8 = arith.cmpi eq, %2, %7 : vector<16x72xi32>
    %9 = arith.ori %5, %8 : vector<16x72xi1>
    %10 = vector.extract_strided_slice %1 {offsets = [0, 2], sizes = [16, 1], strides = [1, 1]} : vector<16x3xi32> to vector<16x1xi32>
    %11 = vector.broadcast %10 : vector<16x1xi32> to vector<16x72xi32>
    %12 = arith.cmpi eq, %2, %11 : vector<16x72xi32>
    %13 = arith.ori %9, %12 : vector<16x72xi1>
    %14 = arith.extui %13 : vector<16x72xi1> to vector<16x72xi32>
    %15 = arith.sitofp %14 : vector<16x72xi32> to vector<16x72xf32>
    %c0_3 = arith.constant 0 : index
    %c0_4 = arith.constant 0 : index
    %16 = vector.load %arg3[%c0_3, %c0_4] : memref<72x32xf32, #tpu.memory_space<vmem>>, vector<72x32xf32>
    %cst = arith.constant dense<0.000000e+00> : vector<16x32xf32>
    %17 = tpu.matmul %15, %16, %cst {dimension_numbers = #tpu.dot_dimension_numbers<[1], [0], [0], [1], [0, 0, 1, 1], [], []>} : vector<16x72xf32>, vector<72x32xf32>, vector<16x32xf32> -> vector<16x32xf32>
    %18 = vector.extract_strided_slice %0 {offsets = [0, 0], sizes = [1, 32], strides = [1, 1]} : vector<24x128xf32> to vector<1x32xf32>
    %19 = vector.extract_strided_slice %0 {offsets = [1, 0], sizes = [1, 32], strides = [1, 1]} : vector<24x128xf32> to vector<1x32xf32>
    %cst_5 = arith.constant dense<0.000000e+00> : vector<16xf32>
    %20 = vector.multi_reduction <add>, %17, %cst_5 [1] : vector<16x32xf32> to vector<16xf32>
    %21 = vector.shape_cast %20 : vector<16xf32> to vector<16x1xf32>
    %cst_6 = arith.constant 3.200000e+01 : f32
    %22 = vector.broadcast %cst_6 : f32 to vector<16x1xf32>
    %23 = arith.divf %21, %22 : vector<16x1xf32>
    %24 = vector.broadcast %23 : vector<16x1xf32> to vector<16x32xf32>
    %25 = arith.subf %17, %24 : vector<16x32xf32>
    %26 = arith.mulf %25, %25 : vector<16x32xf32>
    %cst_7 = arith.constant dense<0.000000e+00> : vector<16xf32>
    %27 = vector.multi_reduction <add>, %26, %cst_7 [1] : vector<16x32xf32> to vector<16xf32>
    %28 = vector.shape_cast %27 : vector<16xf32> to vector<16x1xf32>
    %cst_8 = arith.constant 3.200000e+01 : f32
    %29 = vector.broadcast %cst_8 : f32 to vector<16x1xf32>
    %30 = arith.divf %28, %29 : vector<16x1xf32>
    %cst_9 = arith.constant 9.99999996E-13 : f32
    %31 = vector.broadcast %cst_9 : f32 to vector<16x1xf32>
    %32 = arith.addf %30, %31 : vector<16x1xf32>
    %33 = math.rsqrt %32 : vector<16x1xf32>
    %34 = vector.broadcast %33 : vector<16x1xf32> to vector<16x32xf32>
    %35 = arith.mulf %25, %34 : vector<16x32xf32>
    %36 = vector.broadcast %18 : vector<1x32xf32> to vector<16x32xf32>
    %37 = arith.mulf %35, %36 : vector<16x32xf32>
    %38 = vector.broadcast %19 : vector<1x32xf32> to vector<16x32xf32>
    %39 = arith.addf %37, %38 : vector<16x32xf32>
    %c0_10 = arith.constant 0 : index
    %c0_11 = arith.constant 0 : index
    %40 = vector.load %arg2[%c0_10, %c0_11] : memref<2x8xi32, #tpu.memory_space<vmem>>, vector<2x8xi32>
    %41 = arith.sitofp %40 : vector<2x8xi32> to vector<2x8xf32>
    %cst_12 = arith.constant 1.000000e+00 : f32
    %42 = vector.broadcast %cst_12 : f32 to vector<2x8xf32>
    %43 = arith.subf %42, %41 : vector<2x8xf32>
    %cst_13 = arith.constant -1.000000e+04 : f32
    %44 = vector.broadcast %cst_13 : f32 to vector<2x8xf32>
    %45 = arith.mulf %43, %44 : vector<2x8xf32>
    %c0_14 = arith.constant 0 : index
    %c0_15 = arith.constant 0 : index
    %c0_16 = arith.constant 0 : index
    %46 = vector.load %arg4[%c0_14, %c0_15, %c0_16] : memref<9x64x128xf32, #tpu.memory_space<vmem>>, vector<1x64x128xf32>
    %47 = vector.shape_cast %46 : vector<1x64x128xf32> to vector<64x128xf32>
    %48 = vector.extract_strided_slice %47 {offsets = [0, 0], sizes = [32, 96], strides = [1, 1]} : vector<64x128xf32> to vector<32x96xf32>
    %c1 = arith.constant 1 : index
    %c0_17 = arith.constant 0 : index
    %c0_18 = arith.constant 0 : index
    %49 = vector.load %arg4[%c1, %c0_17, %c0_18] : memref<9x64x128xf32, #tpu.memory_space<vmem>>, vector<1x64x128xf32>
    %50 = vector.shape_cast %49 : vector<1x64x128xf32> to vector<64x128xf32>
    %51 = vector.extract_strided_slice %50 {offsets = [0, 0], sizes = [32, 32], strides = [1, 1]} : vector<64x128xf32> to vector<32x32xf32>
    %c2 = arith.constant 2 : index
    %c0_19 = arith.constant 0 : index
    %c0_20 = arith.constant 0 : index
    %52 = vector.load %arg4[%c2, %c0_19, %c0_20] : memref<9x64x128xf32, #tpu.memory_space<vmem>>, vector<1x64x128xf32>
    %53 = vector.shape_cast %52 : vector<1x64x128xf32> to vector<64x128xf32>
    %54 = vector.extract_strided_slice %53 {offsets = [0, 0], sizes = [32, 64], strides = [1, 1]} : vector<64x128xf32> to vector<32x64xf32>
    %c3 = arith.constant 3 : index
    %c0_21 = arith.constant 0 : index
    %c0_22 = arith.constant 0 : index
    %55 = vector.load %arg4[%c3, %c0_21, %c0_22] : memref<9x64x128xf32, #tpu.memory_space<vmem>>, vector<1x64x128xf32>
    %56 = vector.shape_cast %55 : vector<1x64x128xf32> to vector<64x128xf32>
    %57 = vector.extract_strided_slice %56 {offsets = [0, 0], sizes = [64, 32], strides = [1, 1]} : vector<64x128xf32> to vector<64x32xf32>
    %cst_23 = arith.constant dense<0.000000e+00> : vector<16x96xf32>
    %58 = tpu.matmul %39, %48, %cst_23 {dimension_numbers = #tpu.dot_dimension_numbers<[1], [0], [0], [1], [0, 0, 1, 1], [], []>} : vector<16x32xf32>, vector<32x96xf32>, vector<16x96xf32> -> vector<16x96xf32>
    %59 = vector.extract_strided_slice %0 {offsets = [2, 0], sizes = [1, 96], strides = [1, 1]} : vector<24x128xf32> to vector<1x96xf32>
    %60 = vector.broadcast %59 : vector<1x96xf32> to vector<16x96xf32>
    %61 = arith.addf %58, %60 : vector<16x96xf32>
    %62 = vector.extract_strided_slice %61 {offsets = [0, 0], sizes = [8, 8], strides = [1, 1]} : vector<16x96xf32> to vector<8x8xf32>
    %63 = vector.extract_strided_slice %61 {offsets = [0, 32], sizes = [8, 8], strides = [1, 1]} : vector<16x96xf32> to vector<8x8xf32>
    %64 = vector.extract_strided_slice %61 {offsets = [0, 64], sizes = [8, 8], strides = [1, 1]} : vector<16x96xf32> to vector<8x8xf32>
    %cst_24 = arith.constant dense<0.000000e+00> : vector<8x8xf32>
    %65 = tpu.matmul %62, %63, %cst_24 {dimension_numbers = #tpu.dot_dimension_numbers<[1], [1], [0], [0], [0, 0, 1, 0], [], []>} : vector<8x8xf32>, vector<8x8xf32>, vector<8x8xf32> -> vector<8x8xf32>
    %cst_25 = arith.constant 0.353553385 : f32
    %66 = vector.broadcast %cst_25 : f32 to vector<8x8xf32>
    %67 = arith.mulf %65, %66 : vector<8x8xf32>
    %68 = vector.extract_strided_slice %45 {offsets = [0, 0], sizes = [1, 8], strides = [1, 1]} : vector<2x8xf32> to vector<1x8xf32>
    %69 = vector.broadcast %68 : vector<1x8xf32> to vector<8x8xf32>
    %70 = arith.addf %67, %69 : vector<8x8xf32>
    %cst_26 = arith.constant dense<0xFF800000> : vector<8xf32>
    %71 = vector.multi_reduction <maximumf>, %70, %cst_26 [1] : vector<8x8xf32> to vector<8xf32>
    %72 = vector.shape_cast %71 : vector<8xf32> to vector<8x1xf32>
    %73 = vector.broadcast %72 : vector<8x1xf32> to vector<8x8xf32>
    %74 = arith.subf %70, %73 : vector<8x8xf32>
    %75 = math.exp %74 : vector<8x8xf32>
    %cst_27 = arith.constant dense<0.000000e+00> : vector<8xf32>
    %76 = vector.multi_reduction <add>, %75, %cst_27 [1] : vector<8x8xf32> to vector<8xf32>
    %77 = vector.shape_cast %76 : vector<8xf32> to vector<8x1xf32>
    %78 = vector.broadcast %77 : vector<8x1xf32> to vector<8x8xf32>
    %79 = arith.divf %75, %78 : vector<8x8xf32>
    %cst_28 = arith.constant dense<0.000000e+00> : vector<8x8xf32>
    %80 = tpu.matmul %79, %64, %cst_28 {dimension_numbers = #tpu.dot_dimension_numbers<[1], [0], [0], [1], [0, 0, 1, 1], [], []>} : vector<8x8xf32>, vector<8x8xf32>, vector<8x8xf32> -> vector<8x8xf32>
    %c0_29 = arith.constant 0 : index
    %c0_30 = arith.constant 0 : index
    %81 = vector.load %arg7[%c0_29, %c0_30] : memref<16x32xf32, #tpu.memory_space<vmem>>, vector<8x8xf32>
    tpu.vector_store %arg7[%c0_29, %c0_30], %80 {strides = array<i32>} : memref<16x32xf32, #tpu.memory_space<vmem>>, vector<8x8xf32>,
    %82 = vector.extract_strided_slice %61 {offsets = [0, 8], sizes = [8, 8], strides = [1, 1]} : vector<16x96xf32> to vector<8x8xf32>
    %83 = vector.extract_strided_slice %61 {offsets = [0, 40], sizes = [8, 8], strides = [1, 1]} : vector<16x96xf32> to vector<8x8xf32>
    %84 = vector.extract_strided_slice %61 {offsets = [0, 72], sizes = [8, 8], strides = [1, 1]} : vector<16x96xf32> to vector<8x8xf32>
    %cst_31 = arith.constant dense<0.000000e+00> : vector<8x8xf32>
    %85 = tpu.matmul %82, %83, %cst_31 {dimension_numbers = #tpu.dot_dimension_numbers<[1], [1], [0], [0], [0, 0, 1, 0], [], []>} : vector<8x8xf32>, vector<8x8xf32>, vector<8x8xf32> -> vector<8x8xf32>
    %cst_32 = arith.constant 0.353553385 : f32
    %86 = vector.broadcast %cst_32 : f32 to vector<8x8xf32>
    %87 = arith.mulf %85, %86 : vector<8x8xf32>
    %88 = vector.extract_strided_slice %45 {offsets = [0, 0], sizes = [1, 8], strides = [1, 1]} : vector<2x8xf32> to vector<1x8xf32>
    %89 = vector.broadcast %88 : vector<1x8xf32> to vector<8x8xf32>
    %90 = arith.addf %87, %89 : vector<8x8xf32>
    %cst_33 = arith.constant dense<0xFF800000> : vector<8xf32>
    %91 = vector.multi_reduction <maximumf>, %90, %cst_33 [1] : vector<8x8xf32> to vector<8xf32>
    %92 = vector.shape_cast %91 : vector<8xf32> to vector<8x1xf32>
    %93 = vector.broadcast %92 : vector<8x1xf32> to vector<8x8xf32>
    %94 = arith.subf %90, %93 : vector<8x8xf32>
    %95 = math.exp %94 : vector<8x8xf32>
    %cst_34 = arith.constant dense<0.000000e+00> : vector<8xf32>
    %96 = vector.multi_reduction <add>, %95, %cst_34 [1] : vector<8x8xf32> to vector<8xf32>
    %97 = vector.shape_cast %96 : vector<8xf32> to vector<8x1xf32>
    %98 = vector.broadcast %97 : vector<8x1xf32> to vector<8x8xf32>
    %99 = arith.divf %95, %98 : vector<8x8xf32>
    %cst_35 = arith.constant dense<0.000000e+00> : vector<8x8xf32>
    %100 = tpu.matmul %99, %84, %cst_35 {dimension_numbers = #tpu.dot_dimension_numbers<[1], [0], [0], [1], [0, 0, 1, 1], [], []>} : vector<8x8xf32>, vector<8x8xf32>, vector<8x8xf32> -> vector<8x8xf32>
    %c0_36 = arith.constant 0 : index
    %c8 = arith.constant 8 : index
    %101 = vector.load %arg7[%c0_36, %c8] : memref<16x32xf32, #tpu.memory_space<vmem>>, vector<8x8xf32>
    tpu.vector_store %arg7[%c0_36, %c8], %100 {strides = array<i32>} : memref<16x32xf32, #tpu.memory_space<vmem>>, vector<8x8xf32>,
    %102 = vector.extract_strided_slice %61 {offsets = [0, 16], sizes = [8, 8], strides = [1, 1]} : vector<16x96xf32> to vector<8x8xf32>
    %103 = vector.extract_strided_slice %61 {offsets = [0, 48], sizes = [8, 8], strides = [1, 1]} : vector<16x96xf32> to vector<8x8xf32>
    %104 = vector.extract_strided_slice %61 {offsets = [0, 80], sizes = [8, 8], strides = [1, 1]} : vector<16x96xf32> to vector<8x8xf32>
    %cst_37 = arith.constant dense<0.000000e+00> : vector<8x8xf32>
    %105 = tpu.matmul %102, %103, %cst_37 {dimension_numbers = #tpu.dot_dimension_numbers<[1], [1], [0], [0], [0, 0, 1, 0], [], []>} : vector<8x8xf32>, vector<8x8xf32>, vector<8x8xf32> -> vector<8x8xf32>
    %cst_38 = arith.constant 0.353553385 : f32
    %106 = vector.broadcast %cst_38 : f32 to vector<8x8xf32>
    %107 = arith.mulf %105, %106 : vector<8x8xf32>
    %108 = vector.extract_strided_slice %45 {offsets = [0, 0], sizes = [1, 8], strides = [1, 1]} : vector<2x8xf32> to vector<1x8xf32>
    %109 = vector.broadcast %108 : vector<1x8xf32> to vector<8x8xf32>
    %110 = arith.addf %107, %109 : vector<8x8xf32>
    %cst_39 = arith.constant dense<0xFF800000> : vector<8xf32>
    %111 = vector.multi_reduction <maximumf>, %110, %cst_39 [1] : vector<8x8xf32> to vector<8xf32>
    %112 = vector.shape_cast %111 : vector<8xf32> to vector<8x1xf32>
    %113 = vector.broadcast %112 : vector<8x1xf32> to vector<8x8xf32>
    %114 = arith.subf %110, %113 : vector<8x8xf32>
    %115 = math.exp %114 : vector<8x8xf32>
    %cst_40 = arith.constant dense<0.000000e+00> : vector<8xf32>
    %116 = vector.multi_reduction <add>, %115, %cst_40 [1] : vector<8x8xf32> to vector<8xf32>
    %117 = vector.shape_cast %116 : vector<8xf32> to vector<8x1xf32>
    %118 = vector.broadcast %117 : vector<8x1xf32> to vector<8x8xf32>
    %119 = arith.divf %115, %118 : vector<8x8xf32>
    %cst_41 = arith.constant dense<0.000000e+00> : vector<8x8xf32>
    %120 = tpu.matmul %119, %104, %cst_41 {dimension_numbers = #tpu.dot_dimension_numbers<[1], [0], [0], [1], [0, 0, 1, 1], [], []>} : vector<8x8xf32>, vector<8x8xf32>, vector<8x8xf32> -> vector<8x8xf32>
    %c0_42 = arith.constant 0 : index
    %c16 = arith.constant 16 : index
    %121 = vector.load %arg7[%c0_42, %c16] : memref<16x32xf32, #tpu.memory_space<vmem>>, vector<8x8xf32>
    tpu.vector_store %arg7[%c0_42, %c16], %120 {strides = array<i32>} : memref<16x32xf32, #tpu.memory_space<vmem>>, vector<8x8xf32>,
    %122 = vector.extract_strided_slice %61 {offsets = [0, 24], sizes = [8, 8], strides = [1, 1]} : vector<16x96xf32> to vector<8x8xf32>
    %123 = vector.extract_strided_slice %61 {offsets = [0, 56], sizes = [8, 8], strides = [1, 1]} : vector<16x96xf32> to vector<8x8xf32>
    %124 = vector.extract_strided_slice %61 {offsets = [0, 88], sizes = [8, 8], strides = [1, 1]} : vector<16x96xf32> to vector<8x8xf32>
    %cst_43 = arith.constant dense<0.000000e+00> : vector<8x8xf32>
    %125 = tpu.matmul %122, %123, %cst_43 {dimension_numbers = #tpu.dot_dimension_numbers<[1], [1], [0], [0], [0, 0, 1, 0], [], []>} : vector<8x8xf32>, vector<8x8xf32>, vector<8x8xf32> -> vector<8x8xf32>
    %cst_44 = arith.constant 0.353553385 : f32
    %126 = vector.broadcast %cst_44 : f32 to vector<8x8xf32>
    %127 = arith.mulf %125, %126 : vector<8x8xf32>
    %128 = vector.extract_strided_slice %45 {offsets = [0, 0], sizes = [1, 8], strides = [1, 1]} : vector<2x8xf32> to vector<1x8xf32>
    %129 = vector.broadcast %128 : vector<1x8xf32> to vector<8x8xf32>
    %130 = arith.addf %127, %129 : vector<8x8xf32>
    %cst_45 = arith.constant dense<0xFF800000> : vector<8xf32>
    %131 = vector.multi_reduction <maximumf>, %130, %cst_45 [1] : vector<8x8xf32> to vector<8xf32>
    %132 = vector.shape_cast %131 : vector<8xf32> to vector<8x1xf32>
    %133 = vector.broadcast %132 : vector<8x1xf32> to vector<8x8xf32>
    %134 = arith.subf %130, %133 : vector<8x8xf32>
    %135 = math.exp %134 : vector<8x8xf32>
    %cst_46 = arith.constant dense<0.000000e+00> : vector<8xf32>
    %136 = vector.multi_reduction <add>, %135, %cst_46 [1] : vector<8x8xf32> to vector<8xf32>
    %137 = vector.shape_cast %136 : vector<8xf32> to vector<8x1xf32>
    %138 = vector.broadcast %137 : vector<8x1xf32> to vector<8x8xf32>
    %139 = arith.divf %135, %138 : vector<8x8xf32>
    %cst_47 = arith.constant dense<0.000000e+00> : vector<8x8xf32>
    %140 = tpu.matmul %139, %124, %cst_47 {dimension_numbers = #tpu.dot_dimension_numbers<[1], [0], [0], [1], [0, 0, 1, 1], [], []>} : vector<8x8xf32>, vector<8x8xf32>, vector<8x8xf32> -> vector<8x8xf32>
    %c0_48 = arith.constant 0 : index
    %c24 = arith.constant 24 : index
    %141 = vector.load %arg7[%c0_48, %c24] : memref<16x32xf32, #tpu.memory_space<vmem>>, vector<8x8xf32>
    tpu.vector_store %arg7[%c0_48, %c24], %140 {strides = array<i32>} : memref<16x32xf32, #tpu.memory_space<vmem>>, vector<8x8xf32>,
    %142 = vector.extract_strided_slice %61 {offsets = [8, 0], sizes = [8, 8], strides = [1, 1]} : vector<16x96xf32> to vector<8x8xf32>
    %143 = vector.extract_strided_slice %61 {offsets = [8, 32], sizes = [8, 8], strides = [1, 1]} : vector<16x96xf32> to vector<8x8xf32>
    %144 = vector.extract_strided_slice %61 {offsets = [8, 64], sizes = [8, 8], strides = [1, 1]} : vector<16x96xf32> to vector<8x8xf32>
    %cst_49 = arith.constant dense<0.000000e+00> : vector<8x8xf32>
    %145 = tpu.matmul %142, %143, %cst_49 {dimension_numbers = #tpu.dot_dimension_numbers<[1], [1], [0], [0], [0, 0, 1, 0], [], []>} : vector<8x8xf32>, vector<8x8xf32>, vector<8x8xf32> -> vector<8x8xf32>
    %cst_50 = arith.constant 0.353553385 : f32
    %146 = vector.broadcast %cst_50 : f32 to vector<8x8xf32>
    %147 = arith.mulf %145, %146 : vector<8x8xf32>
    %148 = vector.extract_strided_slice %45 {offsets = [1, 0], sizes = [1, 8], strides = [1, 1]} : vector<2x8xf32> to vector<1x8xf32>
    %149 = vector.broadcast %148 : vector<1x8xf32> to vector<8x8xf32>
    %150 = arith.addf %147, %149 : vector<8x8xf32>
    %cst_51 = arith.constant dense<0xFF800000> : vector<8xf32>
    %151 = vector.multi_reduction <maximumf>, %150, %cst_51 [1] : vector<8x8xf32> to vector<8xf32>
    %152 = vector.shape_cast %151 : vector<8xf32> to vector<8x1xf32>
    %153 = vector.broadcast %152 : vector<8x1xf32> to vector<8x8xf32>
    %154 = arith.subf %150, %153 : vector<8x8xf32>
    %155 = math.exp %154 : vector<8x8xf32>
    %cst_52 = arith.constant dense<0.000000e+00> : vector<8xf32>
    %156 = vector.multi_reduction <add>, %155, %cst_52 [1] : vector<8x8xf32> to vector<8xf32>
    %157 = vector.shape_cast %156 : vector<8xf32> to vector<8x1xf32>
    %158 = vector.broadcast %157 : vector<8x1xf32> to vector<8x8xf32>
    %159 = arith.divf %155, %158 : vector<8x8xf32>
    %cst_53 = arith.constant dense<0.000000e+00> : vector<8x8xf32>
    %160 = tpu.matmul %159, %144, %cst_53 {dimension_numbers = #tpu.dot_dimension_numbers<[1], [0], [0], [1], [0, 0, 1, 1], [], []>} : vector<8x8xf32>, vector<8x8xf32>, vector<8x8xf32> -> vector<8x8xf32>
    %c8_54 = arith.constant 8 : index
    %c0_55 = arith.constant 0 : index
    %161 = vector.load %arg7[%c8_54, %c0_55] : memref<16x32xf32, #tpu.memory_space<vmem>>, vector<8x8xf32>
    tpu.vector_store %arg7[%c8_54, %c0_55], %160 {strides = array<i32>} : memref<16x32xf32, #tpu.memory_space<vmem>>, vector<8x8xf32>,
    %162 = vector.extract_strided_slice %61 {offsets = [8, 8], sizes = [8, 8], strides = [1, 1]} : vector<16x96xf32> to vector<8x8xf32>
    %163 = vector.extract_strided_slice %61 {offsets = [8, 40], sizes = [8, 8], strides = [1, 1]} : vector<16x96xf32> to vector<8x8xf32>
    %164 = vector.extract_strided_slice %61 {offsets = [8, 72], sizes = [8, 8], strides = [1, 1]} : vector<16x96xf32> to vector<8x8xf32>
    %cst_56 = arith.constant dense<0.000000e+00> : vector<8x8xf32>
    %165 = tpu.matmul %162, %163, %cst_56 {dimension_numbers = #tpu.dot_dimension_numbers<[1], [1], [0], [0], [0, 0, 1, 0], [], []>} : vector<8x8xf32>, vector<8x8xf32>, vector<8x8xf32> -> vector<8x8xf32>
    %cst_57 = arith.constant 0.353553385 : f32
    %166 = vector.broadcast %cst_57 : f32 to vector<8x8xf32>
    %167 = arith.mulf %165, %166 : vector<8x8xf32>
    %168 = vector.extract_strided_slice %45 {offsets = [1, 0], sizes = [1, 8], strides = [1, 1]} : vector<2x8xf32> to vector<1x8xf32>
    %169 = vector.broadcast %168 : vector<1x8xf32> to vector<8x8xf32>
    %170 = arith.addf %167, %169 : vector<8x8xf32>
    %cst_58 = arith.constant dense<0xFF800000> : vector<8xf32>
    %171 = vector.multi_reduction <maximumf>, %170, %cst_58 [1] : vector<8x8xf32> to vector<8xf32>
    %172 = vector.shape_cast %171 : vector<8xf32> to vector<8x1xf32>
    %173 = vector.broadcast %172 : vector<8x1xf32> to vector<8x8xf32>
    %174 = arith.subf %170, %173 : vector<8x8xf32>
    %175 = math.exp %174 : vector<8x8xf32>
    %cst_59 = arith.constant dense<0.000000e+00> : vector<8xf32>
    %176 = vector.multi_reduction <add>, %175, %cst_59 [1] : vector<8x8xf32> to vector<8xf32>
    %177 = vector.shape_cast %176 : vector<8xf32> to vector<8x1xf32>
    %178 = vector.broadcast %177 : vector<8x1xf32> to vector<8x8xf32>
    %179 = arith.divf %175, %178 : vector<8x8xf32>
    %cst_60 = arith.constant dense<0.000000e+00> : vector<8x8xf32>
    %180 = tpu.matmul %179, %164, %cst_60 {dimension_numbers = #tpu.dot_dimension_numbers<[1], [0], [0], [1], [0, 0, 1, 1], [], []>} : vector<8x8xf32>, vector<8x8xf32>, vector<8x8xf32> -> vector<8x8xf32>
    %c8_61 = arith.constant 8 : index
    %c8_62 = arith.constant 8 : index
    %181 = vector.load %arg7[%c8_61, %c8_62] : memref<16x32xf32, #tpu.memory_space<vmem>>, vector<8x8xf32>
    tpu.vector_store %arg7[%c8_61, %c8_62], %180 {strides = array<i32>} : memref<16x32xf32, #tpu.memory_space<vmem>>, vector<8x8xf32>,
    %182 = vector.extract_strided_slice %61 {offsets = [8, 16], sizes = [8, 8], strides = [1, 1]} : vector<16x96xf32> to vector<8x8xf32>
    %183 = vector.extract_strided_slice %61 {offsets = [8, 48], sizes = [8, 8], strides = [1, 1]} : vector<16x96xf32> to vector<8x8xf32>
    %184 = vector.extract_strided_slice %61 {offsets = [8, 80], sizes = [8, 8], strides = [1, 1]} : vector<16x96xf32> to vector<8x8xf32>
    %cst_63 = arith.constant dense<0.000000e+00> : vector<8x8xf32>
    %185 = tpu.matmul %182, %183, %cst_63 {dimension_numbers = #tpu.dot_dimension_numbers<[1], [1], [0], [0], [0, 0, 1, 0], [], []>} : vector<8x8xf32>, vector<8x8xf32>, vector<8x8xf32> -> vector<8x8xf32>
    %cst_64 = arith.constant 0.353553385 : f32
    %186 = vector.broadcast %cst_64 : f32 to vector<8x8xf32>
    %187 = arith.mulf %185, %186 : vector<8x8xf32>
    %188 = vector.extract_strided_slice %45 {offsets = [1, 0], sizes = [1, 8], strides = [1, 1]} : vector<2x8xf32> to vector<1x8xf32>
    %189 = vector.broadcast %188 : vector<1x8xf32> to vector<8x8xf32>
    %190 = arith.addf %187, %189 : vector<8x8xf32>
    %cst_65 = arith.constant dense<0xFF800000> : vector<8xf32>
    %191 = vector.multi_reduction <maximumf>, %190, %cst_65 [1] : vector<8x8xf32> to vector<8xf32>
    %192 = vector.shape_cast %191 : vector<8xf32> to vector<8x1xf32>
    %193 = vector.broadcast %192 : vector<8x1xf32> to vector<8x8xf32>
    %194 = arith.subf %190, %193 : vector<8x8xf32>
    %195 = math.exp %194 : vector<8x8xf32>
    %cst_66 = arith.constant dense<0.000000e+00> : vector<8xf32>
    %196 = vector.multi_reduction <add>, %195, %cst_66 [1] : vector<8x8xf32> to vector<8xf32>
    %197 = vector.shape_cast %196 : vector<8xf32> to vector<8x1xf32>
    %198 = vector.broadcast %197 : vector<8x1xf32> to vector<8x8xf32>
    %199 = arith.divf %195, %198 : vector<8x8xf32>
    %cst_67 = arith.constant dense<0.000000e+00> : vector<8x8xf32>
    %200 = tpu.matmul %199, %184, %cst_67 {dimension_numbers = #tpu.dot_dimension_numbers<[1], [0], [0], [1], [0, 0, 1, 1], [], []>} : vector<8x8xf32>, vector<8x8xf32>, vector<8x8xf32> -> vector<8x8xf32>
    %c8_68 = arith.constant 8 : index
    %c16_69 = arith.constant 16 : index
    %201 = vector.load %arg7[%c8_68, %c16_69] : memref<16x32xf32, #tpu.memory_space<vmem>>, vector<8x8xf32>
    tpu.vector_store %arg7[%c8_68, %c16_69], %200 {strides = array<i32>} : memref<16x32xf32, #tpu.memory_space<vmem>>, vector<8x8xf32>,
    %202 = vector.extract_strided_slice %61 {offsets = [8, 24], sizes = [8, 8], strides = [1, 1]} : vector<16x96xf32> to vector<8x8xf32>
    %203 = vector.extract_strided_slice %61 {offsets = [8, 56], sizes = [8, 8], strides = [1, 1]} : vector<16x96xf32> to vector<8x8xf32>
    %204 = vector.extract_strided_slice %61 {offsets = [8, 88], sizes = [8, 8], strides = [1, 1]} : vector<16x96xf32> to vector<8x8xf32>
    %cst_70 = arith.constant dense<0.000000e+00> : vector<8x8xf32>
    %205 = tpu.matmul %202, %203, %cst_70 {dimension_numbers = #tpu.dot_dimension_numbers<[1], [1], [0], [0], [0, 0, 1, 0], [], []>} : vector<8x8xf32>, vector<8x8xf32>, vector<8x8xf32> -> vector<8x8xf32>
    %cst_71 = arith.constant 0.353553385 : f32
    %206 = vector.broadcast %cst_71 : f32 to vector<8x8xf32>
    %207 = arith.mulf %205, %206 : vector<8x8xf32>
    %208 = vector.extract_strided_slice %45 {offsets = [1, 0], sizes = [1, 8], strides = [1, 1]} : vector<2x8xf32> to vector<1x8xf32>
    %209 = vector.broadcast %208 : vector<1x8xf32> to vector<8x8xf32>
    %210 = arith.addf %207, %209 : vector<8x8xf32>
    %cst_72 = arith.constant dense<0xFF800000> : vector<8xf32>
    %211 = vector.multi_reduction <maximumf>, %210, %cst_72 [1] : vector<8x8xf32> to vector<8xf32>
    %212 = vector.shape_cast %211 : vector<8xf32> to vector<8x1xf32>
    %213 = vector.broadcast %212 : vector<8x1xf32> to vector<8x8xf32>
    %214 = arith.subf %210, %213 : vector<8x8xf32>
    %215 = math.exp %214 : vector<8x8xf32>
    %cst_73 = arith.constant dense<0.000000e+00> : vector<8xf32>
    %216 = vector.multi_reduction <add>, %215, %cst_73 [1] : vector<8x8xf32> to vector<8xf32>
    %217 = vector.shape_cast %216 : vector<8xf32> to vector<8x1xf32>
    %218 = vector.broadcast %217 : vector<8x1xf32> to vector<8x8xf32>
    %219 = arith.divf %215, %218 : vector<8x8xf32>
    %cst_74 = arith.constant dense<0.000000e+00> : vector<8x8xf32>
    %220 = tpu.matmul %219, %204, %cst_74 {dimension_numbers = #tpu.dot_dimension_numbers<[1], [0], [0], [1], [0, 0, 1, 1], [], []>} : vector<8x8xf32>, vector<8x8xf32>, vector<8x8xf32> -> vector<8x8xf32>
    %c8_75 = arith.constant 8 : index
    %c24_76 = arith.constant 24 : index
    %221 = vector.load %arg7[%c8_75, %c24_76] : memref<16x32xf32, #tpu.memory_space<vmem>>, vector<8x8xf32>
    tpu.vector_store %arg7[%c8_75, %c24_76], %220 {strides = array<i32>} : memref<16x32xf32, #tpu.memory_space<vmem>>, vector<8x8xf32>,
    %c0_77 = arith.constant 0 : index
    %c0_78 = arith.constant 0 : index
    %222 = vector.load %arg7[%c0_77, %c0_78] : memref<16x32xf32, #tpu.memory_space<vmem>>, vector<16x32xf32>
    %cst_79 = arith.constant dense<0.000000e+00> : vector<16x32xf32>
    %223 = tpu.matmul %222, %51, %cst_79 {dimension_numbers = #tpu.dot_dimension_numbers<[1], [0], [0], [1], [0, 0, 1, 1], [], []>} : vector<16x32xf32>, vector<32x32xf32>, vector<16x32xf32> -> vector<16x32xf32>
    %224 = vector.extract_strided_slice %0 {offsets = [3, 0], sizes = [1, 32], strides = [1, 1]} : vector<24x128xf32> to vector<1x32xf32>
    %225 = vector.broadcast %224 : vector<1x32xf32> to vector<16x32xf32>
    %226 = arith.addf %223, %225 : vector<16x32xf32>
    %227 = arith.addf %226, %39 : vector<16x32xf32>
    %228 = vector.extract_strided_slice %0 {offsets = [4, 0], sizes = [1, 32], strides = [1, 1]} : vector<24x128xf32> to vector<1x32xf32>
    %229 = vector.extract_strided_slice %0 {offsets = [5, 0], sizes = [1, 32], strides = [1, 1]} : vector<24x128xf32> to vector<1x32xf32>
    %cst_80 = arith.constant dense<0.000000e+00> : vector<16xf32>
    %230 = vector.multi_reduction <add>, %227, %cst_80 [1] : vector<16x32xf32> to vector<16xf32>
    %231 = vector.shape_cast %230 : vector<16xf32> to vector<16x1xf32>
    %cst_81 = arith.constant 3.200000e+01 : f32
    %232 = vector.broadcast %cst_81 : f32 to vector<16x1xf32>
    %233 = arith.divf %231, %232 : vector<16x1xf32>
    %234 = vector.broadcast %233 : vector<16x1xf32> to vector<16x32xf32>
    %235 = arith.subf %227, %234 : vector<16x32xf32>
    %236 = arith.mulf %235, %235 : vector<16x32xf32>
    %cst_82 = arith.constant dense<0.000000e+00> : vector<16xf32>
    %237 = vector.multi_reduction <add>, %236, %cst_82 [1] : vector<16x32xf32> to vector<16xf32>
    %238 = vector.shape_cast %237 : vector<16xf32> to vector<16x1xf32>
    %cst_83 = arith.constant 3.200000e+01 : f32
    %239 = vector.broadcast %cst_83 : f32 to vector<16x1xf32>
    %240 = arith.divf %238, %239 : vector<16x1xf32>
    %cst_84 = arith.constant 9.99999996E-13 : f32
    %241 = vector.broadcast %cst_84 : f32 to vector<16x1xf32>
    %242 = arith.addf %240, %241 : vector<16x1xf32>
    %243 = math.rsqrt %242 : vector<16x1xf32>
    %244 = vector.broadcast %243 : vector<16x1xf32> to vector<16x32xf32>
    %245 = arith.mulf %235, %244 : vector<16x32xf32>
    %246 = vector.broadcast %228 : vector<1x32xf32> to vector<16x32xf32>
    %247 = arith.mulf %245, %246 : vector<16x32xf32>
    %248 = vector.broadcast %229 : vector<1x32xf32> to vector<16x32xf32>
    %249 = arith.addf %247, %248 : vector<16x32xf32>
    %cst_85 = arith.constant dense<0.000000e+00> : vector<16x64xf32>
    %250 = tpu.matmul %249, %54, %cst_85 {dimension_numbers = #tpu.dot_dimension_numbers<[1], [0], [0], [1], [0, 0, 1, 1], [], []>} : vector<16x32xf32>, vector<32x64xf32>, vector<16x64xf32> -> vector<16x64xf32>
    %251 = vector.extract_strided_slice %0 {offsets = [6, 0], sizes = [1, 64], strides = [1, 1]} : vector<24x128xf32> to vector<1x64xf32>
    %252 = vector.broadcast %251 : vector<1x64xf32> to vector<16x64xf32>
    %253 = arith.addf %250, %252 : vector<16x64xf32>
    %cst_86 = arith.constant 5.000000e-01 : f32
    %254 = vector.broadcast %cst_86 : f32 to vector<16x64xf32>
    %255 = arith.mulf %254, %253 : vector<16x64xf32>
    %cst_87 = arith.constant 4.471500e-02 : f32
    %256 = vector.broadcast %cst_87 : f32 to vector<16x64xf32>
    %257 = arith.mulf %256, %253 : vector<16x64xf32>
    %258 = arith.mulf %257, %253 : vector<16x64xf32>
    %259 = arith.mulf %258, %253 : vector<16x64xf32>
    %260 = arith.addf %253, %259 : vector<16x64xf32>
    %cst_88 = arith.constant 0.797884583 : f32
    %261 = vector.broadcast %cst_88 : f32 to vector<16x64xf32>
    %262 = arith.mulf %261, %260 : vector<16x64xf32>
    %263 = math.tanh %262 : vector<16x64xf32>
    %cst_89 = arith.constant 1.000000e+00 : f32
    %264 = vector.broadcast %cst_89 : f32 to vector<16x64xf32>
    %265 = arith.addf %264, %263 : vector<16x64xf32>
    %266 = arith.mulf %255, %265 : vector<16x64xf32>
    %cst_90 = arith.constant dense<0.000000e+00> : vector<16x32xf32>
    %267 = tpu.matmul %266, %57, %cst_90 {dimension_numbers = #tpu.dot_dimension_numbers<[1], [0], [0], [1], [0, 0, 1, 1], [], []>} : vector<16x64xf32>, vector<64x32xf32>, vector<16x32xf32> -> vector<16x32xf32>
    %268 = vector.extract_strided_slice %0 {offsets = [7, 0], sizes = [1, 32], strides = [1, 1]} : vector<24x128xf32> to vector<1x32xf32>
    %269 = vector.broadcast %268 : vector<1x32xf32> to vector<16x32xf32>
    %270 = arith.addf %267, %269 : vector<16x32xf32>
    %271 = arith.addf %270, %249 : vector<16x32xf32>
    %272 = vector.extract_strided_slice %0 {offsets = [8, 0], sizes = [1, 32], strides = [1, 1]} : vector<24x128xf32> to vector<1x32xf32>
    %273 = vector.extract_strided_slice %0 {offsets = [9, 0], sizes = [1, 32], strides = [1, 1]} : vector<24x128xf32> to vector<1x32xf32>
    %cst_91 = arith.constant dense<0.000000e+00> : vector<16xf32>
    %274 = vector.multi_reduction <add>, %271, %cst_91 [1] : vector<16x32xf32> to vector<16xf32>
    %275 = vector.shape_cast %274 : vector<16xf32> to vector<16x1xf32>
    %cst_92 = arith.constant 3.200000e+01 : f32
    %276 = vector.broadcast %cst_92 : f32 to vector<16x1xf32>
    %277 = arith.divf %275, %276 : vector<16x1xf32>
    %278 = vector.broadcast %277 : vector<16x1xf32> to vector<16x32xf32>
    %279 = arith.subf %271, %278 : vector<16x32xf32>
    %280 = arith.mulf %279, %279 : vector<16x32xf32>
    %cst_93 = arith.constant dense<0.000000e+00> : vector<16xf32>
    %281 = vector.multi_reduction <add>, %280, %cst_93 [1] : vector<16x32xf32> to vector<16xf32>
    %282 = vector.shape_cast %281 : vector<16xf32> to vector<16x1xf32>
    %cst_94 = arith.constant 3.200000e+01 : f32
    %283 = vector.broadcast %cst_94 : f32 to vector<16x1xf32>
    %284 = arith.divf %282, %283 : vector<16x1xf32>
    %cst_95 = arith.constant 9.99999996E-13 : f32
    %285 = vector.broadcast %cst_95 : f32 to vector<16x1xf32>
    %286 = arith.addf %284, %285 : vector<16x1xf32>
    %287 = math.rsqrt %286 : vector<16x1xf32>
    %288 = vector.broadcast %287 : vector<16x1xf32> to vector<16x32xf32>
    %289 = arith.mulf %279, %288 : vector<16x32xf32>
    %290 = vector.broadcast %272 : vector<1x32xf32> to vector<16x32xf32>
    %291 = arith.mulf %289, %290 : vector<16x32xf32>
    %292 = vector.broadcast %273 : vector<1x32xf32> to vector<16x32xf32>
    %293 = arith.addf %291, %292 : vector<16x32xf32>
    %c4 = arith.constant 4 : index
    %c0_96 = arith.constant 0 : index
    %c0_97 = arith.constant 0 : index
    %294 = vector.load %arg4[%c4, %c0_96, %c0_97] : memref<9x64x128xf32, #tpu.memory_space<vmem>>, vector<1x64x128xf32>
    %295 = vector.shape_cast %294 : vector<1x64x128xf32> to vector<64x128xf32>
    %296 = vector.extract_strided_slice %295 {offsets = [0, 0], sizes = [32, 96], strides = [1, 1]} : vector<64x128xf32> to vector<32x96xf32>
    %c5 = arith.constant 5 : index
    %c0_98 = arith.constant 0 : index
    %c0_99 = arith.constant 0 : index
    %297 = vector.load %arg4[%c5, %c0_98, %c0_99] : memref<9x64x128xf32, #tpu.memory_space<vmem>>, vector<1x64x128xf32>
    %298 = vector.shape_cast %297 : vector<1x64x128xf32> to vector<64x128xf32>
    %299 = vector.extract_strided_slice %298 {offsets = [0, 0], sizes = [32, 32], strides = [1, 1]} : vector<64x128xf32> to vector<32x32xf32>
    %c6 = arith.constant 6 : index
    %c0_100 = arith.constant 0 : index
    %c0_101 = arith.constant 0 : index
    %300 = vector.load %arg4[%c6, %c0_100, %c0_101] : memref<9x64x128xf32, #tpu.memory_space<vmem>>, vector<1x64x128xf32>
    %301 = vector.shape_cast %300 : vector<1x64x128xf32> to vector<64x128xf32>
    %302 = vector.extract_strided_slice %301 {offsets = [0, 0], sizes = [32, 64], strides = [1, 1]} : vector<64x128xf32> to vector<32x64xf32>
    %c7 = arith.constant 7 : index
    %c0_102 = arith.constant 0 : index
    %c0_103 = arith.constant 0 : index
    %303 = vector.load %arg4[%c7, %c0_102, %c0_103] : memref<9x64x128xf32, #tpu.memory_space<vmem>>, vector<1x64x128xf32>
    %304 = vector.shape_cast %303 : vector<1x64x128xf32> to vector<64x128xf32>
    %305 = vector.extract_strided_slice %304 {offsets = [0, 0], sizes = [64, 32], strides = [1, 1]} : vector<64x128xf32> to vector<64x32xf32>
    %cst_104 = arith.constant dense<0.000000e+00> : vector<16x96xf32>
    %306 = tpu.matmul %293, %296, %cst_104 {dimension_numbers = #tpu.dot_dimension_numbers<[1], [0], [0], [1], [0, 0, 1, 1], [], []>} : vector<16x32xf32>, vector<32x96xf32>, vector<16x96xf32> -> vector<16x96xf32>
    %307 = vector.extract_strided_slice %0 {offsets = [10, 0], sizes = [1, 96], strides = [1, 1]} : vector<24x128xf32> to vector<1x96xf32>
    %308 = vector.broadcast %307 : vector<1x96xf32> to vector<16x96xf32>
    %309 = arith.addf %306, %308 : vector<16x96xf32>
    %310 = vector.extract_strided_slice %309 {offsets = [0, 0], sizes = [8, 8], strides = [1, 1]} : vector<16x96xf32> to vector<8x8xf32>
    %311 = vector.extract_strided_slice %309 {offsets = [0, 32], sizes = [8, 8], strides = [1, 1]} : vector<16x96xf32> to vector<8x8xf32>
    %312 = vector.extract_strided_slice %309 {offsets = [0, 64], sizes = [8, 8], strides = [1, 1]} : vector<16x96xf32> to vector<8x8xf32>
    %cst_105 = arith.constant dense<0.000000e+00> : vector<8x8xf32>
    %313 = tpu.matmul %310, %311, %cst_105 {dimension_numbers = #tpu.dot_dimension_numbers<[1], [1], [0], [0], [0, 0, 1, 0], [], []>} : vector<8x8xf32>, vector<8x8xf32>, vector<8x8xf32> -> vector<8x8xf32>
    %cst_106 = arith.constant 0.353553385 : f32
    %314 = vector.broadcast %cst_106 : f32 to vector<8x8xf32>
    %315 = arith.mulf %313, %314 : vector<8x8xf32>
    %316 = vector.extract_strided_slice %45 {offsets = [0, 0], sizes = [1, 8], strides = [1, 1]} : vector<2x8xf32> to vector<1x8xf32>
    %317 = vector.broadcast %316 : vector<1x8xf32> to vector<8x8xf32>
    %318 = arith.addf %315, %317 : vector<8x8xf32>
    %cst_107 = arith.constant dense<0xFF800000> : vector<8xf32>
    %319 = vector.multi_reduction <maximumf>, %318, %cst_107 [1] : vector<8x8xf32> to vector<8xf32>
    %320 = vector.shape_cast %319 : vector<8xf32> to vector<8x1xf32>
    %321 = vector.broadcast %320 : vector<8x1xf32> to vector<8x8xf32>
    %322 = arith.subf %318, %321 : vector<8x8xf32>
    %323 = math.exp %322 : vector<8x8xf32>
    %cst_108 = arith.constant dense<0.000000e+00> : vector<8xf32>
    %324 = vector.multi_reduction <add>, %323, %cst_108 [1] : vector<8x8xf32> to vector<8xf32>
    %325 = vector.shape_cast %324 : vector<8xf32> to vector<8x1xf32>
    %326 = vector.broadcast %325 : vector<8x1xf32> to vector<8x8xf32>
    %327 = arith.divf %323, %326 : vector<8x8xf32>
    %cst_109 = arith.constant dense<0.000000e+00> : vector<8x8xf32>
    %328 = tpu.matmul %327, %312, %cst_109 {dimension_numbers = #tpu.dot_dimension_numbers<[1], [0], [0], [1], [0, 0, 1, 1], [], []>} : vector<8x8xf32>, vector<8x8xf32>, vector<8x8xf32> -> vector<8x8xf32>
    %c0_110 = arith.constant 0 : index
    %c0_111 = arith.constant 0 : index
    %329 = vector.load %arg7[%c0_110, %c0_111] : memref<16x32xf32, #tpu.memory_space<vmem>>, vector<8x8xf32>
    tpu.vector_store %arg7[%c0_110, %c0_111], %328 {strides = array<i32>} : memref<16x32xf32, #tpu.memory_space<vmem>>, vector<8x8xf32>,
    %330 = vector.extract_strided_slice %309 {offsets = [0, 8], sizes = [8, 8], strides = [1, 1]} : vector<16x96xf32> to vector<8x8xf32>
    %331 = vector.extract_strided_slice %309 {offsets = [0, 40], sizes = [8, 8], strides = [1, 1]} : vector<16x96xf32> to vector<8x8xf32>
    %332 = vector.extract_strided_slice %309 {offsets = [0, 72], sizes = [8, 8], strides = [1, 1]} : vector<16x96xf32> to vector<8x8xf32>
    %cst_112 = arith.constant dense<0.000000e+00> : vector<8x8xf32>
    %333 = tpu.matmul %330, %331, %cst_112 {dimension_numbers = #tpu.dot_dimension_numbers<[1], [1], [0], [0], [0, 0, 1, 0], [], []>} : vector<8x8xf32>, vector<8x8xf32>, vector<8x8xf32> -> vector<8x8xf32>
    %cst_113 = arith.constant 0.353553385 : f32
    %334 = vector.broadcast %cst_113 : f32 to vector<8x8xf32>
    %335 = arith.mulf %333, %334 : vector<8x8xf32>
    %336 = vector.extract_strided_slice %45 {offsets = [0, 0], sizes = [1, 8], strides = [1, 1]} : vector<2x8xf32> to vector<1x8xf32>
    %337 = vector.broadcast %336 : vector<1x8xf32> to vector<8x8xf32>
    %338 = arith.addf %335, %337 : vector<8x8xf32>
    %cst_114 = arith.constant dense<0xFF800000> : vector<8xf32>
    %339 = vector.multi_reduction <maximumf>, %338, %cst_114 [1] : vector<8x8xf32> to vector<8xf32>
    %340 = vector.shape_cast %339 : vector<8xf32> to vector<8x1xf32>
    %341 = vector.broadcast %340 : vector<8x1xf32> to vector<8x8xf32>
    %342 = arith.subf %338, %341 : vector<8x8xf32>
    %343 = math.exp %342 : vector<8x8xf32>
    %cst_115 = arith.constant dense<0.000000e+00> : vector<8xf32>
    %344 = vector.multi_reduction <add>, %343, %cst_115 [1] : vector<8x8xf32> to vector<8xf32>
    %345 = vector.shape_cast %344 : vector<8xf32> to vector<8x1xf32>
    %346 = vector.broadcast %345 : vector<8x1xf32> to vector<8x8xf32>
    %347 = arith.divf %343, %346 : vector<8x8xf32>
    %cst_116 = arith.constant dense<0.000000e+00> : vector<8x8xf32>
    %348 = tpu.matmul %347, %332, %cst_116 {dimension_numbers = #tpu.dot_dimension_numbers<[1], [0], [0], [1], [0, 0, 1, 1], [], []>} : vector<8x8xf32>, vector<8x8xf32>, vector<8x8xf32> -> vector<8x8xf32>
    %c0_117 = arith.constant 0 : index
    %c8_118 = arith.constant 8 : index
    %349 = vector.load %arg7[%c0_117, %c8_118] : memref<16x32xf32, #tpu.memory_space<vmem>>, vector<8x8xf32>
    tpu.vector_store %arg7[%c0_117, %c8_118], %348 {strides = array<i32>} : memref<16x32xf32, #tpu.memory_space<vmem>>, vector<8x8xf32>,
    %350 = vector.extract_strided_slice %309 {offsets = [0, 16], sizes = [8, 8], strides = [1, 1]} : vector<16x96xf32> to vector<8x8xf32>
    %351 = vector.extract_strided_slice %309 {offsets = [0, 48], sizes = [8, 8], strides = [1, 1]} : vector<16x96xf32> to vector<8x8xf32>
    %352 = vector.extract_strided_slice %309 {offsets = [0, 80], sizes = [8, 8], strides = [1, 1]} : vector<16x96xf32> to vector<8x8xf32>
    %cst_119 = arith.constant dense<0.000000e+00> : vector<8x8xf32>
    %353 = tpu.matmul %350, %351, %cst_119 {dimension_numbers = #tpu.dot_dimension_numbers<[1], [1], [0], [0], [0, 0, 1, 0], [], []>} : vector<8x8xf32>, vector<8x8xf32>, vector<8x8xf32> -> vector<8x8xf32>
    %cst_120 = arith.constant 0.353553385 : f32
    %354 = vector.broadcast %cst_120 : f32 to vector<8x8xf32>
    %355 = arith.mulf %353, %354 : vector<8x8xf32>
    %356 = vector.extract_strided_slice %45 {offsets = [0, 0], sizes = [1, 8], strides = [1, 1]} : vector<2x8xf32> to vector<1x8xf32>
    %357 = vector.broadcast %356 : vector<1x8xf32> to vector<8x8xf32>
    %358 = arith.addf %355, %357 : vector<8x8xf32>
    %cst_121 = arith.constant dense<0xFF800000> : vector<8xf32>
    %359 = vector.multi_reduction <maximumf>, %358, %cst_121 [1] : vector<8x8xf32> to vector<8xf32>
    %360 = vector.shape_cast %359 : vector<8xf32> to vector<8x1xf32>
    %361 = vector.broadcast %360 : vector<8x1xf32> to vector<8x8xf32>
    %362 = arith.subf %358, %361 : vector<8x8xf32>
    %363 = math.exp %362 : vector<8x8xf32>
    %cst_122 = arith.constant dense<0.000000e+00> : vector<8xf32>
    %364 = vector.multi_reduction <add>, %363, %cst_122 [1] : vector<8x8xf32> to vector<8xf32>
    %365 = vector.shape_cast %364 : vector<8xf32> to vector<8x1xf32>
    %366 = vector.broadcast %365 : vector<8x1xf32> to vector<8x8xf32>
    %367 = arith.divf %363, %366 : vector<8x8xf32>
    %cst_123 = arith.constant dense<0.000000e+00> : vector<8x8xf32>
    %368 = tpu.matmul %367, %352, %cst_123 {dimension_numbers = #tpu.dot_dimension_numbers<[1], [0], [0], [1], [0, 0, 1, 1], [], []>} : vector<8x8xf32>, vector<8x8xf32>, vector<8x8xf32> -> vector<8x8xf32>
    %c0_124 = arith.constant 0 : index
    %c16_125 = arith.constant 16 : index
    %369 = vector.load %arg7[%c0_124, %c16_125] : memref<16x32xf32, #tpu.memory_space<vmem>>, vector<8x8xf32>
    tpu.vector_store %arg7[%c0_124, %c16_125], %368 {strides = array<i32>} : memref<16x32xf32, #tpu.memory_space<vmem>>, vector<8x8xf32>,
    %370 = vector.extract_strided_slice %309 {offsets = [0, 24], sizes = [8, 8], strides = [1, 1]} : vector<16x96xf32> to vector<8x8xf32>
    %371 = vector.extract_strided_slice %309 {offsets = [0, 56], sizes = [8, 8], strides = [1, 1]} : vector<16x96xf32> to vector<8x8xf32>
    %372 = vector.extract_strided_slice %309 {offsets = [0, 88], sizes = [8, 8], strides = [1, 1]} : vector<16x96xf32> to vector<8x8xf32>
    %cst_126 = arith.constant dense<0.000000e+00> : vector<8x8xf32>
    %373 = tpu.matmul %370, %371, %cst_126 {dimension_numbers = #tpu.dot_dimension_numbers<[1], [1], [0], [0], [0, 0, 1, 0], [], []>} : vector<8x8xf32>, vector<8x8xf32>, vector<8x8xf32> -> vector<8x8xf32>
    %cst_127 = arith.constant 0.353553385 : f32
    %374 = vector.broadcast %cst_127 : f32 to vector<8x8xf32>
    %375 = arith.mulf %373, %374 : vector<8x8xf32>
    %376 = vector.extract_strided_slice %45 {offsets = [0, 0], sizes = [1, 8], strides = [1, 1]} : vector<2x8xf32> to vector<1x8xf32>
    %377 = vector.broadcast %376 : vector<1x8xf32> to vector<8x8xf32>
    %378 = arith.addf %375, %377 : vector<8x8xf32>
    %cst_128 = arith.constant dense<0xFF800000> : vector<8xf32>
    %379 = vector.multi_reduction <maximumf>, %378, %cst_128 [1] : vector<8x8xf32> to vector<8xf32>
    %380 = vector.shape_cast %379 : vector<8xf32> to vector<8x1xf32>
    %381 = vector.broadcast %380 : vector<8x1xf32> to vector<8x8xf32>
    %382 = arith.subf %378, %381 : vector<8x8xf32>
    %383 = math.exp %382 : vector<8x8xf32>
    %cst_129 = arith.constant dense<0.000000e+00> : vector<8xf32>
    %384 = vector.multi_reduction <add>, %383, %cst_129 [1] : vector<8x8xf32> to vector<8xf32>
    %385 = vector.shape_cast %384 : vector<8xf32> to vector<8x1xf32>
    %386 = vector.broadcast %385 : vector<8x1xf32> to vector<8x8xf32>
    %387 = arith.divf %383, %386 : vector<8x8xf32>
    %cst_130 = arith.constant dense<0.000000e+00> : vector<8x8xf32>
    %388 = tpu.matmul %387, %372, %cst_130 {dimension_numbers = #tpu.dot_dimension_numbers<[1], [0], [0], [1], [0, 0, 1, 1], [], []>} : vector<8x8xf32>, vector<8x8xf32>, vector<8x8xf32> -> vector<8x8xf32>
    %c0_131 = arith.constant 0 : index
    %c24_132 = arith.constant 24 : index
    %389 = vector.load %arg7[%c0_131, %c24_132] : memref<16x32xf32, #tpu.memory_space<vmem>>, vector<8x8xf32>
    tpu.vector_store %arg7[%c0_131, %c24_132], %388 {strides = array<i32>} : memref<16x32xf32, #tpu.memory_space<vmem>>, vector<8x8xf32>,
    %390 = vector.extract_strided_slice %309 {offsets = [8, 0], sizes = [8, 8], strides = [1, 1]} : vector<16x96xf32> to vector<8x8xf32>
    %391 = vector.extract_strided_slice %309 {offsets = [8, 32], sizes = [8, 8], strides = [1, 1]} : vector<16x96xf32> to vector<8x8xf32>
    %392 = vector.extract_strided_slice %309 {offsets = [8, 64], sizes = [8, 8], strides = [1, 1]} : vector<16x96xf32> to vector<8x8xf32>
    %cst_133 = arith.constant dense<0.000000e+00> : vector<8x8xf32>
    %393 = tpu.matmul %390, %391, %cst_133 {dimension_numbers = #tpu.dot_dimension_numbers<[1], [1], [0], [0], [0, 0, 1, 0], [], []>} : vector<8x8xf32>, vector<8x8xf32>, vector<8x8xf32> -> vector<8x8xf32>
    %cst_134 = arith.constant 0.353553385 : f32
    %394 = vector.broadcast %cst_134 : f32 to vector<8x8xf32>
    %395 = arith.mulf %393, %394 : vector<8x8xf32>
    %396 = vector.extract_strided_slice %45 {offsets = [1, 0], sizes = [1, 8], strides = [1, 1]} : vector<2x8xf32> to vector<1x8xf32>
    %397 = vector.broadcast %396 : vector<1x8xf32> to vector<8x8xf32>
    %398 = arith.addf %395, %397 : vector<8x8xf32>
    %cst_135 = arith.constant dense<0xFF800000> : vector<8xf32>
    %399 = vector.multi_reduction <maximumf>, %398, %cst_135 [1] : vector<8x8xf32> to vector<8xf32>
    %400 = vector.shape_cast %399 : vector<8xf32> to vector<8x1xf32>
    %401 = vector.broadcast %400 : vector<8x1xf32> to vector<8x8xf32>
    %402 = arith.subf %398, %401 : vector<8x8xf32>
    %403 = math.exp %402 : vector<8x8xf32>
    %cst_136 = arith.constant dense<0.000000e+00> : vector<8xf32>
    %404 = vector.multi_reduction <add>, %403, %cst_136 [1] : vector<8x8xf32> to vector<8xf32>
    %405 = vector.shape_cast %404 : vector<8xf32> to vector<8x1xf32>
    %406 = vector.broadcast %405 : vector<8x1xf32> to vector<8x8xf32>
    %407 = arith.divf %403, %406 : vector<8x8xf32>
    %cst_137 = arith.constant dense<0.000000e+00> : vector<8x8xf32>
    %408 = tpu.matmul %407, %392, %cst_137 {dimension_numbers = #tpu.dot_dimension_numbers<[1], [0], [0], [1], [0, 0, 1, 1], [], []>} : vector<8x8xf32>, vector<8x8xf32>, vector<8x8xf32> -> vector<8x8xf32>
    %c8_138 = arith.constant 8 : index
    %c0_139 = arith.constant 0 : index
    %409 = vector.load %arg7[%c8_138, %c0_139] : memref<16x32xf32, #tpu.memory_space<vmem>>, vector<8x8xf32>
    tpu.vector_store %arg7[%c8_138, %c0_139], %408 {strides = array<i32>} : memref<16x32xf32, #tpu.memory_space<vmem>>, vector<8x8xf32>,
    %410 = vector.extract_strided_slice %309 {offsets = [8, 8], sizes = [8, 8], strides = [1, 1]} : vector<16x96xf32> to vector<8x8xf32>
    %411 = vector.extract_strided_slice %309 {offsets = [8, 40], sizes = [8, 8], strides = [1, 1]} : vector<16x96xf32> to vector<8x8xf32>
    %412 = vector.extract_strided_slice %309 {offsets = [8, 72], sizes = [8, 8], strides = [1, 1]} : vector<16x96xf32> to vector<8x8xf32>
    %cst_140 = arith.constant dense<0.000000e+00> : vector<8x8xf32>
    %413 = tpu.matmul %410, %411, %cst_140 {dimension_numbers = #tpu.dot_dimension_numbers<[1], [1], [0], [0], [0, 0, 1, 0], [], []>} : vector<8x8xf32>, vector<8x8xf32>, vector<8x8xf32> -> vector<8x8xf32>
    %cst_141 = arith.constant 0.353553385 : f32
    %414 = vector.broadcast %cst_141 : f32 to vector<8x8xf32>
    %415 = arith.mulf %413, %414 : vector<8x8xf32>
    %416 = vector.extract_strided_slice %45 {offsets = [1, 0], sizes = [1, 8], strides = [1, 1]} : vector<2x8xf32> to vector<1x8xf32>
    %417 = vector.broadcast %416 : vector<1x8xf32> to vector<8x8xf32>
    %418 = arith.addf %415, %417 : vector<8x8xf32>
    %cst_142 = arith.constant dense<0xFF800000> : vector<8xf32>
    %419 = vector.multi_reduction <maximumf>, %418, %cst_142 [1] : vector<8x8xf32> to vector<8xf32>
    %420 = vector.shape_cast %419 : vector<8xf32> to vector<8x1xf32>
    %421 = vector.broadcast %420 : vector<8x1xf32> to vector<8x8xf32>
    %422 = arith.subf %418, %421 : vector<8x8xf32>
    %423 = math.exp %422 : vector<8x8xf32>
    %cst_143 = arith.constant dense<0.000000e+00> : vector<8xf32>
    %424 = vector.multi_reduction <add>, %423, %cst_143 [1] : vector<8x8xf32> to vector<8xf32>
    %425 = vector.shape_cast %424 : vector<8xf32> to vector<8x1xf32>
    %426 = vector.broadcast %425 : vector<8x1xf32> to vector<8x8xf32>
    %427 = arith.divf %423, %426 : vector<8x8xf32>
    %cst_144 = arith.constant dense<0.000000e+00> : vector<8x8xf32>
    %428 = tpu.matmul %427, %412, %cst_144 {dimension_numbers = #tpu.dot_dimension_numbers<[1], [0], [0], [1], [0, 0, 1, 1], [], []>} : vector<8x8xf32>, vector<8x8xf32>, vector<8x8xf32> -> vector<8x8xf32>
    %c8_145 = arith.constant 8 : index
    %c8_146 = arith.constant 8 : index
    %429 = vector.load %arg7[%c8_145, %c8_146] : memref<16x32xf32, #tpu.memory_space<vmem>>, vector<8x8xf32>
    tpu.vector_store %arg7[%c8_145, %c8_146], %428 {strides = array<i32>} : memref<16x32xf32, #tpu.memory_space<vmem>>, vector<8x8xf32>,
    %430 = vector.extract_strided_slice %309 {offsets = [8, 16], sizes = [8, 8], strides = [1, 1]} : vector<16x96xf32> to vector<8x8xf32>
    %431 = vector.extract_strided_slice %309 {offsets = [8, 48], sizes = [8, 8], strides = [1, 1]} : vector<16x96xf32> to vector<8x8xf32>
    %432 = vector.extract_strided_slice %309 {offsets = [8, 80], sizes = [8, 8], strides = [1, 1]} : vector<16x96xf32> to vector<8x8xf32>
    %cst_147 = arith.constant dense<0.000000e+00> : vector<8x8xf32>
    %433 = tpu.matmul %430, %431, %cst_147 {dimension_numbers = #tpu.dot_dimension_numbers<[1], [1], [0], [0], [0, 0, 1, 0], [], []>} : vector<8x8xf32>, vector<8x8xf32>, vector<8x8xf32> -> vector<8x8xf32>
    %cst_148 = arith.constant 0.353553385 : f32
    %434 = vector.broadcast %cst_148 : f32 to vector<8x8xf32>
    %435 = arith.mulf %433, %434 : vector<8x8xf32>
    %436 = vector.extract_strided_slice %45 {offsets = [1, 0], sizes = [1, 8], strides = [1, 1]} : vector<2x8xf32> to vector<1x8xf32>
    %437 = vector.broadcast %436 : vector<1x8xf32> to vector<8x8xf32>
    %438 = arith.addf %435, %437 : vector<8x8xf32>
    %cst_149 = arith.constant dense<0xFF800000> : vector<8xf32>
    %439 = vector.multi_reduction <maximumf>, %438, %cst_149 [1] : vector<8x8xf32> to vector<8xf32>
    %440 = vector.shape_cast %439 : vector<8xf32> to vector<8x1xf32>
    %441 = vector.broadcast %440 : vector<8x1xf32> to vector<8x8xf32>
    %442 = arith.subf %438, %441 : vector<8x8xf32>
    %443 = math.exp %442 : vector<8x8xf32>
    %cst_150 = arith.constant dense<0.000000e+00> : vector<8xf32>
    %444 = vector.multi_reduction <add>, %443, %cst_150 [1] : vector<8x8xf32> to vector<8xf32>
    %445 = vector.shape_cast %444 : vector<8xf32> to vector<8x1xf32>
    %446 = vector.broadcast %445 : vector<8x1xf32> to vector<8x8xf32>
    %447 = arith.divf %443, %446 : vector<8x8xf32>
    %cst_151 = arith.constant dense<0.000000e+00> : vector<8x8xf32>
    %448 = tpu.matmul %447, %432, %cst_151 {dimension_numbers = #tpu.dot_dimension_numbers<[1], [0], [0], [1], [0, 0, 1, 1], [], []>} : vector<8x8xf32>, vector<8x8xf32>, vector<8x8xf32> -> vector<8x8xf32>
    %c8_152 = arith.constant 8 : index
    %c16_153 = arith.constant 16 : index
    %449 = vector.load %arg7[%c8_152, %c16_153] : memref<16x32xf32, #tpu.memory_space<vmem>>, vector<8x8xf32>
    tpu.vector_store %arg7[%c8_152, %c16_153], %448 {strides = array<i32>} : memref<16x32xf32, #tpu.memory_space<vmem>>, vector<8x8xf32>,
    %450 = vector.extract_strided_slice %309 {offsets = [8, 24], sizes = [8, 8], strides = [1, 1]} : vector<16x96xf32> to vector<8x8xf32>
    %451 = vector.extract_strided_slice %309 {offsets = [8, 56], sizes = [8, 8], strides = [1, 1]} : vector<16x96xf32> to vector<8x8xf32>
    %452 = vector.extract_strided_slice %309 {offsets = [8, 88], sizes = [8, 8], strides = [1, 1]} : vector<16x96xf32> to vector<8x8xf32>
    %cst_154 = arith.constant dense<0.000000e+00> : vector<8x8xf32>
    %453 = tpu.matmul %450, %451, %cst_154 {dimension_numbers = #tpu.dot_dimension_numbers<[1], [1], [0], [0], [0, 0, 1, 0], [], []>} : vector<8x8xf32>, vector<8x8xf32>, vector<8x8xf32> -> vector<8x8xf32>
    %cst_155 = arith.constant 0.353553385 : f32
    %454 = vector.broadcast %cst_155 : f32 to vector<8x8xf32>
    %455 = arith.mulf %453, %454 : vector<8x8xf32>
    %456 = vector.extract_strided_slice %45 {offsets = [1, 0], sizes = [1, 8], strides = [1, 1]} : vector<2x8xf32> to vector<1x8xf32>
    %457 = vector.broadcast %456 : vector<1x8xf32> to vector<8x8xf32>
    %458 = arith.addf %455, %457 : vector<8x8xf32>
    %cst_156 = arith.constant dense<0xFF800000> : vector<8xf32>
    %459 = vector.multi_reduction <maximumf>, %458, %cst_156 [1] : vector<8x8xf32> to vector<8xf32>
    %460 = vector.shape_cast %459 : vector<8xf32> to vector<8x1xf32>
    %461 = vector.broadcast %460 : vector<8x1xf32> to vector<8x8xf32>
    %462 = arith.subf %458, %461 : vector<8x8xf32>
    %463 = math.exp %462 : vector<8x8xf32>
    %cst_157 = arith.constant dense<0.000000e+00> : vector<8xf32>
    %464 = vector.multi_reduction <add>, %463, %cst_157 [1] : vector<8x8xf32> to vector<8xf32>
    %465 = vector.shape_cast %464 : vector<8xf32> to vector<8x1xf32>
    %466 = vector.broadcast %465 : vector<8x1xf32> to vector<8x8xf32>
    %467 = arith.divf %463, %466 : vector<8x8xf32>
    %cst_158 = arith.constant dense<0.000000e+00> : vector<8x8xf32>
    %468 = tpu.matmul %467, %452, %cst_158 {dimension_numbers = #tpu.dot_dimension_numbers<[1], [0], [0], [1], [0, 0, 1, 1], [], []>} : vector<8x8xf32>, vector<8x8xf32>, vector<8x8xf32> -> vector<8x8xf32>
    %c8_159 = arith.constant 8 : index
    %c24_160 = arith.constant 24 : index
    %469 = vector.load %arg7[%c8_159, %c24_160] : memref<16x32xf32, #tpu.memory_space<vmem>>, vector<8x8xf32>
    tpu.vector_store %arg7[%c8_159, %c24_160], %468 {strides = array<i32>} : memref<16x32xf32, #tpu.memory_space<vmem>>, vector<8x8xf32>,
    %c0_161 = arith.constant 0 : index
    %c0_162 = arith.constant 0 : index
    %470 = vector.load %arg7[%c0_161, %c0_162] : memref<16x32xf32, #tpu.memory_space<vmem>>, vector<16x32xf32>
    %cst_163 = arith.constant dense<0.000000e+00> : vector<16x32xf32>
    %471 = tpu.matmul %470, %299, %cst_163 {dimension_numbers = #tpu.dot_dimension_numbers<[1], [0], [0], [1], [0, 0, 1, 1], [], []>} : vector<16x32xf32>, vector<32x32xf32>, vector<16x32xf32> -> vector<16x32xf32>
    %472 = vector.extract_strided_slice %0 {offsets = [11, 0], sizes = [1, 32], strides = [1, 1]} : vector<24x128xf32> to vector<1x32xf32>
    %473 = vector.broadcast %472 : vector<1x32xf32> to vector<16x32xf32>
    %474 = arith.addf %471, %473 : vector<16x32xf32>
    %475 = arith.addf %474, %293 : vector<16x32xf32>
    %476 = vector.extract_strided_slice %0 {offsets = [12, 0], sizes = [1, 32], strides = [1, 1]} : vector<24x128xf32> to vector<1x32xf32>
    %477 = vector.extract_strided_slice %0 {offsets = [13, 0], sizes = [1, 32], strides = [1, 1]} : vector<24x128xf32> to vector<1x32xf32>
    %cst_164 = arith.constant dense<0.000000e+00> : vector<16xf32>
    %478 = vector.multi_reduction <add>, %475, %cst_164 [1] : vector<16x32xf32> to vector<16xf32>
    %479 = vector.shape_cast %478 : vector<16xf32> to vector<16x1xf32>
    %cst_165 = arith.constant 3.200000e+01 : f32
    %480 = vector.broadcast %cst_165 : f32 to vector<16x1xf32>
    %481 = arith.divf %479, %480 : vector<16x1xf32>
    %482 = vector.broadcast %481 : vector<16x1xf32> to vector<16x32xf32>
    %483 = arith.subf %475, %482 : vector<16x32xf32>
    %484 = arith.mulf %483, %483 : vector<16x32xf32>
    %cst_166 = arith.constant dense<0.000000e+00> : vector<16xf32>
    %485 = vector.multi_reduction <add>, %484, %cst_166 [1] : vector<16x32xf32> to vector<16xf32>
    %486 = vector.shape_cast %485 : vector<16xf32> to vector<16x1xf32>
    %cst_167 = arith.constant 3.200000e+01 : f32
    %487 = vector.broadcast %cst_167 : f32 to vector<16x1xf32>
    %488 = arith.divf %486, %487 : vector<16x1xf32>
    %cst_168 = arith.constant 9.99999996E-13 : f32
    %489 = vector.broadcast %cst_168 : f32 to vector<16x1xf32>
    %490 = arith.addf %488, %489 : vector<16x1xf32>
    %491 = math.rsqrt %490 : vector<16x1xf32>
    %492 = vector.broadcast %491 : vector<16x1xf32> to vector<16x32xf32>
    %493 = arith.mulf %483, %492 : vector<16x32xf32>
    %494 = vector.broadcast %476 : vector<1x32xf32> to vector<16x32xf32>
    %495 = arith.mulf %493, %494 : vector<16x32xf32>
    %496 = vector.broadcast %477 : vector<1x32xf32> to vector<16x32xf32>
    %497 = arith.addf %495, %496 : vector<16x32xf32>
    %cst_169 = arith.constant dense<0.000000e+00> : vector<16x64xf32>
    %498 = tpu.matmul %497, %302, %cst_169 {dimension_numbers = #tpu.dot_dimension_numbers<[1], [0], [0], [1], [0, 0, 1, 1], [], []>} : vector<16x32xf32>, vector<32x64xf32>, vector<16x64xf32> -> vector<16x64xf32>
    %499 = vector.extract_strided_slice %0 {offsets = [14, 0], sizes = [1, 64], strides = [1, 1]} : vector<24x128xf32> to vector<1x64xf32>
    %500 = vector.broadcast %499 : vector<1x64xf32> to vector<16x64xf32>
    %501 = arith.addf %498, %500 : vector<16x64xf32>
    %cst_170 = arith.constant 5.000000e-01 : f32
    %502 = vector.broadcast %cst_170 : f32 to vector<16x64xf32>
    %503 = arith.mulf %502, %501 : vector<16x64xf32>
    %cst_171 = arith.constant 4.471500e-02 : f32
    %504 = vector.broadcast %cst_171 : f32 to vector<16x64xf32>
    %505 = arith.mulf %504, %501 : vector<16x64xf32>
    %506 = arith.mulf %505, %501 : vector<16x64xf32>
    %507 = arith.mulf %506, %501 : vector<16x64xf32>
    %508 = arith.addf %501, %507 : vector<16x64xf32>
    %cst_172 = arith.constant 0.797884583 : f32
    %509 = vector.broadcast %cst_172 : f32 to vector<16x64xf32>
    %510 = arith.mulf %509, %508 : vector<16x64xf32>
    %511 = math.tanh %510 : vector<16x64xf32>
    %cst_173 = arith.constant 1.000000e+00 : f32
    %512 = vector.broadcast %cst_173 : f32 to vector<16x64xf32>
    %513 = arith.addf %512, %511 : vector<16x64xf32>
    %514 = arith.mulf %503, %513 : vector<16x64xf32>
    %cst_174 = arith.constant dense<0.000000e+00> : vector<16x32xf32>
    %515 = tpu.matmul %514, %305, %cst_174 {dimension_numbers = #tpu.dot_dimension_numbers<[1], [0], [0], [1], [0, 0, 1, 1], [], []>} : vector<16x64xf32>, vector<64x32xf32>, vector<16x32xf32> -> vector<16x32xf32>
    %516 = vector.extract_strided_slice %0 {offsets = [15, 0], sizes = [1, 32], strides = [1, 1]} : vector<24x128xf32> to vector<1x32xf32>
    %517 = vector.broadcast %516 : vector<1x32xf32> to vector<16x32xf32>
    %518 = arith.addf %515, %517 : vector<16x32xf32>
    %519 = arith.addf %518, %497 : vector<16x32xf32>
    %520 = vector.extract_strided_slice %0 {offsets = [16, 0], sizes = [1, 32], strides = [1, 1]} : vector<24x128xf32> to vector<1x32xf32>
    %521 = vector.extract_strided_slice %0 {offsets = [17, 0], sizes = [1, 32], strides = [1, 1]} : vector<24x128xf32> to vector<1x32xf32>
    %cst_175 = arith.constant dense<0.000000e+00> : vector<16xf32>
    %522 = vector.multi_reduction <add>, %519, %cst_175 [1] : vector<16x32xf32> to vector<16xf32>
    %523 = vector.shape_cast %522 : vector<16xf32> to vector<16x1xf32>
    %cst_176 = arith.constant 3.200000e+01 : f32
    %524 = vector.broadcast %cst_176 : f32 to vector<16x1xf32>
    %525 = arith.divf %523, %524 : vector<16x1xf32>
    %526 = vector.broadcast %525 : vector<16x1xf32> to vector<16x32xf32>
    %527 = arith.subf %519, %526 : vector<16x32xf32>
    %528 = arith.mulf %527, %527 : vector<16x32xf32>
    %cst_177 = arith.constant dense<0.000000e+00> : vector<16xf32>
    %529 = vector.multi_reduction <add>, %528, %cst_177 [1] : vector<16x32xf32> to vector<16xf32>
    %530 = vector.shape_cast %529 : vector<16xf32> to vector<16x1xf32>
    %cst_178 = arith.constant 3.200000e+01 : f32
    %531 = vector.broadcast %cst_178 : f32 to vector<16x1xf32>
    %532 = arith.divf %530, %531 : vector<16x1xf32>
    %cst_179 = arith.constant 9.99999996E-13 : f32
    %533 = vector.broadcast %cst_179 : f32 to vector<16x1xf32>
    %534 = arith.addf %532, %533 : vector<16x1xf32>
    %535 = math.rsqrt %534 : vector<16x1xf32>
    %536 = vector.broadcast %535 : vector<16x1xf32> to vector<16x32xf32>
    %537 = arith.mulf %527, %536 : vector<16x32xf32>
    %538 = vector.broadcast %520 : vector<1x32xf32> to vector<16x32xf32>
    %539 = arith.mulf %537, %538 : vector<16x32xf32>
    %540 = vector.broadcast %521 : vector<1x32xf32> to vector<16x32xf32>
    %541 = arith.addf %539, %540 : vector<16x32xf32>
    %c8_180 = arith.constant 8 : index
    %c0_181 = arith.constant 0 : index
    %c0_182 = arith.constant 0 : index
    %542 = vector.load %arg4[%c8_180, %c0_181, %c0_182] : memref<9x64x128xf32, #tpu.memory_space<vmem>>, vector<1x64x128xf32>
    %543 = vector.shape_cast %542 : vector<1x64x128xf32> to vector<64x128xf32>
    %544 = vector.extract_strided_slice %543 {offsets = [0, 0], sizes = [32, 128], strides = [1, 1]} : vector<64x128xf32> to vector<32x128xf32>
    %545 = vector.extract_strided_slice %0 {offsets = [18, 0], sizes = [1, 128], strides = [1, 1]} : vector<24x128xf32> to vector<1x128xf32>
    %cst_183 = arith.constant dense<0.000000e+00> : vector<16x128xf32>
    %546 = tpu.matmul %541, %544, %cst_183 {dimension_numbers = #tpu.dot_dimension_numbers<[1], [0], [0], [1], [0, 0, 1, 1], [], []>} : vector<16x32xf32>, vector<32x128xf32>, vector<16x128xf32> -> vector<16x128xf32>
    %547 = vector.broadcast %545 : vector<1x128xf32> to vector<16x128xf32>
    %548 = arith.addf %546, %547 : vector<16x128xf32>
    %c0_184 = arith.constant 0 : index
    %c0_185 = arith.constant 0 : index
    %549 = vector.load %arg6[%c0_184, %c0_185] : memref<16x128xf32, #tpu.memory_space<vmem>>, vector<16x128xf32>
    tpu.vector_store %arg6[%c0_184, %c0_185], %548 {strides = array<i32>} : memref<16x128xf32, #tpu.memory_space<vmem>>, vector<16x128xf32>,
    return
  }
  func.func @transform_0(%arg0: i32) -> (i32, i32) {
    %c0_i32 = arith.constant 0 : i32
    %c0_i32_0 = arith.constant 0 : i32
    %c0_i32_1 = arith.constant 0 : i32
    return %c0_i32, %c0_i32_0 : i32, i32
  }
  func.func @transform_1(%arg0: i32) -> (i32, i32) {
    %c0_i32 = arith.constant 0 : i32
    %c0_i32_0 = arith.constant 0 : i32
    %c0_i32_1 = arith.constant 0 : i32
    return %c0_i32, %c0_i32_0 : i32, i32
  }
  func.func @transform_2(%arg0: i32) -> (i32, i32) {
    %c0_i32 = arith.constant 0 : i32
    %c0_i32_0 = arith.constant 0 : i32
    %c0_i32_1 = arith.constant 0 : i32
    return %c0_i32, %c0_i32_0 : i32, i32
  }
  func.func @transform_3(%arg0: i32) -> (i32, i32, i32) {
    %c0_i32 = arith.constant 0 : i32
    %c0_i32_0 = arith.constant 0 : i32
    %c0_i32_1 = arith.constant 0 : i32
    %c0_i32_2 = arith.constant 0 : i32
    return %c0_i32, %c0_i32_0, %c0_i32_1 : i32, i32, i32
  }
  func.func @transform_4(%arg0: i32) -> (i32, i32) {
    %c0_i32 = arith.constant 0 : i32
    %c0_i32_0 = arith.constant 0 : i32
    %c0_i32_1 = arith.constant 0 : i32
    return %c0_i32, %c0_i32_0 : i32, i32
  }
  func.func @transform_5(%arg0: i32) -> (i32, i32) {
    %c0_i32 = arith.constant 0 : i32
    %c0_i32_0 = arith.constant 0 : i32
    %c0_i32_1 = arith.constant 0 : i32
    return %c0_i32, %c0_i32_0 : i32, i32
  }
}

</mosaic_0001>

<bundles_post_ra>
// kernel: news_model_forward.1
= control target key start
LH: loop header
LB: loop body
LE: loop exit
PB: predicated region body
PF: predicated region fallthrough
CT: control target
= control target key end

     0   :  { %10 = vsyncpa [#allocation4], 0  ;;  %s4621_s18 = smov [#allocation3]   ;;  %s5209_s0 = inlined_call_operand.vmem [shape: s32[16,3], index: 0, kind: input, shape index: {}]   ;;  %s5210_s1 = inlined_call_operand.vmem [shape: s32[2,8], index: 1, kind: input, shape index: {}]   ;;  %s5211_s2 = inlined_call_operand.vmem [shape: f32[72,32], index: 2, kind: input, shape index: {}]   ;;  %s5212_s3 = inlined_call_operand.hbm [shape: f32[9,64,128], index: 3, kind: input, shape index: {}]   ;;  %s5213_s4 = inlined_call_operand.vmem [shape: f32[24,128], index: 4, kind: input, shape index: {}]   ;;  %s5214_s5 = inlined_call_operand.vmem [shape: f32[16,128], index: 5, kind: output, shape index: {}]  }
   0x1   :  { %s22_s19 = sshll.u32 %s4621_s18, 4  ;;  %s23_s19 = int_to_ptr.vmem [resolvable:$true] %s22_s19 }
   0x2   :  { %s4607_s20 = scalar_lea.vmem %s23_s19, 9216  ;;  %p4612_p1 = scmp.lt.s32.totalorder %s23_s19, %s23_s19 }
   0x3   :  { %p4608_p0 = scmp.ne.s32.totalorder %s23_s19, %s4607_s20  ;;  %p4613_p2 = scmp.lt.s32.totalorder %s4607_s20, %s4607_s20 }
   0x5   :  { %p4614_p3 = por %p4613_p2, %p4612_p1 }
   0x7   :  { %p4615_p4 = pnand %p4614_p3, %p4608_p0 }
   0x9   :  { %4618 = shalt.err (!%p4615_p4)
}
   0xa   :  { %s4622_s21 = smov 128   ;;  %s4623_s22 = smov 8  }
   0xb   :  { %28 = dma.hbm_to_vmem [thread:$0]  %s5212_s3, 9216, %s23_s19, [#allocation4], %s4622_s21, %s4622_s21, %s4623_s22  }
   0xc   :  { %4619 = dma.done.wait [#allocation4], 9216  }
   0xd   :  { %4620 = vsyncadd [#allocation4], 4294958080  ;;  %v4624_v0 = vmov 0   ;;  %v38_v1 = vld [vmem:[%s5209_s0 + $0x8] sm:$0xff]  ;;  %v37_v2 = vld [vmem:[%s5209_s0] sm:$0xff]  ;;  %v4625_v5 = vmov 1   ;;  %v39_v17 = vlaneseq }
   0xe   :  { %4503 = vset.pattern.permute.xlu1 %v4624_v0  ;;  %4501 = vset.pattern.permute.xlu0 %v4624_v0  ;;  %v81_v3 = vld [vmem:[%s5211_s2 + $0x40] sm:$0xff]  ;;  %v80_v4 = vld [vmem:[%s5211_s2 + $0x38] sm:$0xff]  ;;  %v79_v6 = vld [vmem:[%s5211_s2 + $0x30] sm:$0xff]  ;;  %v4626_v8 = vmov 2   ;;  %v4627_v14 = vmov 0.0   ;;  %vm82_vm9 = vcmask 588800  }
   0xf   :  { %45 = vperm.xlu1 %4503, %v38_v1   ;;  %42 = vperm.xlu0 %4501, %v37_v2   ;;  %v78_v7 = vld [vmem:[%s5211_s2 + $0x28] sm:$0xff]  ;;  %v77_v9 = vld [vmem:[%s5211_s2 + $0x20] sm:$0xff]  ;;  %v76_v10 = vld [vmem:[%s5211_s2 + $0x18] sm:$0xff]  ;;  %v40_v18 = vand.u32 127, %v39_v17  ;;  %vm164_vm11 = vcmask 261120   ;;  %v4717_v49 = vshrl.u32 %v39_v17, 7 }
  0x10   :  { %4184 = vmatprep.subr.mxu0 %v81_v3  ;;  %v75_v11 = vld [vmem:[%s5211_s2 + $0x10] sm:$0xff]  ;;  %v74_v12 = vld [vmem:[%s5211_s2 + $0x8] sm:$0xff]  ;;  %v73_v13 = vld [vmem:[%s5211_s2] sm:$0xff]  ;;  %vm4628_vm12 = vmmov 0   ;;  %s4629_s21 = smov 96   ;;  %s4630_s23 = smov 88  }
  0x11   :  { %4185 = vmatpush3.msra.mxu0 %v81_v3  ;;  %v211_v39 = vld [vmem:[#allocation3 + $0x18] sm:$0xff]  ;;  %v210_v40 = vld [vmem:[#allocation3 + $0x10] sm:$0xff]  ;;  %v209_v41 = vld [vmem:[#allocation3 + $0x8] sm:$0xff]  ;;  %v4720_v50 = vsub.s32 0, %v4717_v49  ;;  %v4730_v54 = vsub.s32 1, %v4717_v49  ;;  %v4747_v63 = vsub.s32 2, %v4717_v49 }
  0x12   :  { %4186 = vmatprep.subr.mxu0 %v80_v4  ;;  %4205 = vmatprep.subr.mxu1 %v211_v39  ;;  %v208_v42 = vld [vmem:[#allocation3] sm:$0xff]  ;;  %v4725_v51 = vld [vmem:[%s5213_s4] sm:$0xff]  ;;  %s4631_s24 = smov 120   ;;  %s4632_s25 = smov 80   ;;  %vm319_vm13 = vcmask 64512   ;;  %vm659_vm14 = vcmask 130112  }
  0x13   :  { %4504 = vset.pattern.permute.xlu1 %v4625_v5  ;;  %4502 = vset.pattern.permute.xlu0 %v4625_v5  ;;  %v195_v53 = vrot.slane %v4725_v51, %v4720_v50  ;;  %v201_v59 = vrot.slane %v4725_v51, %v4730_v54  ;;  %s4633_s26 = smov 112   ;;  %s4634_s27 = smov 104   ;;  %vm832_vm15 = vcmask 195712  }
  0x14   :  { %53 = vperm.xlu1 %4504, %v38_v1   ;;  %50 = vperm.xlu0 %4502, %v37_v2   ;;  %s4635_s28 = smov 72   ;;  %s4637_s3 = smov 48  }
  0x15   :  { %4187 = vmatpush3.msra.mxu0 %v80_v4  ;;  %4206 = vmatpush3.msra.mxu1 %v211_v39  ;;  %s4638_s6 = smov 40   ;;  %s4639_s7 = smov 56  }
  0x16   :  { %4188 = vmatprep.subr.mxu0 %v79_v6  ;;  %4207 = vmatprep.subr.mxu1 %v210_v40  ;;  %s4640_s8 = smov 16   ;;  %s4641_s0 = smov 24  }
  0x17   :  { %4189 = vmatpush3.msra.mxu0 %v79_v6  ;;  %4208 = vmatpush3.msra.mxu1 %v210_v40  ;;  %v204_v6 = vld [vmem:[%s5210_s1] sm:$0x3]  ;;  %s4636_s1 = smov 64  }
  0x18   :  { %4505 = vset.pattern.permute.xlu1 %v4626_v8  ;;  %4506 = vset.pattern.permute.xlu0 %v4626_v8 }
  0x19   :  { %60 = vperm.xlu1 %4505, %v37_v2   ;;  %63 = vperm.xlu0 %4506, %v38_v1   ;;  %v234_v1 = vrot.slane %v4725_v51, %v4747_v63 }
  0x1a   :  { %4190 = vmatprep.subr.mxu0 %v78_v7  ;;  %4209 = vmatprep.subr.mxu1 %v209_v41 }
  0x1b   :  { %4191 = vmatpush3.msra.mxu0 %v78_v7  ;;  %4210 = vmatpush3.msra.mxu1 %v209_v41  ;;  %v205_v7 = vcvt.s32.f32 %v204_v6 }
  0x1c   :  { %4192 = vmatprep.subr.mxu0 %v77_v9  ;;  %4211 = vmatprep.subr.mxu1 %v208_v42 }
  0x1d   :  { %4193 = vmatpush3.msra.mxu0 %v77_v9  ;;  %4212 = vmatpush3.msra.mxu1 %v208_v42  ;;  %v206_v8 = vsub.f32 1.0, %v205_v7 }
  0x1e   :  { %4194 = vmatprep.subr.mxu0 %v76_v10  ;;  %4221 = vmatprep.subr.mxu1 %v4627_v14 }
  0x1f   :  { %4195 = vmatpush3.msra.mxu0 %v76_v10  ;;  %v4782_v9 = vmul.f32 -10000.0, %v206_v8 }
  0x20   :  { %4196 = vmatprep.subr.mxu0 %v75_v11 }
  0x21   :  { %4197 = vmatpush3.msra.mxu0 %v75_v11  ;;  %v4786_v10 = vrot.slane %v4782_v9, %v4720_v50 }
  0x22   :  { %4198 = vmatprep.subr.mxu0 %v74_v12 }
  0x23   :  { %4199 = vmatpush3.msra.mxu0 %v74_v12 }
  0x24   :  { %4200 = vmatprep.subr.mxu0 %v73_v13 }
  0x25   :  { %4201 = vmatpush3.msra.mxu0 %v73_v13 }
  0x26   :  { %4216 = vmatprep.subr.mxu0 %v4627_v14 }
  0x8a   :  { %v46_v15 = vpop.permute.xlu1 %45  ;;  %v43_v16 = vpop.permute.xlu0 %42 }
  0x8b   :  { %vm48_vm2 = vcmp.eq.s32.totalorder %v40_v18, %v46_v15  ;;  %vm47_vm3 = vcmp.eq.s32.totalorder %v40_v18, %v43_v16 }
  0x8f   :  { %v54_v19 = vpop.permute.xlu1 %53  ;;  %v51_v20 = vpop.permute.xlu0 %50 }
  0x90   :  { %vm56_vm0 = vcmp.eq.s32.totalorder %v40_v18, %v54_v19  ;;  %vm55_vm1 = vcmp.eq.s32.totalorder %v40_v18, %v51_v20 }
  0x91   :  { %vm58_vm4 = vmor %vm48_vm2, %vm56_vm0  ;;  %vm1005_vm0 = vcmask 261312  }
  0x92   :  { %vm57_vm7 = vmor %vm47_vm3, %vm55_vm1  ;;  %vm1928_vm1 = vcmask 523264  }
  0x94   :  { %v61_v21 = vpop.permute.xlu1 %60  ;;  %v64_v22 = vpop.permute.xlu0 %63 }
  0x95   :  { %vm65_vm5 = vcmp.eq.s32.totalorder %v40_v18, %v61_v21  ;;  %vm66_vm6 = vcmp.eq.s32.totalorder %v40_v18, %v64_v22 }
  0x96   :  { %vm68_vm8 = vmor %vm58_vm4, %vm66_vm6 }
  0x97   :  { %vm67_vm10 = vmor %vm57_vm7, %vm65_vm5  ;;  %v3978_v23 = vsel %vm68_vm8, 1.0, %v4627_v14 }
  0x98   :  { %v3977_v24 = vsel %vm67_vm10, 1.0, %v4627_v14 }
  0x99   :  { %4202 = vmatprep.mubr.msk.f32.mxu0 %vm82_vm9, %v3977_v24 }
  0x9a   :  { %4203 = vmatmul.mubr.msk.f32.vlgmr.msra.gmra.mxu0 %vm82_vm9, %v3978_v23 }
  0x9b   :  { %4218 = vmatprep.mubr.msk.f32.mxu0 %vm4628_vm12, %v4627_v14 }
 0x15a   :  { %v4204_v25 = vpop.f32.mrf.mxu0 }
 0x15b   :  { %v168_v26 = vsel %vm164_vm11, %v4204_v25, 0.0 }
 0x15c   :  { %169 = vadd.xlane.f32.xlu0 %v168_v26  ;;  %v155_v27 = vpop.f32.mrf.mxu0 }
 0x15d   :  { %v165_v28 = vsel %vm164_vm11, %v155_v27, 0.0 }
 0x15e   :  { %166 = vadd.xlane.f32.xlu1 %v165_v28 }
 0x1e5   :  { %v170_v29 = vpop.xlane.xlu0 %169 }
 0x1e6   :  { %v173_v30 = vmul.f32 0.03125, %v170_v29 }
 0x1e7   :  { %v167_v31 = vpop.xlane.xlu1 %166 }
 0x1e8   :  { %v175_v32 = vsub.f32 %v4204_v25, %v173_v30  ;;  %v172_v33 = vmul.f32 0.03125, %v167_v31 }
 0x1ea   :  { %v174_v34 = vsub.f32 %v155_v27, %v172_v33  ;;  %v177_v35 = vmul.f32 %v175_v32, %v175_v32 }
 0x1ec   :  { %v181_v36 = vsel %vm164_vm11, %v177_v35, 0.0  ;;  %v176_v37 = vmul.f32 %v174_v34, %v174_v34 }
 0x1ed   :  { %182 = vadd.xlane.f32.xlu0 %v181_v36 }
 0x1ee   :  { %v178_v38 = vsel %vm164_vm11, %v176_v37, 0.0 }
 0x1ef   :  { %179 = vadd.xlane.f32.xlu1 %v178_v38 }
 0x276   :  { %v183_v43 = vpop.xlane.xlu0 %182 }
 0x277   :  { %v185_v44 = vmul.f32 0.03125, %v183_v43 }
 0x278   :  { %v180_v45 = vpop.xlane.xlu1 %179 }
 0x279   :  { %v187_v46 = vadd.f32 1e-12, %v185_v44  ;;  %v184_v47 = vmul.f32 0.03125, %v180_v45 }
 0x27b   :  { %4507 = vrsqrt.f32 %v187_v46  ;;  %v186_v48 = vadd.f32 1e-12, %v184_v47 }
 0x27d   :  { %4509 = vrsqrt.f32 %v186_v48 }
 0x288   :  { %v4508_v52 = vpop.eup %4507 }
 0x289   :  { %v191_v55 = vmul.f32 %v4508_v52, %v175_v32 }
 0x28a   :  { %v4510_v56 = vpop.eup %4509 }
 0x28b   :  { %v190_v57 = vmul.f32 %v4510_v56, %v174_v34  ;;  %v197_v58 = vmul.f32 %v195_v53, %v191_v55 }
 0x28d   :  { %v196_v60 = vmul.f32 %v195_v53, %v190_v57  ;;  %v4736_v62 = vadd.f32 %v201_v59, %v197_v58  ;;  %v4847_v58 = vrot.slane %v4782_v9, %v4730_v54 }
 0x28f   :  { %v4734_v61 = vadd.f32 %v201_v59, %v196_v60 }
 0x291   :  { %4213 = vmatprep.mubr.msk.f32.mxu1 %vm164_vm11, %v4734_v61 }
 0x292   :  { %4214 = vmatmul.mubr.msk.f32.vlgmr.msra.gmra.mxu1 %vm164_vm11, %v4736_v62 }
 0x293   :  { %4223 = vmatprep.mubr.msk.f32.mxu1 %vm4628_vm12, %v4627_v14 }
 0x352   :  { %v4215_v0 = vpop.f32.mrf.mxu1 }
 0x353   :  { %v4765_v4 = vadd.f32 %v4215_v0, %v234_v1 }
 0x354   :  { %v307_v2 = vpop.f32.mrf.mxu1 }
 0x355   :  { %v4751_v3 = vadd.f32 %v307_v2, %v234_v1 }
 0x357   :  { %317 = vrot.lane.b32.xlu1 %v4751_v3, %s4629_s21 }
 0x35b   :  { %490 = vrot.lane.b32.xlu1 %v4751_v3, %s4630_s23 }
 0x35f   :  { %488 = vrot.lane.b32.xlu1 %v4751_v3, %s4631_s24 }
 0x363   :  { %663 = vrot.lane.b32.xlu1 %v4751_v3, %s4632_s25 }
 0x367   :  { %661 = vrot.lane.b32.xlu1 %v4751_v3, %s4633_s26 }
 0x36b   :  { %834 = vrot.lane.b32.xlu1 %v4751_v3, %s4634_s27 }
 0x36f   :  { %1180 = vrot.lane.b32.xlu1 %v4765_v4, %s4630_s23 }
 0x373   :  { %1352 = vrot.lane.b32.xlu1 %v4765_v4, %s4632_s25 }
 0x377   :  { %1524 = vrot.lane.b32.xlu1 %v4765_v4, %s4635_s28 }
 0x3c9   :  { %v318_v5 = vpop.permute.xlu1 %317 }
 0x3ca   :  { %4217 = vmatpush3.xpose.msk.msra.mxu0 %vm319_vm13, %v318_v5 }
 0x3cb   :  { %4231 = vmatprep.subr.mxu0 %v4627_v14 }
 0x3cd   :  { %4219 = vmatmul.mubr.msk.f32.vlgmr.msra.gmra.mxu0 %vm319_vm13, %v4751_v3  ;;  %v491_v22 = vpop.permute.xlu1 %490 }
 0x3ce   :  { %4233 = vmatprep.mubr.msk.f32.mxu0 %vm4628_vm12, %v4627_v14 }
 0x3d1   :  { %v489_v25 = vpop.permute.xlu1 %488 }
 0x3d5   :  { %v664_v26 = vpop.permute.xlu1 %663 }
 0x3d9   :  { %v662_v29 = vpop.permute.xlu1 %661 }
 0x3dd   :  { %v835_v31 = vpop.permute.xlu1 %834 }
 0x3e1   :  { %v1181_v33 = vpop.permute.xlu1 %1180 }
 0x3e5   :  { %v1353_v35 = vpop.permute.xlu1 %1352 }
 0x3e9   :  { %v1525_v37 = vpop.permute.xlu1 %1524 }
 0x48d   :  { %v390_v11 = vpop.f32.mrf.mxu0 }
 0x48e   :  { %v394_v12 = vmul.f32 0.35355338, %v390_v11 }
 0x48f   :  { %v4220_v13 = vpop.f32.mrf.mxu0 }
 0x490   :  { %v399_v15 = vadd.f32 %v4786_v10, %v394_v12 }
 0x492   :  { %v400_v16 = vsel %vm319_vm13, %v399_v15, -inf }
 0x493   :  { %401 = vmax.xlane.f32.xlu0 %v400_v16 }
 0x51c   :  { %v402_v17 = vpop.xlane.xlu0 %401 }
 0x51d   :  { %v403_v18 = vsub.f32 %v399_v15, %v402_v17 }
 0x51f   :  { %v404_v19 = vmul.f32 1.442695, %v403_v18 }
 0x521   :  { %4511 = vpow2.f32 %v404_v19 }
 0x52e   :  { %v4512_v20 = vpop.eup %4511 }
 0x52f   :  { %v406_v21 = vsel %vm319_vm13, %v4512_v20, 0.0 }
 0x530   :  { %407 = vadd.xlane.f32.xlu0 %v406_v21 }
 0x546   :  { %411 = vrot.lane.b32.xlu0 %v4751_v3, %s4636_s1 }
 0x54a   :  { %836 = vrot.lane.b32.xlu0 %v4751_v3, %s4635_s28 }
 0x54e   :  { %1008 = vrot.lane.b32.xlu0 %v4765_v4, %s4629_s21 }
 0x552   :  { %1178 = vrot.lane.b32.xlu0 %v4765_v4, %s4631_s24 }
 0x556   :  { %1350 = vrot.lane.b32.xlu0 %v4765_v4, %s4633_s26 }
 0x55a   :  { %1522 = vrot.lane.b32.xlu0 %v4765_v4, %s4634_s27 }
 0x5b9   :  { %v408_v23 = vpop.xlane.xlu0 %407 }
 0x5ba   :  { %4513 = vrcp.f32 %v408_v23 }
 0x5bd   :  { %v412_v24 = vpop.permute.xlu0 %411 }
 0x5be   :  { %4222 = vmatpush3.msra.mxu1 %v412_v24 }
 0x5bf   :  { %4226 = vmatprep.subr.mxu1 %v4627_v14 }
 0x5c1   :  { %v837_v30 = vpop.permute.xlu0 %836 }
 0x5c5   :  { %v1009_v32 = vpop.permute.xlu0 %1008 }
 0x5c7   :  { %v4514_v27 = vpop.eup %4513 }
 0x5c8   :  { %v410_v28 = vmul.f32 %v4514_v27, %v4512_v20 }
 0x5c9   :  { %v1179_v34 = vpop.permute.xlu0 %1178 }
 0x5ca   :  { %4224 = vmatmul.mubr.msk.f32.vlgmr.msra.gmra.mxu1 %vm319_vm13, %v410_v28 }
 0x5cb   :  { %4227 = vmatpush3.xpose.msk.msra.mxu1 %vm319_vm13, %v491_v22  ;;  %4228 = vmatprep.mubr.msk.f32.mxu1 %vm4628_vm12, %v4627_v14 }
 0x5cc   :  { %4236 = vmatprep.subr.mxu1 %v4627_v14 }
 0x5cd   :  { %v1351_v36 = vpop.permute.xlu0 %1350 }
 0x5ce   :  { %4229 = vmatmul.mubr.msk.f32.vlgmr.msra.gmra.mxu1 %vm319_vm13, %v489_v25 }
 0x5cf   :  { %4237 = vmatpush3.xpose.msk.msra.mxu1 %vm319_vm13, %v664_v26  ;;  %4238 = vmatprep.mubr.msk.f32.mxu1 %vm4628_vm12, %v4627_v14 }
 0x5d0   :  { %4246 = vmatprep.subr.mxu1 %v4627_v14 }
 0x5d1   :  { %v1523_v38 = vpop.permute.xlu0 %1522 }
 0x5d2   :  { %4239 = vmatmul.mubr.msk.f32.vlgmr.msra.gmra.mxu1 %vm319_vm13, %v662_v29 }
 0x5d3   :  { %4247 = vmatpush3.xpose.msk.msra.mxu1 %vm319_vm13, %v837_v30  ;;  %4248 = vmatprep.mubr.msk.f32.mxu1 %vm4628_vm12, %v4627_v14 }
 0x5d4   :  { %4256 = vmatprep.subr.mxu1 %v4627_v14 }
 0x5d6   :  { %4249 = vmatmul.mubr.msk.f32.vlgmr.msra.gmra.mxu1 %vm319_vm13, %v835_v31 }
 0x5d7   :  { %4257 = vmatpush3.xpose.msk.msra.mxu1 %vm319_vm13, %v1009_v32  ;;  %4258 = vmatprep.mubr.msk.f32.mxu1 %vm4628_vm12, %v4627_v14 }
 0x5d8   :  { %4266 = vmatprep.subr.mxu1 %v4627_v14 }
 0x5da   :  { %4259 = vmatmul.mubr.msk.f32.vlgmr.msra.gmra.mxu1 %vm319_vm13, %v4765_v4 }
 0x5db   :  { %4267 = vmatpush3.xpose.msk.msra.mxu1 %vm319_vm13, %v1181_v33  ;;  %4268 = vmatprep.mubr.msk.f32.mxu1 %vm4628_vm12, %v4627_v14 }
 0x5dc   :  { %4276 = vmatprep.subr.mxu1 %v4627_v14 }
 0x5de   :  { %4269 = vmatmul.mubr.msk.f32.vlgmr.msra.gmra.mxu1 %vm319_vm13, %v1179_v34 }
 0x5df   :  { %4277 = vmatpush3.xpose.msk.msra.mxu1 %vm319_vm13, %v1353_v35  ;;  %4278 = vmatprep.mubr.msk.f32.mxu1 %vm4628_vm12, %v4627_v14 }
 0x5e0   :  { %4286 = vmatprep.subr.mxu1 %v4627_v14 }
 0x5e2   :  { %4279 = vmatmul.mubr.msk.f32.vlgmr.msra.gmra.mxu1 %vm319_vm13, %v1351_v36 }
 0x5e3   :  { %4287 = vmatpush3.xpose.msk.msra.mxu1 %vm319_vm13, %v1525_v37  ;;  %4288 = vmatprep.mubr.msk.f32.mxu1 %vm4628_vm12, %v4627_v14 }
 0x5e6   :  { %4289 = vmatmul.mubr.msk.f32.vlgmr.msra.gmra.mxu1 %vm319_vm13, %v1523_v38 }
 0x68a   :  { %v483_v39 = vpop.f32.mrf.mxu1 }
 0x68b   :  { %487 = vst.msk [vmem:[#allocation2] sm:$0xff] %vm319_vm13, %v483_v39 }
 0x68c   :  { %v4225_v40 = vpop.f32.mrf.mxu1 }
 0x68e   :  { %v562_v41 = vpop.f32.mrf.mxu1 }
 0x68f   :  { %v566_v42 = vmul.f32 0.35355338, %v562_v41 }
 0x690   :  { %v4230_v43 = vpop.f32.mrf.mxu1 }
 0x691   :  { %v567_v44 = vadd.f32 %v566_v42, %v4786_v10 }
 0x692   :  { %v735_v45 = vpop.f32.mrf.mxu1 }
 0x693   :  { %v739_v46 = vmul.f32 0.35355338, %v735_v45  ;;  %v568_v47 = vsel %vm319_vm13, %v567_v44, -inf }
 0x694   :  { %569 = vmax.xlane.f32.xlu1 %v568_v47  ;;  %v4240_v48 = vpop.f32.mrf.mxu1 }
 0x695   :  { %v740_v52 = vadd.f32 %v739_v46, %v4786_v10 }
 0x696   :  { %v908_v53 = vpop.f32.mrf.mxu1 }
 0x697   :  { %v912_v55 = vmul.f32 0.35355338, %v908_v53  ;;  %v741_v56 = vsel %vm319_vm13, %v740_v52, -inf }
 0x698   :  { %742 = vmax.xlane.f32.xlu0 %v741_v56  ;;  %v4250_v57 = vpop.f32.mrf.mxu1 }
 0x699   :  { %v913_v59 = vadd.f32 %v912_v55, %v4786_v10 }
 0x69a   :  { %v1080_v60 = vpop.f32.mrf.mxu1 }
 0x69b   :  { %v1084_v0 = vmul.f32 0.35355338, %v1080_v60  ;;  %v914_v1 = vsel %vm319_vm13, %v913_v59, -inf }
 0x69c   :  { %915 = vmax.xlane.f32.xlu0 %v914_v1  ;;  %v4260_v2 = vpop.f32.mrf.mxu1 }
 0x69d   :  { %v1089_v5 = vadd.f32 %v4847_v58, %v1084_v0 }
 0x69e   :  { %v1252_v6 = vpop.f32.mrf.mxu1 }
 0x69f   :  { %v1256_v7 = vmul.f32 0.35355338, %v1252_v6  ;;  %v1090_v8 = vsel %vm319_vm13, %v1089_v5, -inf }
 0x6a0   :  { %1091 = vmax.xlane.f32.xlu1 %v1090_v8  ;;  %v4270_v11 = vpop.f32.mrf.mxu1 }
 0x6a1   :  { %v1257_v12 = vadd.f32 %v1256_v7, %v4847_v58 }
 0x6a2   :  { %v1424_v9 = vpop.f32.mrf.mxu1 }
 0x6a3   :  { %v1428_v13 = vmul.f32 0.35355338, %v1424_v9  ;;  %v1258_v15 = vsel %vm319_vm13, %v1257_v12, -inf }
 0x6a4   :  { %1259 = vmax.xlane.f32.xlu0 %v1258_v15  ;;  %v4280_v16 = vpop.f32.mrf.mxu1 }
 0x6a5   :  { %v1429_v17 = vadd.f32 %v1428_v13, %v4847_v58 }
 0x6a6   :  { %v1596_v18 = vpop.f32.mrf.mxu1 }
 0x6a7   :  { %v1600_v19 = vmul.f32 0.35355338, %v1596_v18  ;;  %v1430_v20 = vsel %vm319_vm13, %v1429_v17, -inf }
 0x6a8   :  { %1431 = vmax.xlane.f32.xlu1 %v1430_v20  ;;  %v4290_v21 = vpop.f32.mrf.mxu1 }
 0x6a9   :  { %v1601_v22 = vadd.f32 %v1600_v19, %v4847_v58 }
 0x6ab   :  { %v1602_v23 = vsel %vm319_vm13, %v1601_v22, -inf }
 0x6ac   :  { %1603 = vmax.xlane.f32.xlu0 %v1602_v23 }
 0x6b9   :  { %752 = vrot.lane.b32.xlu1 %v4751_v3, %s4637_s3 }
 0x6bd   :  { %925 = vrot.lane.b32.xlu1 %v4751_v3, %s4638_s6 }
 0x6c2   :  { %579 = vrot.lane.b32.xlu0 %v4751_v3, %s4639_s7 }
 0x71d   :  { %v570_v24 = vpop.xlane.xlu1 %569 }
 0x71e   :  { %v571_v25 = vsub.f32 %v567_v44, %v570_v24 }
 0x720   :  { %v572_v26 = vmul.f32 1.442695, %v571_v25 }
 0x721   :  { %v743_v27 = vpop.xlane.xlu0 %742 }
 0x722   :  { %4515 = vpow2.f32 %v572_v26  ;;  %v744_v28 = vsub.f32 %v740_v52, %v743_v27 }
 0x724   :  { %v745_v29 = vmul.f32 1.442695, %v744_v28 }
 0x725   :  { %v916_v30 = vpop.xlane.xlu0 %915 }
 0x726   :  { %4517 = vpow2.f32 %v745_v29  ;;  %v917_v37 = vsub.f32 %v913_v59, %v916_v30 }
 0x728   :  { %v918_v40 = vmul.f32 1.442695, %v917_v37 }
 0x729   :  { %v1092_v38 = vpop.xlane.xlu1 %1091 }
 0x72a   :  { %v1093_v39 = vsub.f32 %v1089_v5, %v1092_v38  ;;  %4519 = vpow2.f32 %v918_v40  ;;  %v215_v40 = vld [vmem:[#allocation3 + $0x50] sm:$0xff] }
 0x72c   :  { %v1094_v43 = vmul.f32 1.442695, %v1093_v39  ;;  %v216_v39 = vld [vmem:[#allocation3 + $0x58] sm:$0xff] }
 0x72d   :  { %v1260_v33 = vpop.xlane.xlu0 %1259  ;;  %4296 = vmatprep.subr.mxu1 %v216_v39 }
 0x72e   :  { %v1261_v41 = vsub.f32 %v1257_v12, %v1260_v33  ;;  %4521 = vpow2.f32 %v1094_v43  ;;  %4297 = vmatpush3.msra.mxu1 %v216_v39 }
 0x72f   :  { %v4516_v31 = vpop.eup %4515  ;;  %4298 = vmatprep.subr.mxu1 %v215_v40 }
 0x730   :  { %v574_v32 = vsel %vm319_vm13, %v4516_v31, 0.0  ;;  %v1262_v45 = vmul.f32 1.442695, %v1261_v41  ;;  %4299 = vmatpush3.msra.mxu1 %v215_v40 }
 0x731   :  { %575 = vadd.xlane.f32.xlu1 %v574_v32  ;;  %v1432_v42 = vpop.xlane.xlu1 %1431 }
 0x732   :  { %v1433_v44 = vsub.f32 %v1429_v17, %v1432_v42  ;;  %4523 = vpow2.f32 %v1262_v45  ;;  %v214_v42 = vld [vmem:[#allocation3 + $0x48] sm:$0xff] }
 0x733   :  { %v4518_v34 = vpop.eup %4517  ;;  %4300 = vmatprep.subr.mxu1 %v214_v42 }
 0x734   :  { %v747_v35 = vsel %vm319_vm13, %v4518_v34, 0.0  ;;  %v1434_v47 = vmul.f32 1.442695, %v1433_v44  ;;  %v213_v44 = vld [vmem:[#allocation3 + $0x40] sm:$0xff]  ;;  %4301 = vmatpush3.msra.mxu1 %v214_v42 }
 0x735   :  { %748 = vadd.xlane.f32.xlu0 %v747_v35  ;;  %v1604_v36 = vpop.xlane.xlu0 %1603  ;;  %v753_v5 = vpop.permute.xlu1 %752  ;;  %4302 = vmatprep.subr.mxu1 %v213_v44 }
 0x736   :  { %v1605_v46 = vsub.f32 %v1601_v22, %v1604_v36  ;;  %4525 = vpow2.f32 %v1434_v47  ;;  %4303 = vmatpush3.msra.mxu1 %v213_v44  ;;  %v230_v44 = vld [vmem:[#allocation3 + $0xf8] sm:$0xff] }
 0x737   :  { %v4520_v52 = vpop.eup %4519  ;;  %4318 = vmatprep.subr.mxu1 %v230_v44 }
 0x738   :  { %v1606_v48 = vmul.f32 1.442695, %v1605_v46  ;;  %v920_v55 = vsel %vm319_vm13, %v4520_v52, 0.0 }
 0x739   :  { %v580_v3 = vpop.permute.xlu0 %579  ;;  %v926_v6 = vpop.permute.xlu1 %925 }
 0x73a   :  { %4232 = vmatpush3.msra.mxu0 %v580_v3  ;;  %4527 = vpow2.f32 %v1606_v48 }
 0x73b   :  { %4241 = vmatprep.subr.mxu0 %v4627_v14  ;;  %v4522_v53 = vpop.eup %4521 }
 0x73c   :  { %v1096_v60 = vsel %vm319_vm13, %v4522_v53, 0.0 }
 0x73f   :  { %v4524_v56 = vpop.eup %4523 }
 0x740   :  { %v1264_v59 = vsel %vm319_vm13, %v4524_v56, 0.0 }
 0x742   :  { %1269 = vrot.lane.b32.xlu1 %v4765_v4, %s4639_s7 }
 0x743   :  { %v4526_v57 = vpop.eup %4525 }
 0x744   :  { %v1436_v2 = vsel %vm319_vm13, %v4526_v57, 0.0 }
 0x747   :  { %v4875_v0 = vpop.eup %4527 }
 0x748   :  { %v1608_v1 = vsel %vm319_vm13, %v4875_v0, 0.0 }
 0x74b   :  { %1101 = vrot.lane.b32.xlu0 %v4765_v4, %s4636_s1 }
 0x766   :  { %921 = vadd.xlane.f32.xlu1 %v920_v55 }
 0x76a   :  { %1265 = vadd.xlane.f32.xlu1 %v1264_v59  ;;  %1097 = vadd.xlane.f32.xlu0 %v1096_v60 }
 0x76e   :  { %1609 = vadd.xlane.f32.xlu1 %v1608_v1  ;;  %1437 = vadd.xlane.f32.xlu0 %v1436_v2  ;;  %v1698_v2 = vsub.s32 3, %v4717_v49 }
 0x77f   :  { %1613 = vrot.lane.b32.xlu1 %v4765_v4, %s4638_s6 }
 0x784   :  { %1441 = vrot.lane.b32.xlu0 %v4765_v4, %s4637_s3 }
 0x7ba   :  { %v576_v7 = vpop.xlane.xlu1 %575 }
 0x7bb   :  { %4529 = vrcp.f32 %v576_v7 }
 0x7be   :  { %v749_v8 = vpop.xlane.xlu0 %748  ;;  %v1270_v4 = vpop.permute.xlu1 %1269 }
 0x7bf   :  { %4531 = vrcp.f32 %v749_v8 }
 0x7c2   :  { %v1102_v15 = vpop.permute.xlu0 %1101 }
 0x7c8   :  { %v4530_v11 = vpop.eup %4529 }
 0x7c9   :  { %v578_v12 = vmul.f32 %v4530_v11, %v4516_v31 }
 0x7cb   :  { %4234 = vmatmul.mubr.msk.f32.vlgmr.msra.gmra.mxu0 %vm319_vm13, %v578_v12 }
 0x7cc   :  { %v4532_v9 = vpop.eup %4531  ;;  %4242 = vmatpush3.msra.mxu0 %v753_v5  ;;  %4243 = vmatprep.mubr.msk.f32.mxu0 %vm4628_vm12, %v4627_v14  ;;  %v1699_v5 = vrot.slane %v4725_v51, %v1698_v2 }
 0x7cd   :  { %4251 = vmatprep.subr.mxu0 %v4627_v14  ;;  %v751_v13 = vmul.f32 %v4532_v9, %v4518_v34 }
 0x7cf   :  { %4244 = vmatmul.mubr.msk.f32.vlgmr.msra.gmra.mxu0 %vm319_vm13, %v751_v13 }
 0x7d0   :  { %4252 = vmatpush3.msra.mxu0 %v926_v6  ;;  %4253 = vmatprep.mubr.msk.f32.mxu0 %vm4628_vm12, %v4627_v14 }
 0x7d1   :  { %4261 = vmatprep.subr.mxu0 %v4627_v14 }
 0x7ef   :  { %v922_v16 = vpop.xlane.xlu1 %921 }
 0x7f0   :  { %4533 = vrcp.f32 %v922_v16 }
 0x7f3   :  { %v1098_v17 = vpop.xlane.xlu0 %1097  ;;  %v1266_v18 = vpop.xlane.xlu1 %1265 }
 0x7f4   :  { %4535 = vrcp.f32 %v1098_v17 }
 0x7f5   :  { %4537 = vrcp.f32 %v1266_v18 }
 0x7f7   :  { %v1438_v19 = vpop.xlane.xlu0 %1437  ;;  %v1610_v20 = vpop.xlane.xlu1 %1609 }
 0x7f8   :  { %4539 = vrcp.f32 %v1438_v19 }
 0x7f9   :  { %4541 = vrcp.f32 %v1610_v20 }
 0x7fb   :  { %v1442_v28 = vpop.permute.xlu0 %1441  ;;  %v1614_v31 = vpop.permute.xlu1 %1613 }
 0x7fd   :  { %v4534_v21 = vpop.eup %4533 }
 0x7fe   :  { %v924_v22 = vmul.f32 %v4534_v21, %v4520_v52 }
 0x800   :  { %4254 = vmatmul.mubr.msk.f32.vlgmr.msra.gmra.mxu0 %vm319_vm13, %v924_v22 }
 0x801   :  { %v4536_v23 = vpop.eup %4535  ;;  %4262 = vmatpush3.msra.mxu0 %v1102_v15  ;;  %4263 = vmatprep.mubr.msk.f32.mxu0 %vm4628_vm12, %v4627_v14 }
 0x802   :  { %4271 = vmatprep.subr.mxu0 %v4627_v14  ;;  %v1100_v24 = vmul.f32 %v4536_v23, %v4522_v53  ;;  %v4538_v25 = vpop.eup %4537 }
 0x803   :  { %v1268_v26 = vmul.f32 %v4538_v25, %v4524_v56  ;;  %v219_v25 = vld [vmem:[#allocation3 + $0x88] sm:$0xff] }
 0x804   :  { %4264 = vmatmul.mubr.msk.f32.vlgmr.msra.gmra.mxu0 %vm319_vm13, %v1100_v24  ;;  %v221_v24 = vld [vmem:[#allocation3 + $0x98] sm:$0xff] }
 0x805   :  { %4272 = vmatpush3.msra.mxu0 %v1270_v4  ;;  %4273 = vmatprep.mubr.msk.f32.mxu0 %vm4628_vm12, %v4627_v14  ;;  %v4540_v27 = vpop.eup %4539 }
 0x806   :  { %4281 = vmatprep.subr.mxu0 %v4627_v14  ;;  %v1440_v29 = vmul.f32 %v4540_v27, %v4526_v57  ;;  %v4542_v30 = vpop.eup %4541 }
 0x807   :  { %v1612_v32 = vmul.f32 %v4542_v30, %v4875_v0 }
 0x808   :  { %4274 = vmatmul.mubr.msk.f32.vlgmr.msra.gmra.mxu0 %vm319_vm13, %v1268_v26  ;;  %v218_v26 = vld [vmem:[#allocation3 + $0x80] sm:$0xff] }
 0x809   :  { %4282 = vmatpush3.msra.mxu0 %v1442_v28  ;;  %4283 = vmatprep.mubr.msk.f32.mxu0 %vm4628_vm12, %v4627_v14 }
 0x80a   :  { %4291 = vmatprep.subr.mxu0 %v4627_v14 }
 0x80c   :  { %4284 = vmatmul.mubr.msk.f32.vlgmr.msra.gmra.mxu0 %vm319_vm13, %v1440_v29 }
 0x80d   :  { %4292 = vmatpush3.msra.mxu0 %v1614_v31  ;;  %4293 = vmatprep.mubr.msk.f32.mxu0 %vm4628_vm12, %v4627_v14 }
 0x80e   :  { %4307 = vmatprep.subr.mxu0 %v221_v24 }
 0x810   :  { %4294 = vmatmul.mubr.msk.f32.vlgmr.msra.gmra.mxu0 %vm319_vm13, %v1612_v32 }
 0x811   :  { %4308 = vmatpush3.msra.mxu0 %v221_v24 }
 0x88b   :  { %v651_v33 = vpop.f32.mrf.mxu0 }
 0x88c   :  { %656 = vrot.lane.b32.xlu0 %v651_v33, %s4623_s22  ;;  %v1811_v33 = vsub.s32 4, %v4717_v49 }
 0x88d   :  { %v4235_v34 = vpop.f32.mrf.mxu0 }
 0x88e   :  { %v1817_v34 = vsub.s32 5, %v4717_v49 }
 0x88f   :  { %v824_v35 = vpop.f32.mrf.mxu0 }
 0x890   :  { %829 = vrot.lane.b32.xlu1 %v824_v35, %s4640_s8  ;;  %v1812_v35 = vrot.slane %v4725_v51, %v1811_v33 }
 0x891   :  { %v4245_v36 = vpop.f32.mrf.mxu0 }
 0x8c0   :  { %v997_v3 = vpop.f32.mrf.mxu0 }
 0x8c1   :  { %1002 = vrot.lane.b32.xlu1 %v997_v3, %s4641_s0 }
 0x8c2   :  { %v4255_v37 = vpop.f32.mrf.mxu0 }
 0x8c3   :  { %v1818_v37 = vrot.slane %v4725_v51, %v1817_v34 }
 0x8c4   :  { %v1173_v38 = vpop.f32.mrf.mxu0 }
 0x8c5   :  { %1177 = vst.msk [vmem:[#allocation2 + $0x8] sm:$0xff] %vm319_vm13, %v1173_v38 }
 0x8c6   :  { %v4265_v41 = vpop.f32.mrf.mxu0 }
 0x8c8   :  { %v1341_v43 = vpop.f32.mrf.mxu0 }
 0x8c9   :  { %1346 = vrot.lane.b32.xlu0 %v1341_v43, %s4623_s22 }
 0x8ca   :  { %v4275_v45 = vpop.f32.mrf.mxu0 }
 0x8cb   :  { %v229_v45 = vld [vmem:[#allocation3 + $0xf0] sm:$0xff] }
 0x8cc   :  { %v1513_v46 = vpop.f32.mrf.mxu0 }
 0x8cd   :  { %1518 = vrot.lane.b32.xlu0 %v1513_v46, %s4640_s8  ;;  %v228_v46 = vld [vmem:[#allocation3 + $0xe8] sm:$0xff] }
 0x8ce   :  { %v4285_v47 = vpop.f32.mrf.mxu0 }
 0x8cf   :  { %v227_v47 = vld [vmem:[#allocation3 + $0xe0] sm:$0xff] }
 0x8d0   :  { %v1685_v48 = vpop.f32.mrf.mxu0 }
 0x8d1   :  { %1690 = vrot.lane.b32.xlu1 %v1685_v48, %s4641_s0  ;;  %v226_v48 = vld [vmem:[#allocation3 + $0xd8] sm:$0xff] }
 0x8d2   :  { %v4295_v52 = vpop.f32.mrf.mxu0 }
 0x8d3   :  { %v225_v52 = vld [vmem:[#allocation3 + $0xd0] sm:$0xff] }
 0x8fe   :  { %v657_v53 = vpop.permute.xlu0 %656 }
 0x8ff   :  { %660 = vst.msk [vmem:[#allocation2] sm:$0xff] %vm659_vm14, %v657_v53  ;;  %v224_v53 = vld [vmem:[#allocation3 + $0xc8] sm:$0xff] }
 0x902   :  { %v830_v55 = vpop.permute.xlu1 %829 }
 0x903   :  { %833 = vst.msk [vmem:[#allocation2] sm:$0xff] %vm832_vm15, %v830_v55  ;;  %v223_v55 = vld [vmem:[#allocation3 + $0xc0] sm:$0xff] }
 0x933   :  { %v1003_v56 = vpop.permute.xlu1 %1002 }
 0x934   :  { %1006 = vst.msk [vmem:[#allocation2] sm:$0xff] %vm1005_vm0, %v1003_v56  ;;  %v1823_v56 = vsub.s32 6, %v4717_v49 }
 0x93b   :  { %v1347_v57 = vpop.permute.xlu0 %1346  ;;  %v1694_v59 = vld [vmem:[#allocation2] sm:$0xff] }
 0x93c   :  { %1349 = vst.msk [vmem:[#allocation2 + $0x8] sm:$0xff] %vm659_vm14, %v1347_v57  ;;  %4304 = vmatprep.mubr.msk.f32.mxu1 %vm164_vm11, %v1694_v59  ;;  %v1824_v57 = vrot.slane %v4725_v51, %v1823_v56 }
 0x93f   :  { %v1519_v60 = vpop.permute.xlu0 %1518 }
 0x940   :  { %1521 = vst.msk [vmem:[#allocation2 + $0x8] sm:$0xff] %vm832_vm15, %v1519_v60 }
 0x943   :  { %v1691_v0 = vpop.permute.xlu1 %1690 }
 0x944   :  { %1693 = vst.msk [vmem:[#allocation2 + $0x8] sm:$0xff] %vm1005_vm0, %v1691_v0 }
 0x94b   :  { %v1695_v1 = vld [vmem:[#allocation2 + $0x8] sm:$0xff] }
 0x94c   :  { %4305 = vmatmul.mubr.msk.f32.vlgmr.msra.gmra.mxu1 %vm164_vm11, %v1695_v1 }
 0x94d   :  { %4319 = vmatpush3.msra.mxu1 %v230_v44  ;;  %v2052_v44 = vld [vmem:[#allocation3 + $0x108] sm:$0xff] }
 0x94e   :  { %4320 = vmatprep.subr.mxu1 %v229_v45 }
 0x94f   :  { %4321 = vmatpush3.msra.mxu1 %v229_v45  ;;  %v2051_v45 = vld [vmem:[#allocation3 + $0x100] sm:$0xff] }
 0x950   :  { %4322 = vmatprep.subr.mxu1 %v228_v46 }
 0x951   :  { %4323 = vmatpush3.msra.mxu1 %v228_v46 }
 0x952   :  { %4324 = vmatprep.subr.mxu1 %v227_v47 }
 0x953   :  { %4325 = vmatpush3.msra.mxu1 %v227_v47 }
 0x954   :  { %4326 = vmatprep.subr.mxu1 %v226_v48 }
 0x955   :  { %4327 = vmatpush3.msra.mxu1 %v226_v48 }
 0x956   :  { %4328 = vmatprep.subr.mxu1 %v225_v52 }
 0x957   :  { %4329 = vmatpush3.msra.mxu1 %v225_v52 }
 0x958   :  { %4330 = vmatprep.subr.mxu1 %v224_v53 }
 0x959   :  { %4331 = vmatpush3.msra.mxu1 %v224_v53 }
 0x95a   :  { %4332 = vmatprep.subr.mxu1 %v223_v55 }
 0x95b   :  { %4333 = vmatpush3.msra.mxu1 %v223_v55 }
 0x95c   :  { %4358 = vmatprep.subr.mxu1 %v4627_v14 }
 0xa0c   :  { %v4306_v6 = vpop.f32.mrf.mxu1 }
 0xa0d   :  { %v1778_v7 = vadd.f32 %v4306_v6, %v1699_v5 }
 0xa0e   :  { %v1772_v8 = vpop.f32.mrf.mxu1 }
 0xa0f   :  { %v1773_v11 = vadd.f32 %v1772_v8, %v1699_v5  ;;  %v1782_v12 = vadd.f32 %v1778_v7, %v4736_v62 }
 0xa11   :  { %v1786_v9 = vsel %vm164_vm11, %v1782_v12, 0.0  ;;  %v1781_v13 = vadd.f32 %v1773_v11, %v4734_v61  ;;  %v220_v61 = vld [vmem:[#allocation3 + $0x90] sm:$0xff] }
 0xa12   :  { %1787 = vadd.xlane.f32.xlu1 %v1786_v9  ;;  %4309 = vmatprep.subr.mxu0 %v220_v61 }
 0xa13   :  { %v1783_v4 = vsel %vm164_vm11, %v1781_v13, 0.0  ;;  %4310 = vmatpush3.msra.mxu0 %v220_v61 }
 0xa14   :  { %1784 = vadd.xlane.f32.xlu0 %v1783_v4  ;;  %4311 = vmatprep.subr.mxu0 %v219_v25 }
 0xa15   :  { %4312 = vmatpush3.msra.mxu0 %v219_v25 }
 0xa16   :  { %4313 = vmatprep.subr.mxu0 %v218_v26 }
 0xa17   :  { %4314 = vmatpush3.msra.mxu0 %v218_v26 }
 0xa9b   :  { %v1788_v15 = vpop.xlane.xlu1 %1787 }
 0xa9c   :  { %v1790_v16 = vmul.f32 0.03125, %v1788_v15 }
 0xa9d   :  { %v1785_v17 = vpop.xlane.xlu0 %1784 }
 0xa9e   :  { %v1789_v18 = vmul.f32 0.03125, %v1785_v17  ;;  %v1792_v19 = vsub.f32 %v1782_v12, %v1790_v16 }
 0xaa0   :  { %v1791_v20 = vsub.f32 %v1781_v13, %v1789_v18  ;;  %v1794_v23 = vmul.f32 %v1792_v19, %v1792_v19 }
 0xaa2   :  { %v1793_v21 = vmul.f32 %v1791_v20, %v1791_v20  ;;  %v1798_v62 = vsel %vm164_vm11, %v1794_v23, 0.0 }
 0xaa4   :  { %v1795_v22 = vsel %vm164_vm11, %v1793_v21, 0.0 }
 0xaa5   :  { %1796 = vadd.xlane.f32.xlu0 %v1795_v22 }
 0xaa9   :  { %1799 = vadd.xlane.f32.xlu0 %v1798_v62  ;;  %v1926_v62 = vsub.s32 7, %v4717_v49 }
 0xaab   :  { %v1927_v24 = vrot.slane %v4725_v51, %v1926_v62 }
 0xb2e   :  { %v1797_v27 = vpop.xlane.xlu0 %1796 }
 0xb2f   :  { %v1801_v28 = vmul.f32 0.03125, %v1797_v27 }
 0xb31   :  { %v1803_v29 = vadd.f32 1e-12, %v1801_v28 }
 0xb32   :  { %v1800_v30 = vpop.xlane.xlu0 %1799 }
 0xb33   :  { %4543 = vrsqrt.f32 %v1803_v29  ;;  %v1802_v31 = vmul.f32 0.03125, %v1800_v30 }
 0xb35   :  { %v1804_v32 = vadd.f32 1e-12, %v1802_v31 }
 0xb37   :  { %4545 = vrsqrt.f32 %v1804_v32 }
 0xb40   :  { %v4544_v36 = vpop.eup %4543 }
 0xb41   :  { %v1807_v3 = vmul.f32 %v4544_v36, %v1791_v20 }
 0xb43   :  { %v1813_v38 = vmul.f32 %v1812_v35, %v1807_v3 }
 0xb44   :  { %v4546_v39 = vpop.eup %4545 }
 0xb45   :  { %v1808_v40 = vmul.f32 %v4546_v39, %v1792_v19  ;;  %v4942_v41 = vadd.f32 %v1818_v37, %v1813_v38 }
 0xb47   :  { %v1814_v42 = vmul.f32 %v1812_v35, %v1808_v40  ;;  %4315 = vmatprep.mubr.msk.f32.mxu0 %vm164_vm11, %v4942_v41 }
 0xb49   :  { %v4946_v43 = vadd.f32 %v1818_v37, %v1814_v42 }
 0xb4b   :  { %4316 = vmatmul.mubr.msk.f32.vlgmr.msra.gmra.mxu0 %vm164_vm11, %v4946_v43 }
 0xc0b   :  { %v4317_v59 = vpop.f32.mrf.mxu0 }
 0xc0c   :  { %v1903_v60 = vadd.f32 %v4317_v59, %v1824_v57 }
 0xc0d   :  { %v1897_v0 = vpop.f32.mrf.mxu0 }
 0xc0e   :  { %v1909_v1 = vmul.f32 0.044715, %v1903_v60  ;;  %v1898_v5 = vadd.f32 %v1897_v0, %v1824_v57  ;;  %v1907_v21 = vmul.f32 0.5, %v1903_v60  ;;  %v4973_v57 = vld [vmem:[%s5213_s4 + $0x8] sm:$0xff] }
 0xc10   :  { %v1911_v6 = vmul.f32 %v1909_v1, %v1903_v60  ;;  %v1908_v7 = vmul.f32 0.044715, %v1898_v5  ;;  %v1906_v19 = vmul.f32 0.5, %v1898_v5 }
 0xc12   :  { %v1913_v8 = vmul.f32 %v1911_v6, %v1903_v60  ;;  %v1910_v11 = vmul.f32 %v1908_v7, %v1898_v5  ;;  %v2047_v7 = vrot.slane %v4973_v57, %v4730_v54 }
 0xc14   :  { %v1915_v12 = vadd.f32 %v1913_v8, %v1903_v60  ;;  %v1912_v9 = vmul.f32 %v1910_v11, %v1898_v5  ;;  %v2041_v60 = vrot.slane %v4973_v57, %v4720_v50 }
 0xc16   :  { %v1917_v13 = vmul.f32 0.7978846, %v1915_v12  ;;  %v1914_v4 = vadd.f32 %v1912_v9, %v1898_v5 }
 0xc18   :  { %4547 = vtanh.f32 %v1917_v13  ;;  %v1916_v15 = vmul.f32 0.7978846, %v1914_v4  ;;  %v2077_v13 = vrot.slane %v4973_v57, %v4747_v63 }
 0xc1a   :  { %4549 = vtanh.f32 %v1916_v15 }
 0xc25   :  { %v4548_v16 = vpop.eup %4547 }
 0xc26   :  { %v1921_v18 = vadd.f32 1.0, %v4548_v16 }
 0xc27   :  { %v4550_v17 = vpop.eup %4549 }
 0xc28   :  { %v1920_v20 = vadd.f32 1.0, %v4550_v17  ;;  %v1923_v23 = vmul.f32 %v1921_v18, %v1907_v21 }
 0xc2a   :  { %v1922_v22 = vmul.f32 %v1920_v20, %v1906_v19 }
 0xc2c   :  { %4334 = vmatprep.mubr.msk.f32.mxu1 %vm1928_vm1, %v1922_v22 }
 0xc2d   :  { %4335 = vmatmul.mubr.msk.f32.vlgmr.msra.gmra.mxu1 %vm1928_vm1, %v1923_v23 }
 0xc2e   :  { %4360 = vmatprep.mubr.msk.f32.mxu1 %vm4628_vm12, %v4627_v14 }
 0xced   :  { %v4336_v61 = vpop.f32.mrf.mxu1 }
 0xcee   :  { %v2007_v25 = vadd.f32 %v4336_v61, %v1927_v24 }
 0xcef   :  { %v2001_v26 = vpop.f32.mrf.mxu1 }
 0xcf0   :  { %v2002_v27 = vadd.f32 %v2001_v26, %v1927_v24  ;;  %v2011_v28 = vadd.f32 %v2007_v25, %v4946_v43  ;;  %v2054_v43 = vld [vmem:[#allocation3 + $0x118] sm:$0xff] }
 0xcf1   :  { %4337 = vmatprep.subr.mxu0 %v2054_v43 }
 0xcf2   :  { %v2015_v29 = vsel %vm164_vm11, %v2011_v28, 0.0  ;;  %v2010_v30 = vadd.f32 %v2002_v27, %v4942_v41  ;;  %v2053_v41 = vld [vmem:[#allocation3 + $0x110] sm:$0xff]  ;;  %4338 = vmatpush3.msra.mxu0 %v2054_v43 }
 0xcf3   :  { %2016 = vadd.xlane.f32.xlu0 %v2015_v29  ;;  %4339 = vmatprep.subr.mxu0 %v2053_v41 }
 0xcf4   :  { %v2012_v31 = vsel %vm164_vm11, %v2010_v30, 0.0  ;;  %4340 = vmatpush3.msra.mxu0 %v2053_v41 }
 0xcf5   :  { %2013 = vadd.xlane.f32.xlu1 %v2012_v31  ;;  %4341 = vmatprep.subr.mxu0 %v2052_v44 }
 0xcf6   :  { %4342 = vmatpush3.msra.mxu0 %v2052_v44 }
 0xcf7   :  { %4343 = vmatprep.subr.mxu0 %v2051_v45 }
 0xcf8   :  { %4344 = vmatpush3.msra.mxu0 %v2051_v45 }
 0xcf9   :  { %4348 = vmatprep.subr.mxu0 %v4627_v14 }
 0xd7c   :  { %v2017_v32 = vpop.xlane.xlu0 %2016 }
 0xd7d   :  { %v2019_v35 = vmul.f32 0.03125, %v2017_v32 }
 0xd7e   :  { %v2014_v36 = vpop.xlane.xlu1 %2013 }
 0xd7f   :  { %v2021_v3 = vsub.f32 %v2011_v28, %v2019_v35  ;;  %v2018_v37 = vmul.f32 0.03125, %v2014_v36 }
 0xd81   :  { %v2020_v51 = vsub.f32 %v2010_v30, %v2018_v37  ;;  %v2023_v38 = vmul.f32 %v2021_v3, %v2021_v3 }
 0xd83   :  { %v2027_v39 = vsel %vm164_vm11, %v2023_v38, 0.0  ;;  %v2022_v40 = vmul.f32 %v2020_v51, %v2020_v51 }
 0xd84   :  { %2028 = vadd.xlane.f32.xlu0 %v2027_v39 }
 0xd85   :  { %v2024_v42 = vsel %vm164_vm11, %v2022_v40, 0.0 }
 0xd86   :  { %2025 = vadd.xlane.f32.xlu1 %v2024_v42 }
 0xe0d   :  { %v2029_v46 = vpop.xlane.xlu0 %2028 }
 0xe0e   :  { %v2031_v47 = vmul.f32 0.03125, %v2029_v46 }
 0xe0f   :  { %v2026_v48 = vpop.xlane.xlu1 %2025 }
 0xe10   :  { %v2033_v52 = vadd.f32 1e-12, %v2031_v47  ;;  %v2030_v53 = vmul.f32 0.03125, %v2026_v48 }
 0xe12   :  { %4551 = vrsqrt.f32 %v2033_v52  ;;  %v2032_v55 = vadd.f32 1e-12, %v2030_v53 }
 0xe14   :  { %4553 = vrsqrt.f32 %v2032_v55 }
 0xe1f   :  { %v4552_v59 = vpop.eup %4551 }
 0xe20   :  { %v2037_v0 = vmul.f32 %v4552_v59, %v2021_v3 }
 0xe21   :  { %v4554_v1 = vpop.eup %4553 }
 0xe22   :  { %v2036_v5 = vmul.f32 %v4554_v1, %v2020_v51  ;;  %v2043_v6 = vmul.f32 %v2041_v60, %v2037_v0 }
 0xe24   :  { %v2042_v8 = vmul.f32 %v2041_v60, %v2036_v5  ;;  %v4981_v12 = vadd.f32 %v2047_v7, %v2043_v6 }
 0xe26   :  { %v4979_v11 = vadd.f32 %v2047_v7, %v2042_v8 }
 0xe28   :  { %4345 = vmatprep.mubr.msk.f32.mxu0 %vm164_vm11, %v4979_v11 }
 0xe29   :  { %4346 = vmatmul.mubr.msk.f32.vlgmr.msra.gmra.mxu0 %vm164_vm11, %v4981_v12 }
 0xe2a   :  { %4350 = vmatprep.mubr.msk.f32.mxu0 %vm4628_vm12, %v4627_v14 }
 0xee9   :  { %v4347_v9 = vpop.f32.mrf.mxu0 }
 0xeea   :  { %v5005_v16 = vadd.f32 %v4347_v9, %v2077_v13 }
 0xeeb   :  { %v2150_v4 = vpop.f32.mrf.mxu0 }
 0xeec   :  { %v4991_v15 = vadd.f32 %v2150_v4, %v2077_v13 }
 0xeee   :  { %2328 = vrot.lane.b32.xlu0 %v4991_v15, %s4630_s23  ;;  %2160 = vrot.lane.b32.xlu1 %v4991_v15, %s4629_s21 }
 0xef2   :  { %2498 = vrot.lane.b32.xlu0 %v4991_v15, %s4633_s26  ;;  %2326 = vrot.lane.b32.xlu1 %v4991_v15, %s4631_s24 }
 0xef6   :  { %2670 = vrot.lane.b32.xlu0 %v4991_v15, %s4634_s27  ;;  %2500 = vrot.lane.b32.xlu1 %v4991_v15, %s4632_s25 }
 0xefa   :  { %3011 = vrot.lane.b32.xlu0 %v5005_v16, %s4630_s23  ;;  %2672 = vrot.lane.b32.xlu1 %v4991_v15, %s4635_s28 }
 0xefe   :  { %3183 = vrot.lane.b32.xlu0 %v5005_v16, %s4632_s25  ;;  %2843 = vrot.lane.b32.xlu1 %v5005_v16, %s4629_s21 }
 0xf02   :  { %3355 = vrot.lane.b32.xlu0 %v5005_v16, %s4635_s28  ;;  %3009 = vrot.lane.b32.xlu1 %v5005_v16, %s4631_s24 }
 0xf06   :  { %2249 = vrot.lane.b32.xlu0 %v4991_v15, %s4636_s1  ;;  %3181 = vrot.lane.b32.xlu1 %v5005_v16, %s4633_s26 }
 0xf0a   :  { %3353 = vrot.lane.b32.xlu1 %v5005_v16, %s4634_s27 }
 0xf0e   :  { %2417 = vrot.lane.b32.xlu1 %v4991_v15, %s4639_s7 }
 0xf60   :  { %v2329_v17 = vpop.permute.xlu0 %2328  ;;  %v2161_v18 = vpop.permute.xlu1 %2160 }
 0xf61   :  { %4349 = vmatpush3.xpose.msk.msra.mxu0 %vm319_vm13, %v2161_v18  ;;  %4359 = vmatpush3.xpose.msk.msra.mxu1 %vm319_vm13, %v2329_v17 }
 0xf62   :  { %4368 = vmatprep.subr.mxu1 %v4627_v14  ;;  %4353 = vmatprep.subr.mxu0 %v4627_v14 }
 0xf64   :  { %v2499_v19 = vpop.permute.xlu0 %2498  ;;  %4351 = vmatmul.mubr.msk.f32.vlgmr.msra.gmra.mxu0 %vm319_vm13, %v4991_v15  ;;  %v2327_v20 = vpop.permute.xlu1 %2326 }
 0xf65   :  { %4361 = vmatmul.mubr.msk.f32.vlgmr.msra.gmra.mxu1 %vm319_vm13, %v2327_v20  ;;  %4355 = vmatprep.mubr.msk.f32.mxu0 %vm4628_vm12, %v4627_v14 }
 0xf66   :  { %4370 = vmatprep.mubr.msk.f32.mxu1 %vm4628_vm12, %v4627_v14 }
 0xf68   :  { %v2671_v21 = vpop.permute.xlu0 %2670  ;;  %v2501_v22 = vpop.permute.xlu1 %2500 }
 0xf69   :  { %4369 = vmatpush3.xpose.msk.msra.mxu1 %vm319_vm13, %v2501_v22 }
 0xf6a   :  { %4378 = vmatprep.subr.mxu1 %v4627_v14 }
 0xf6c   :  { %v3012_v23 = vpop.permute.xlu0 %3011  ;;  %4371 = vmatmul.mubr.msk.f32.vlgmr.msra.gmra.mxu1 %vm319_vm13, %v2499_v19  ;;  %v2673_v24 = vpop.permute.xlu1 %2672 }
 0xf6d   :  { %4379 = vmatpush3.xpose.msk.msra.mxu1 %vm319_vm13, %v2673_v24  ;;  %4380 = vmatprep.mubr.msk.f32.mxu1 %vm4628_vm12, %v4627_v14 }
 0xf6e   :  { %4388 = vmatprep.subr.mxu1 %v4627_v14 }
 0xf70   :  { %v3184_v61 = vpop.permute.xlu0 %3183  ;;  %4381 = vmatmul.mubr.msk.f32.vlgmr.msra.gmra.mxu1 %vm319_vm13, %v2671_v21  ;;  %v2844_v25 = vpop.permute.xlu1 %2843 }
 0xf71   :  { %4389 = vmatpush3.xpose.msk.msra.mxu1 %vm319_vm13, %v2844_v25  ;;  %4390 = vmatprep.mubr.msk.f32.mxu1 %vm4628_vm12, %v4627_v14 }
 0xf72   :  { %4398 = vmatprep.subr.mxu1 %v4627_v14 }
 0xf74   :  { %v3356_v26 = vpop.permute.xlu0 %3355  ;;  %4391 = vmatmul.mubr.msk.f32.vlgmr.msra.gmra.mxu1 %vm319_vm13, %v5005_v16  ;;  %v3010_v27 = vpop.permute.xlu1 %3009 }
 0xf75   :  { %4399 = vmatpush3.xpose.msk.msra.mxu1 %vm319_vm13, %v3012_v23  ;;  %4400 = vmatprep.mubr.msk.f32.mxu1 %vm4628_vm12, %v4627_v14 }
 0xf76   :  { %4408 = vmatprep.subr.mxu1 %v4627_v14 }
 0xf78   :  { %v2250_v28 = vpop.permute.xlu0 %2249  ;;  %4401 = vmatmul.mubr.msk.f32.vlgmr.msra.gmra.mxu1 %vm319_vm13, %v3010_v27  ;;  %v3182_v29 = vpop.permute.xlu1 %3181 }
 0xf79   :  { %4354 = vmatpush3.msra.mxu0 %v2250_v28  ;;  %4409 = vmatpush3.xpose.msk.msra.mxu1 %vm319_vm13, %v3184_v61 }
 0xf7a   :  { %4410 = vmatprep.mubr.msk.f32.mxu1 %vm4628_vm12, %v4627_v14  ;;  %4418 = vmatprep.subr.mxu1 %v4627_v14 }
 0xf7b   :  { %4363 = vmatprep.subr.mxu0 %v4627_v14 }
 0xf7c   :  { %4411 = vmatmul.mubr.msk.f32.vlgmr.msra.gmra.mxu1 %vm319_vm13, %v3182_v29  ;;  %v3354_v30 = vpop.permute.xlu1 %3353 }
 0xf7d   :  { %4419 = vmatpush3.xpose.msk.msra.mxu1 %vm319_vm13, %v3356_v26  ;;  %4420 = vmatprep.mubr.msk.f32.mxu1 %vm4628_vm12, %v4627_v14 }
 0xf80   :  { %4421 = vmatmul.mubr.msk.f32.vlgmr.msra.gmra.mxu1 %vm319_vm13, %v3354_v30  ;;  %v5087_v24 = vpop.permute.xlu1 %2417 }
0x1024   :  { %v2232_v31 = vpop.f32.mrf.mxu0 }
0x1025   :  { %v2236_v32 = vmul.f32 0.35355338, %v2232_v31  ;;  %v2400_v35 = vpop.f32.mrf.mxu1 }
0x1026   :  { %v2404_v36 = vmul.f32 0.35355338, %v2400_v35  ;;  %v4352_v3 = vpop.f32.mrf.mxu0 }
0x1027   :  { %v4362_v37 = vpop.f32.mrf.mxu1  ;;  %v2237_v51 = vadd.f32 %v2236_v32, %v4786_v10 }
0x1028   :  { %v2405_v38 = vadd.f32 %v2404_v36, %v4786_v10 }
0x1029   :  { %v2238_v39 = vsel %vm319_vm13, %v2237_v51, -inf }
0x102a   :  { %2239 = vmax.xlane.f32.xlu0 %v2238_v39  ;;  %v2406_v40 = vsel %vm319_vm13, %v2405_v38, -inf }
0x102b   :  { %2407 = vmax.xlane.f32.xlu1 %v2406_v40 }
0x102c   :  { %v2572_v42 = vpop.f32.mrf.mxu1 }
0x102d   :  { %v2576_v43 = vmul.f32 0.35355338, %v2572_v42 }
0x102e   :  { %v4372_v41 = vpop.f32.mrf.mxu1 }
0x102f   :  { %v2577_v44 = vadd.f32 %v2576_v43, %v4786_v10 }
0x1030   :  { %v2744_v45 = vpop.f32.mrf.mxu1 }
0x1031   :  { %v2748_v46 = vmul.f32 0.35355338, %v2744_v45  ;;  %v2578_v47 = vsel %vm319_vm13, %v2577_v44, -inf }
0x1032   :  { %2579 = vmax.xlane.f32.xlu0 %v2578_v47  ;;  %v4382_v48 = vpop.f32.mrf.mxu1 }
0x1033   :  { %v2749_v52 = vadd.f32 %v2748_v46, %v4786_v10 }
0x1034   :  { %v2915_v53 = vpop.f32.mrf.mxu1 }
0x1035   :  { %v2919_v55 = vmul.f32 0.35355338, %v2915_v53  ;;  %v2750_v59 = vsel %vm319_vm13, %v2749_v52, -inf }
0x1036   :  { %2751 = vmax.xlane.f32.xlu0 %v2750_v59  ;;  %v4392_v60 = vpop.f32.mrf.mxu1 }
0x1037   :  { %v2920_v0 = vadd.f32 %v2919_v55, %v4847_v58 }
0x1038   :  { %v3083_v1 = vpop.f32.mrf.mxu1 }
0x1039   :  { %v3087_v5 = vmul.f32 0.35355338, %v3083_v1  ;;  %v2921_v6 = vsel %vm319_vm13, %v2920_v0, -inf }
0x103a   :  { %2922 = vmax.xlane.f32.xlu1 %v2921_v6  ;;  %v4402_v7 = vpop.f32.mrf.mxu1 }
0x103b   :  { %v3088_v8 = vadd.f32 %v3087_v5, %v4847_v58 }
0x103c   :  { %v3255_v9 = vpop.f32.mrf.mxu1 }
0x103d   :  { %v3259_v13 = vmul.f32 0.35355338, %v3255_v9  ;;  %v3089_v10 = vsel %vm319_vm13, %v3088_v8, -inf }
0x103e   :  { %3090 = vmax.xlane.f32.xlu0 %v3089_v10  ;;  %v4412_v4 = vpop.f32.mrf.mxu1 }
0x103f   :  { %v3260_v17 = vadd.f32 %v3259_v13, %v4847_v58 }
0x1040   :  { %v3427_v18 = vpop.f32.mrf.mxu1 }
0x1041   :  { %v3431_v19 = vmul.f32 0.35355338, %v3427_v18  ;;  %v3261_v20 = vsel %vm319_vm13, %v3260_v17, -inf }
0x1042   :  { %3262 = vmax.xlane.f32.xlu1 %v3261_v20  ;;  %v4422_v21 = vpop.f32.mrf.mxu1 }
0x1043   :  { %v3432_v22 = vadd.f32 %v3431_v19, %v4847_v58 }
0x1045   :  { %v3433_v23 = vsel %vm319_vm13, %v3432_v22, -inf }
0x1046   :  { %3434 = vmax.xlane.f32.xlu0 %v3433_v23 }
0x1053   :  { %2761 = vrot.lane.b32.xlu1 %v4991_v15, %s4638_s6 }
0x105c   :  { %2589 = vrot.lane.b32.xlu0 %v4991_v15, %s4637_s3 }
0x10b3   :  { %v2240_v61 = vpop.xlane.xlu0 %2239 }
0x10b4   :  { %v2241_v25 = vsub.f32 %v2237_v51, %v2240_v61  ;;  %v2408_v26 = vpop.xlane.xlu1 %2407 }
0x10b5   :  { %v2409_v27 = vsub.f32 %v2405_v38, %v2408_v26 }
0x10b6   :  { %v2242_v28 = vmul.f32 1.442695, %v2241_v25 }
0x10b7   :  { %v2410_v29 = vmul.f32 1.442695, %v2409_v27 }
0x10b8   :  { %4555 = vpow2.f32 %v2242_v28 }
0x10b9   :  { %4557 = vpow2.f32 %v2410_v29 }
0x10bb   :  { %v2580_v58 = vpop.xlane.xlu0 %2579 }
0x10bc   :  { %v2581_v30 = vsub.f32 %v2577_v44, %v2580_v58 }
0x10be   :  { %v2582_v31 = vmul.f32 1.442695, %v2581_v30 }
0x10bf   :  { %v2752_v32 = vpop.xlane.xlu0 %2751 }
0x10c0   :  { %4559 = vpow2.f32 %v2582_v31  ;;  %v2753_v35 = vsub.f32 %v2749_v52, %v2752_v32 }
0x10c2   :  { %v2754_v36 = vmul.f32 1.442695, %v2753_v35 }
0x10c3   :  { %v2923_v43 = vpop.xlane.xlu1 %2922 }
0x10c4   :  { %4561 = vpow2.f32 %v2754_v36  ;;  %v2924_v41 = vsub.f32 %v2920_v0, %v2923_v43 }
0x10c5   :  { %v4556_v3 = vpop.eup %4555 }
0x10c6   :  { %v4558_v15 = vpop.eup %4557  ;;  %v2244_v37 = vsel %vm319_vm13, %v4556_v3, 0.0  ;;  %v2925_v47 = vmul.f32 1.442695, %v2924_v41 }
0x10c7   :  { %2245 = vadd.xlane.f32.xlu1 %v2244_v37  ;;  %v2412_v51 = vsel %vm319_vm13, %v4558_v15, 0.0  ;;  %v3091_v44 = vpop.xlane.xlu0 %3090 }
0x10c8   :  { %2413 = vadd.xlane.f32.xlu0 %v2412_v51  ;;  %v3092_v46 = vsub.f32 %v3088_v8, %v3091_v44  ;;  %4563 = vpow2.f32 %v2925_v47 }
0x10ca   :  { %v3093_v53 = vmul.f32 1.442695, %v3092_v46 }
0x10cb   :  { %v3263_v45 = vpop.xlane.xlu1 %3262 }
0x10cc   :  { %v3264_v48 = vsub.f32 %v3260_v17, %v3263_v45  ;;  %4565 = vpow2.f32 %v3093_v53  ;;  %v2058_v53 = vld [vmem:[#allocation3 + $0x150] sm:$0xff] }
0x10cd   :  { %v4560_v38 = vpop.eup %4559 }
0x10ce   :  { %v2584_v39 = vsel %vm319_vm13, %v4560_v38, 0.0  ;;  %v3265_v55 = vmul.f32 1.442695, %v3264_v48 }
0x10cf   :  { %2585 = vadd.xlane.f32.xlu1 %v2584_v39  ;;  %v3435_v52 = vpop.xlane.xlu0 %3434  ;;  %v2762_v10 = vpop.permute.xlu1 %2761 }
0x10d0   :  { %v3436_v59 = vsub.f32 %v3432_v22, %v3435_v52  ;;  %4567 = vpow2.f32 %v3265_v55  ;;  %v2059_v52 = vld [vmem:[#allocation3 + $0x158] sm:$0xff] }
0x10d1   :  { %v5092_v40 = vpop.eup %4561  ;;  %4428 = vmatprep.subr.mxu1 %v2059_v52 }
0x10d2   :  { %v2756_v42 = vsel %vm319_vm13, %v5092_v40, 0.0  ;;  %v3437_v60 = vmul.f32 1.442695, %v3436_v59  ;;  %4429 = vmatpush3.msra.mxu1 %v2059_v52  ;;  %v2057_v59 = vld [vmem:[#allocation3 + $0x148] sm:$0xff] }
0x10d3   :  { %2757 = vadd.xlane.f32.xlu0 %v2756_v42  ;;  %v2590_v4 = vpop.permute.xlu0 %2589  ;;  %4430 = vmatprep.subr.mxu1 %v2058_v53 }
0x10d4   :  { %4569 = vpow2.f32 %v3437_v60  ;;  %4431 = vmatpush3.msra.mxu1 %v2058_v53 }
0x10d5   :  { %v4564_v1 = vpop.eup %4563  ;;  %4432 = vmatprep.subr.mxu1 %v2057_v59 }
0x10d6   :  { %v2927_v6 = vsel %vm319_vm13, %v4564_v1, 0.0  ;;  %4433 = vmatpush3.msra.mxu1 %v2057_v59  ;;  %v2073_v59 = vld [vmem:[#allocation3 + $0x1f8] sm:$0xff] }
0x10d9   :  { %v5100_v5 = vpop.eup %4565 }
0x10da   :  { %v3095_v7 = vsel %vm319_vm13, %v5100_v5, 0.0 }
0x10dd   :  { %v5103_v0 = vpop.eup %4567 }
0x10de   :  { %v3267_v8 = vsel %vm319_vm13, %v5103_v0, 0.0 }
0x10e0   :  { %3100 = vrot.lane.b32.xlu1 %v5005_v16, %s4639_s7 }
0x10e1   :  { %v5109_v9 = vpop.eup %4569 }
0x10e2   :  { %v3439_v13 = vsel %vm319_vm13, %v5109_v9, 0.0 }
0x10e9   :  { %2932 = vrot.lane.b32.xlu0 %v5005_v16, %s4636_s1 }
0x1104   :  { %2928 = vadd.xlane.f32.xlu1 %v2927_v6 }
0x1108   :  { %3096 = vadd.xlane.f32.xlu0 %v3095_v7  ;;  %3268 = vadd.xlane.f32.xlu1 %v3267_v8 }
0x110c   :  { %3440 = vadd.xlane.f32.xlu1 %v3439_v13 }
0x111d   :  { %3444 = vrot.lane.b32.xlu1 %v5005_v16, %s4638_s6 }
0x111e   :  { %3272 = vrot.lane.b32.xlu0 %v5005_v16, %s4637_s3 }
0x1150   :  { %v2246_v17 = vpop.xlane.xlu1 %2245 }
0x1151   :  { %4571 = vrcp.f32 %v2246_v17  ;;  %v2414_v18 = vpop.xlane.xlu0 %2413 }
0x1152   :  { %4573 = vrcp.f32 %v2414_v18 }
0x1158   :  { %v2586_v19 = vpop.xlane.xlu1 %2585 }
0x1159   :  { %4575 = vrcp.f32 %v2586_v19 }
0x115c   :  { %v2758_v20 = vpop.xlane.xlu0 %2757  ;;  %v3101_v28 = vpop.permute.xlu1 %3100 }
0x115d   :  { %4577 = vrcp.f32 %v2758_v20 }
0x115e   :  { %v4572_v21 = vpop.eup %4571 }
0x115f   :  { %v2248_v22 = vmul.f32 %v4572_v21, %v4556_v3  ;;  %v4574_v23 = vpop.eup %4573  ;;  %v3530_v21 = vrot.slane %v4973_v57, %v1698_v2 }
0x1160   :  { %v2416_v16 = vmul.f32 %v4574_v23, %v4558_v15  ;;  %v2933_v27 = vpop.permute.xlu0 %2932 }
0x1161   :  { %4356 = vmatmul.mubr.msk.f32.vlgmr.msra.gmra.mxu0 %vm319_vm13, %v2248_v22 }
0x1162   :  { %4364 = vmatpush3.msra.mxu0 %v5087_v24  ;;  %4365 = vmatprep.mubr.msk.f32.mxu0 %vm4628_vm12, %v4627_v14 }
0x1163   :  { %4373 = vmatprep.subr.mxu0 %v4627_v14 }
0x1165   :  { %4366 = vmatmul.mubr.msk.f32.vlgmr.msra.gmra.mxu0 %vm319_vm13, %v2416_v16 }
0x1166   :  { %v4576_v61 = vpop.eup %4575  ;;  %4374 = vmatpush3.msra.mxu0 %v2590_v4  ;;  %4375 = vmatprep.mubr.msk.f32.mxu0 %vm4628_vm12, %v4627_v14 }
0x1167   :  { %4383 = vmatprep.subr.mxu0 %v4627_v14  ;;  %v2588_v25 = vmul.f32 %v4576_v61, %v4560_v38 }
0x1169   :  { %4376 = vmatmul.mubr.msk.f32.vlgmr.msra.gmra.mxu0 %vm319_vm13, %v2588_v25 }
0x116a   :  { %v4578_v26 = vpop.eup %4577  ;;  %4384 = vmatpush3.msra.mxu0 %v2762_v10  ;;  %4385 = vmatprep.mubr.msk.f32.mxu0 %vm4628_vm12, %v4627_v14 }
0x116b   :  { %4393 = vmatprep.subr.mxu0 %v4627_v14  ;;  %v2760_v24 = vmul.f32 %v4578_v26, %v5092_v40 }
0x116d   :  { %4386 = vmatmul.mubr.msk.f32.vlgmr.msra.gmra.mxu0 %vm319_vm13, %v2760_v24 }
0x116e   :  { %4394 = vmatpush3.msra.mxu0 %v2933_v27  ;;  %4395 = vmatprep.mubr.msk.f32.mxu0 %vm4628_vm12, %v4627_v14 }
0x116f   :  { %4403 = vmatprep.subr.mxu0 %v4627_v14 }
0x118d   :  { %v2929_v29 = vpop.xlane.xlu1 %2928 }
0x118e   :  { %4579 = vrcp.f32 %v2929_v29 }
0x1191   :  { %v3097_v58 = vpop.xlane.xlu0 %3096  ;;  %v3269_v30 = vpop.xlane.xlu1 %3268 }
0x1192   :  { %4581 = vrcp.f32 %v3097_v58 }
0x1193   :  { %4583 = vrcp.f32 %v3269_v30 }
0x1195   :  { %v3441_v31 = vpop.xlane.xlu1 %3440  ;;  %v3273_v37 = vpop.permute.xlu0 %3272 }
0x1196   :  { %4585 = vrcp.f32 %v3441_v31 }
0x1199   :  { %v3445_v39 = vpop.permute.xlu1 %3444 }
0x119b   :  { %v4580_v32 = vpop.eup %4579 }
0x119c   :  { %v2931_v35 = vmul.f32 %v4580_v32, %v4564_v1  ;;  %v2056_v1 = vld [vmem:[#allocation3 + $0x140] sm:$0xff] }
0x119d   :  { %4434 = vmatprep.subr.mxu1 %v2056_v1 }
0x119e   :  { %4396 = vmatmul.mubr.msk.f32.vlgmr.msra.gmra.mxu0 %vm319_vm13, %v2931_v35  ;;  %4435 = vmatpush3.msra.mxu1 %v2056_v1  ;;  %v2070_v1 = vld [vmem:[#allocation3 + $0x1e0] sm:$0xff] }
0x119f   :  { %v4582_v36 = vpop.eup %4581  ;;  %4404 = vmatpush3.msra.mxu0 %v3101_v28  ;;  %4405 = vmatprep.mubr.msk.f32.mxu0 %vm4628_vm12, %v4627_v14 }
0x11a0   :  { %4413 = vmatprep.subr.mxu0 %v4627_v14  ;;  %v3099_v3 = vmul.f32 %v4582_v36, %v5100_v5  ;;  %v4584_v15 = vpop.eup %4583  ;;  %4450 = vmatprep.subr.mxu1 %v2073_v59 }
0x11a1   :  { %v3271_v51 = vmul.f32 %v4584_v15, %v5103_v0  ;;  %v2062_v15 = vld [vmem:[#allocation3 + $0x188] sm:$0xff] }
0x11a2   :  { %4406 = vmatmul.mubr.msk.f32.vlgmr.msra.gmra.mxu0 %vm319_vm13, %v3099_v3  ;;  %v2063_v3 = vld [vmem:[#allocation3 + $0x190] sm:$0xff] }
0x11a3   :  { %4414 = vmatpush3.msra.mxu0 %v3273_v37  ;;  %4415 = vmatprep.mubr.msk.f32.mxu0 %vm4628_vm12, %v4627_v14  ;;  %v4586_v38 = vpop.eup %4585  ;;  %v2061_v37 = vld [vmem:[#allocation3 + $0x180] sm:$0xff] }
0x11a4   :  { %4423 = vmatprep.subr.mxu0 %v4627_v14  ;;  %v3443_v40 = vmul.f32 %v4586_v38, %v5109_v9 }
0x11a6   :  { %4416 = vmatmul.mubr.msk.f32.vlgmr.msra.gmra.mxu0 %vm319_vm13, %v3271_v51 }
0x11a7   :  { %4424 = vmatpush3.msra.mxu0 %v3445_v39  ;;  %4425 = vmatprep.mubr.msk.f32.mxu0 %vm4628_vm12, %v4627_v14 }
0x11aa   :  { %4426 = vmatmul.mubr.msk.f32.vlgmr.msra.gmra.mxu0 %vm319_vm13, %v3443_v40 }
0x1221   :  { %v2321_v42 = vpop.f32.mrf.mxu0 }
0x1222   :  { %2325 = vst.msk [vmem:[#allocation2] sm:$0xff] %vm319_vm13, %v2321_v42 }
0x1223   :  { %v4357_v43 = vpop.f32.mrf.mxu0 }
0x1225   :  { %v2489_v41 = vpop.f32.mrf.mxu0 }
0x1226   :  { %2494 = vrot.lane.b32.xlu0 %v2489_v41, %s4623_s22  ;;  %v3643_v41 = vrot.slane %v4973_v57, %v1811_v33  ;;  %v2071_v33 = vld [vmem:[#allocation3 + $0x1e8] sm:$0xff] }
0x1227   :  { %v4367_v44 = vpop.f32.mrf.mxu0 }
0x1229   :  { %v2661_v45 = vpop.f32.mrf.mxu0 }
0x122a   :  { %2666 = vrot.lane.b32.xlu1 %v2661_v45, %s4640_s8 }
0x122b   :  { %v4377_v46 = vpop.f32.mrf.mxu0 }
0x122c   :  { %v3649_v46 = vrot.slane %v4973_v57, %v1817_v34  ;;  %v2069_v34 = vld [vmem:[#allocation3 + $0x1d8] sm:$0xff] }
0x122d   :  { %v2833_v47 = vpop.f32.mrf.mxu0 }
0x122e   :  { %2838 = vrot.lane.b32.xlu1 %v2833_v47, %s4641_s0 }
0x122f   :  { %v4387_v14 = vpop.f32.mrf.mxu0 }
0x125e   :  { %v3004_v48 = vpop.f32.mrf.mxu0 }
0x125f   :  { %3008 = vst.msk [vmem:[#allocation2 + $0x8] sm:$0xff] %vm319_vm13, %v3004_v48 }
0x1260   :  { %v4397_v55 = vpop.f32.mrf.mxu0 }
0x1262   :  { %v3172_v60 = vpop.f32.mrf.mxu0 }
0x1263   :  { %3177 = vrot.lane.b32.xlu0 %v3172_v60, %s4623_s22  ;;  %v2072_v60 = vld [vmem:[#allocation3 + $0x1f0] sm:$0xff] }
0x1264   :  { %v4407_v5 = vpop.f32.mrf.mxu0 }
0x1265   :  { %v2068_v5 = vld [vmem:[#allocation3 + $0x1d0] sm:$0xff] }
0x1266   :  { %v3344_v6 = vpop.f32.mrf.mxu0 }
0x1267   :  { %3349 = vrot.lane.b32.xlu0 %v3344_v6, %s4640_s8  ;;  %v2067_v6 = vld [vmem:[#allocation3 + $0x1c8] sm:$0xff] }
0x1268   :  { %v4417_v0 = vpop.f32.mrf.mxu0 }
0x1269   :  { %v2066_v0 = vld [vmem:[#allocation3 + $0x1c0] sm:$0xff] }
0x126a   :  { %v3516_v7 = vpop.f32.mrf.mxu0 }
0x126b   :  { %3521 = vrot.lane.b32.xlu1 %v3516_v7, %s4641_s0  ;;  %v3655_v7 = vrot.slane %v4973_v57, %v1823_v56 }
0x126c   :  { %v4427_v8 = vpop.f32.mrf.mxu0 }
0x1298   :  { %v2495_v9 = vpop.permute.xlu0 %2494 }
0x1299   :  { %2497 = vst.msk [vmem:[#allocation2] sm:$0xff] %vm659_vm14, %v2495_v9 }
0x129c   :  { %v2667_v13 = vpop.permute.xlu1 %2666 }
0x129d   :  { %2669 = vst.msk [vmem:[#allocation2] sm:$0xff] %vm832_vm15, %v2667_v13 }
0x12a0   :  { %v2839_v10 = vpop.permute.xlu1 %2838 }
0x12a1   :  { %2841 = vst.msk [vmem:[#allocation2] sm:$0xff] %vm1005_vm0, %v2839_v10 }
0x12a8   :  { %v3525_v4 = vld [vmem:[#allocation2] sm:$0xff] }
0x12a9   :  { %4436 = vmatprep.mubr.msk.f32.mxu1 %vm164_vm11, %v3525_v4 }
0x12d5   :  { %v3178_v17 = vpop.permute.xlu0 %3177 }
0x12d6   :  { %3180 = vst.msk [vmem:[#allocation2 + $0x8] sm:$0xff] %vm659_vm14, %v3178_v17 }
0x12d9   :  { %v3350_v18 = vpop.permute.xlu0 %3349 }
0x12da   :  { %3352 = vst.msk [vmem:[#allocation2 + $0x8] sm:$0xff] %vm832_vm15, %v3350_v18 }
0x12dd   :  { %v3522_v19 = vpop.permute.xlu1 %3521 }
0x12de   :  { %3524 = vst.msk [vmem:[#allocation2 + $0x8] sm:$0xff] %vm1005_vm0, %v3522_v19 }
0x12e5   :  { %v3526_v20 = vld [vmem:[#allocation2 + $0x8] sm:$0xff] }
0x12e6   :  { %4437 = vmatmul.mubr.msk.f32.vlgmr.msra.gmra.mxu1 %vm164_vm11, %v3526_v20 }
0x12e7   :  { %4451 = vmatpush3.msra.mxu1 %v2073_v59 }
0x12e8   :  { %4452 = vmatprep.subr.mxu1 %v2072_v60 }
0x12e9   :  { %4453 = vmatpush3.msra.mxu1 %v2072_v60 }
0x12ea   :  { %4454 = vmatprep.subr.mxu1 %v2071_v33 }
0x12eb   :  { %4455 = vmatpush3.msra.mxu1 %v2071_v33 }
0x12ec   :  { %4456 = vmatprep.subr.mxu1 %v2070_v1 }
0x12ed   :  { %4457 = vmatpush3.msra.mxu1 %v2070_v1 }
0x12ee   :  { %4458 = vmatprep.subr.mxu1 %v2069_v34 }
0x12ef   :  { %4459 = vmatpush3.msra.mxu1 %v2069_v34 }
0x12f0   :  { %4460 = vmatprep.subr.mxu1 %v2068_v5 }
0x12f1   :  { %4461 = vmatpush3.msra.mxu1 %v2068_v5 }
0x12f2   :  { %4462 = vmatprep.subr.mxu1 %v2067_v6 }
0x12f3   :  { %4463 = vmatpush3.msra.mxu1 %v2067_v6 }
0x12f4   :  { %4464 = vmatprep.subr.mxu1 %v2066_v0 }
0x12f5   :  { %4465 = vmatpush3.msra.mxu1 %v2066_v0 }
0x13a6   :  { %v4438_v22 = vpop.f32.mrf.mxu1 }
0x13a7   :  { %v3609_v23 = vadd.f32 %v4438_v22, %v3530_v21 }
0x13a8   :  { %v3603_v16 = vpop.f32.mrf.mxu1 }
0x13a9   :  { %v3613_v61 = vadd.f32 %v3609_v23, %v4981_v12  ;;  %v3604_v25 = vadd.f32 %v3603_v16, %v3530_v21 }
0x13ab   :  { %v3612_v26 = vadd.f32 %v3604_v25, %v4979_v11  ;;  %v3617_v24 = vsel %vm164_vm11, %v3613_v61, 0.0  ;;  %v2064_v11 = vld [vmem:[#allocation3 + $0x198] sm:$0xff] }
0x13ac   :  { %3618 = vadd.xlane.f32.xlu1 %v3617_v24  ;;  %4439 = vmatprep.subr.mxu0 %v2064_v11 }
0x13ad   :  { %v3614_v27 = vsel %vm164_vm11, %v3612_v26, 0.0  ;;  %4440 = vmatpush3.msra.mxu0 %v2064_v11 }
0x13ae   :  { %3615 = vadd.xlane.f32.xlu0 %v3614_v27  ;;  %4441 = vmatprep.subr.mxu0 %v2063_v3 }
0x13af   :  { %4442 = vmatpush3.msra.mxu0 %v2063_v3 }
0x13b0   :  { %4443 = vmatprep.subr.mxu0 %v2062_v15 }
0x13b1   :  { %4444 = vmatpush3.msra.mxu0 %v2062_v15 }
0x13b2   :  { %4445 = vmatprep.subr.mxu0 %v2061_v37 }
0x13b3   :  { %4446 = vmatpush3.msra.mxu0 %v2061_v37 }
0x1435   :  { %v3619_v28 = vpop.xlane.xlu1 %3618 }
0x1436   :  { %v3621_v29 = vmul.f32 0.03125, %v3619_v28 }
0x1437   :  { %v3616_v58 = vpop.xlane.xlu0 %3615 }
0x1438   :  { %v3620_v30 = vmul.f32 0.03125, %v3616_v58  ;;  %v3623_v31 = vsub.f32 %v3613_v61, %v3621_v29 }
0x143a   :  { %v3622_v2 = vsub.f32 %v3612_v26, %v3620_v30  ;;  %v3625_v36 = vmul.f32 %v3623_v31, %v3623_v31  ;;  %v3758_v30 = vrot.slane %v4973_v57, %v1926_v62 }
0x143c   :  { %v3624_v32 = vmul.f32 %v3622_v2, %v3622_v2  ;;  %v3629_v12 = vsel %vm164_vm11, %v3625_v36, 0.0 }
0x143e   :  { %v3626_v35 = vsel %vm164_vm11, %v3624_v32, 0.0 }
0x143f   :  { %3627 = vadd.xlane.f32.xlu0 %v3626_v35 }
0x1443   :  { %3630 = vadd.xlane.f32.xlu0 %v3629_v12 }
0x14c8   :  { %v3628_v51 = vpop.xlane.xlu0 %3627 }
0x14c9   :  { %v3632_v38 = vmul.f32 0.03125, %v3628_v51 }
0x14cb   :  { %v3634_v39 = vadd.f32 1e-12, %v3632_v38 }
0x14cc   :  { %v3631_v40 = vpop.xlane.xlu0 %3630 }
0x14cd   :  { %4587 = vrsqrt.f32 %v3634_v39  ;;  %v3633_v42 = vmul.f32 0.03125, %v3631_v40 }
0x14cf   :  { %v3635_v43 = vadd.f32 1e-12, %v3633_v42 }
0x14d1   :  { %4589 = vrsqrt.f32 %v3635_v43  ;;  %v3884_v43 = vld [vmem:[#allocation3 + $0x218] sm:$0xff] }
0x14d2   :  { %4469 = vmatprep.subr.mxu0 %v3884_v43 }
0x14da   :  { %v4588_v44 = vpop.eup %4587 }
0x14db   :  { %v3638_v45 = vmul.f32 %v4588_v44, %v3622_v2  ;;  %v3882_v44 = vld [vmem:[#allocation3 + $0x208] sm:$0xff] }
0x14dd   :  { %v3644_v47 = vmul.f32 %v3643_v41, %v3638_v45  ;;  %v3881_v45 = vld [vmem:[#allocation3 + $0x200] sm:$0xff] }
0x14de   :  { %v4590_v14 = vpop.eup %4589 }
0x14df   :  { %v3639_v48 = vmul.f32 %v4590_v14, %v3623_v31  ;;  %v3650_v52 = vadd.f32 %v3649_v46, %v3644_v47 }
0x14e1   :  { %v3645_v53 = vmul.f32 %v3643_v41, %v3639_v48  ;;  %4447 = vmatprep.mubr.msk.f32.mxu0 %vm164_vm11, %v3650_v52  ;;  %v3883_v41 = vld [vmem:[#allocation3 + $0x210] sm:$0xff] }
0x14e3   :  { %v3651_v55 = vadd.f32 %v3649_v46, %v3645_v53 }
0x14e5   :  { %4448 = vmatmul.mubr.msk.f32.vlgmr.msra.gmra.mxu0 %vm164_vm11, %v3651_v55 }
0x14e6   :  { %4470 = vmatpush3.msra.mxu0 %v3884_v43 }
0x14e7   :  { %4471 = vmatprep.subr.mxu0 %v3883_v41 }
0x14e8   :  { %4472 = vmatpush3.msra.mxu0 %v3883_v41 }
0x14e9   :  { %4473 = vmatprep.subr.mxu0 %v3882_v44 }
0x14ea   :  { %4474 = vmatpush3.msra.mxu0 %v3882_v44 }
0x14eb   :  { %4475 = vmatprep.subr.mxu0 %v3881_v45 }
0x14ec   :  { %4476 = vmatpush3.msra.mxu0 %v3881_v45 }
0x15a5   :  { %v4449_v8 = vpop.f32.mrf.mxu0 }
0x15a6   :  { %v3734_v9 = vadd.f32 %v4449_v8, %v3655_v7 }
0x15a7   :  { %v3728_v13 = vpop.f32.mrf.mxu0 }
0x15a8   :  { %v3740_v10 = vmul.f32 0.044715, %v3734_v9  ;;  %v3729_v4 = vadd.f32 %v3728_v13, %v3655_v7  ;;  %v3738_v28 = vmul.f32 0.5, %v3734_v9 }
0x15aa   :  { %v3742_v17 = vmul.f32 %v3740_v10, %v3734_v9  ;;  %v3739_v18 = vmul.f32 0.044715, %v3729_v4  ;;  %v3737_v56 = vmul.f32 0.5, %v3729_v4 }
0x15ac   :  { %v3744_v19 = vmul.f32 %v3742_v17, %v3734_v9  ;;  %v3741_v20 = vmul.f32 %v3739_v18, %v3729_v4 }
0x15ae   :  { %v3746_v21 = vadd.f32 %v3744_v19, %v3734_v9  ;;  %v3743_v22 = vmul.f32 %v3741_v20, %v3729_v4 }
0x15b0   :  { %v3748_v23 = vmul.f32 0.7978846, %v3746_v21  ;;  %v3745_v16 = vadd.f32 %v3743_v22, %v3729_v4 }
0x15b2   :  { %4591 = vtanh.f32 %v3748_v23  ;;  %v3747_v61 = vmul.f32 0.7978846, %v3745_v16 }
0x15b4   :  { %4593 = vtanh.f32 %v3747_v61 }
0x15bf   :  { %v4592_v25 = vpop.eup %4591 }
0x15c0   :  { %v3752_v24 = vadd.f32 1.0, %v4592_v25 }
0x15c1   :  { %v4594_v26 = vpop.eup %4593 }
0x15c2   :  { %v3751_v27 = vadd.f32 1.0, %v4594_v26  ;;  %v3754_v58 = vmul.f32 %v3752_v24, %v3738_v28 }
0x15c4   :  { %v3753_v29 = vmul.f32 %v3751_v27, %v3737_v56 }
0x15c6   :  { %4466 = vmatprep.mubr.msk.f32.mxu1 %vm1928_vm1, %v3753_v29 }
0x15c7   :  { %4467 = vmatmul.mubr.msk.f32.vlgmr.msra.gmra.mxu1 %vm1928_vm1, %v3754_v58 }
0x1687   :  { %v4468_v31 = vpop.f32.mrf.mxu1 }
0x1688   :  { %v3837_v2 = vadd.f32 %v4468_v31, %v3758_v30 }
0x1689   :  { %v3831_v32 = vpop.f32.mrf.mxu1 }
0x168a   :  { %v3841_v35 = vadd.f32 %v3837_v2, %v3651_v55  ;;  %v3832_v36 = vadd.f32 %v3831_v32, %v3758_v30  ;;  %v36_v55 = vld [vmem:[%s5213_s4 + $0x10] sm:$0xff] }
0x168b   :  { %v3871_v60 = vrot.slane %v36_v55, %v4720_v50  ;;  %v3877_v6 = vrot.slane %v36_v55, %v4730_v54  ;;  %v3888_v9 = vrot.slane %v36_v55, %v4747_v63 }
0x168c   :  { %v3840_v12 = vadd.f32 %v3832_v36, %v3650_v52  ;;  %v3845_v11 = vsel %vm164_vm11, %v3841_v35, 0.0 }
0x168d   :  { %3846 = vadd.xlane.f32.xlu0 %v3845_v11 }
0x168e   :  { %v3842_v3 = vsel %vm164_vm11, %v3840_v12, 0.0 }
0x168f   :  { %3843 = vadd.xlane.f32.xlu1 %v3842_v3 }
0x1716   :  { %v3847_v15 = vpop.xlane.xlu0 %3846 }
0x1717   :  { %v3849_v37 = vmul.f32 0.03125, %v3847_v15 }
0x1718   :  { %v3844_v51 = vpop.xlane.xlu1 %3843 }
0x1719   :  { %v3851_v38 = vsub.f32 %v3841_v35, %v3849_v37  ;;  %v3848_v39 = vmul.f32 0.03125, %v3844_v51 }
0x171b   :  { %v3850_v49 = vsub.f32 %v3840_v12, %v3848_v39  ;;  %v3853_v40 = vmul.f32 %v3851_v38, %v3851_v38 }
0x171d   :  { %v3857_v62 = vsel %vm164_vm11, %v3853_v40, 0.0  ;;  %v3852_v57 = vmul.f32 %v3850_v49, %v3850_v49 }
0x171e   :  { %3858 = vadd.xlane.f32.xlu0 %v3857_v62 }
0x171f   :  { %v3854_v42 = vsel %vm164_vm11, %v3852_v57, 0.0 }
0x1720   :  { %3855 = vadd.xlane.f32.xlu1 %v3854_v42 }
0x17a7   :  { %v3859_v46 = vpop.xlane.xlu0 %3858 }
0x17a8   :  { %v3861_v47 = vmul.f32 0.03125, %v3859_v46 }
0x17a9   :  { %v3856_v14 = vpop.xlane.xlu1 %3855 }
0x17aa   :  { %v3863_v48 = vadd.f32 1e-12, %v3861_v47  ;;  %v3860_v52 = vmul.f32 0.03125, %v3856_v14 }
0x17ac   :  { %4595 = vrsqrt.f32 %v3863_v48  ;;  %v3862_v53 = vadd.f32 1e-12, %v3860_v52 }
0x17ae   :  { %4597 = vrsqrt.f32 %v3862_v53 }
0x17b9   :  { %v4596_v59 = vpop.eup %4595 }
0x17ba   :  { %v3867_v33 = vmul.f32 %v4596_v59, %v3851_v38 }
0x17bb   :  { %v4598_v1 = vpop.eup %4597 }
0x17bc   :  { %v3866_v34 = vmul.f32 %v4598_v1, %v3850_v49  ;;  %v3873_v5 = vmul.f32 %v3871_v60, %v3867_v33 }
0x17be   :  { %v3872_v0 = vmul.f32 %v3871_v60, %v3866_v34  ;;  %v3879_v8 = vadd.f32 %v3877_v6, %v3873_v5 }
0x17c0   :  { %v3878_v7 = vadd.f32 %v3877_v6, %v3872_v0 }
0x17c2   :  { %4477 = vmatprep.mubr.msk.f32.mxu0 %vm164_vm11, %v3878_v7 }
0x17c3   :  { %4478 = vmatmul.mubr.msk.f32.vlgmr.msra.gmra.mxu0 %vm164_vm11, %v3879_v8 }
0x1883   :  { %v4479_v13 = vpop.f32.mrf.mxu0 }
0x1884   :  { %v3967_v10 = vadd.f32 %v4479_v13, %v3888_v9 }
0x1885   :  { %v3961_v4 = vpop.f32.mrf.mxu0 }
0x1886   :  { %3971 = vst [vmem:[%s5214_s5 + $0x8] sm:$0xff] %v3967_v10  ;;  %v3962_v50 = vadd.f32 %v3961_v4, %v3888_v9 }
0x1888   :  { %3970 = vst [vmem:[%s5214_s5] sm:$0xff] %v3962_v50 }
0x1889   :  { %3976 = vsyncpa [#allocation4], 1 }

</bundles_post_ra>
